<compile_context>
chip_gen: v6e
topology: v6e:2x2x1
jax: 0.10.0
libtpu: 0.0.40
codegen_flags: <defaults>
</compile_context>

<pallas_src>
import functools

import jax
import jax.numpy as jnp
from jax.experimental import pallas as pl
from jax.experimental.pallas import tpu as pltpu


def nn_batch_kernel(cause_ref, noise_ref, w1c_ref, w1n_ref, b1_ref,
                    w2_ref, b2_ref, w3_ref, b3_ref, o_ref,
                    *, inst_per_step, outdim):
    """One grid step processes `inst_per_step` independent NN instances.

    Block shapes (G = inst_per_step, N = batch, F = indim(+indim2), H = hidden,
    O = outdim):
      cause_ref (G,N,F)  noise_ref (G,N,1)
      w1c_ref (G,F,H)  w1n_ref (G,1,H)  b1_ref (G,1,H)
      w2_ref  (G,H,H)  b2_ref  (G,1,H)
      w3_ref  (G,H,O)  b3_ref  (G,1,O)
      o_ref   (N, G*O)   <- lane-dense output block (G*O is a multiple of 128
                            for the default outdim=8)
    """
    n = cause_ref.shape[1]
    inv_nm1 = 1.0 / float(n - 1)  # torch.std default: unbiased (ddof=1)

    # Static unrolled loop over the instances in this group; each instance is
    # a handful of tiny matmuls (K <= 10), so the MXU shape is irrelevant and
    # the win is amortizing launch/DMA/store overhead across instances.
    for g in range(inst_per_step):
        c = cause_ref[g]        # (N, F)
        nz = noise_ref[g]       # (N, 1)

        # Linear 1 on the virtual concat [cause | noise]:
        #   concat(c, nz) @ W1 == c @ W1[:F] + nz * W1[F]  (rank-1 term)
        h = jnp.dot(c, w1c_ref[g], preferred_element_type=jnp.float32)
        h = h + nz * w1n_ref[g] + b1_ref[g]
        h = jnp.maximum(h, 0.0)

        # Hidden Linear + ReLU (nlayers = 1, the module default)
        h = jnp.dot(h, w2_ref[g], preferred_element_type=jnp.float32) + b2_ref[g]
        h = jnp.maximum(h, 0.0)

        # Output Linear
        eff = jnp.dot(h, w3_ref[g], preferred_element_type=jnp.float32) + b3_ref[g]

        # scale_tensor: (x - mean) / (std + 1e-5), std unbiased over batch dim
        mean = jnp.mean(eff, axis=0, keepdims=True)
        cen = eff - mean
        var = jnp.sum(cen * cen, axis=0, keepdims=True) * inv_nm1
        std = jnp.sqrt(var)
        out = cen * pl.reciprocal(std + 1e-5, approx=False)

        # Static-sliced write into the lane-dense output block.
        o_ref[:, g * outdim:(g + 1) * outdim] = out


def nn_forward_batched(cause, noise, w1, b1, w2, b2, w3, b3, *, inst_per_step=None):
    """Forward of many independent NN instances in one pallas_call.

    cause: (T, N, indim[+indim2])  float32  (cause2, if any, pre-concatenated)
    noise: (T, N, 1)               float32  (the per-instance noise column)
    w1:    (T, indim+1+indim2, H)  b1: (T, 1, H)
    w2:    (T, H, H)               b2: (T, 1, H)
    w3:    (T, H, O)               b3: (T, 1, O)
    returns (T, N, O) float32
    """
    T, N, indim = cause.shape
    H = w1.shape[2]
    O = w3.shape[2]
    assert N >= 2, "unbiased std needs at least 2 samples per instance"
    assert w1.shape[1] == indim + 1, "w1 fan_in must be indim(+indim2)+1"

    # Pick an instance-group size so each output block is lane-dense (>=128).
    if inst_per_step is None:
        if 128 % O == 0 and T >= 128 // O and T % (128 // O) == 0:
            inst_per_step = 128 // O
        else:
            inst_per_step = T  # single full-width step; block == full array
    G = inst_per_step
    assert T % G == 0, "num_instances must be a multiple of inst_per_step"

    # Split the first-layer weight into its cause rows and its noise row once,
    # on the host side, so the kernel never needs a concatenated input in HBM.
    w1c = w1[:, :indim, :]          # (T, indim, H)
    w1n = w1[:, indim:indim + 1, :]  # (T, 1, H)

    def inst_spec(tail_shape):
        # Only the instance axis is blocked; trailing dims are full-extent.
        return pl.BlockSpec((G,) + tail_shape, lambda i: (i, 0, 0))

    out = pl.pallas_call(
        functools.partial(nn_batch_kernel, inst_per_step=G, outdim=O),
        out_shape=jax.ShapeDtypeStruct((N, T * O), jnp.float32),
        grid=(T // G,),
        in_specs=[
            inst_spec((N, indim)),   # cause
            inst_spec((N, 1)),       # noise
            inst_spec((indim, H)),   # w1 (cause rows)
            inst_spec((1, H)),       # w1 (noise row)
            inst_spec((1, H)),       # b1
            inst_spec((H, H)),       # w2
            inst_spec((1, H)),       # b2
            inst_spec((H, O)),       # w3
            inst_spec((1, O)),       # b3
        ],
        out_specs=pl.BlockSpec((N, G * O), lambda i: (0, i)),
        compiler_params=pltpu.CompilerParams(
            dimension_semantics=("parallel",)),
    )(cause, noise, w1c, w1n, b1, w2, b2, w3, b3)

    # (N, T*O) -> (T, N, O): column block t*O:(t+1)*O holds instance t.
    return out.reshape(N, T, O).transpose(1, 0, 2)


if __name__ == "__main__":
    # Module defaults: indim=8, outdim=8, indim2=0, hdlayers=10, nlayers=1.
    indim, outdim, indim2, hdlayers = 8, 8, 0, 10
    batch = 32            # samples per synthetic dataset
    num_instances = 64    # independent NN instances batched into one call

    root = jax.random.PRNGKey(0)
    k_par, k_cause, k_noise = jax.random.split(root, 3)
    in_features = indim + 1 + indim2

    def linear_init(k, fan_in, fan_out, n):
        # PyTorch nn.Linear default init: U(-1/sqrt(fan_in), 1/sqrt(fan_in)).
        kw, kb = jax.random.split(k)
        bound = 1.0 / jnp.sqrt(float(fan_in))
        w = jax.random.uniform(kw, (n, fan_in, fan_out), jnp.float32, -bound, bound)
        b = jax.random.uniform(kb, (n, 1, fan_out), jnp.float32, -bound, bound)
        return w, b

    k1, k2, k3 = jax.random.split(k_par, 3)
    w1, b1 = linear_init(k1, in_features, hdlayers, num_instances)
    w2, b2 = linear_init(k2, hdlayers, hdlayers, num_instances)  # nlayers = 1
    w3, b3 = linear_init(k3, hdlayers, outdim, num_instances)

    cause = jax.random.normal(k_cause, (num_instances, batch, indim), jnp.float32)
    # normal_noise: 0.1 * rand(1) * randn(N, 1), one fresh draw per instance.
    # TODO(synk): could be generated in-kernel with pltpu.prng_seed /
    # stateful_normal; kept host-side so the pure-JAX reference check is exact.
    ks, kn = jax.random.split(k_noise)
    scale = 0.1 * jax.random.uniform(ks, (num_instances, 1, 1), jnp.float32)
    noise = scale * jax.random.normal(kn, (num_instances, batch, 1), jnp.float32)

    out = nn_forward_batched(cause, noise, w1, b1, w2, b2, w3, b3)
    out = jax.block_until_ready(out)

    # Pure-JAX reference of the same math (concat + MLP + scale_tensor).
    hp = jax.lax.Precision.HIGHEST
    x = jnp.concatenate([cause, noise], axis=-1)  # (T, N, indim+1)
    h = jnp.maximum(jnp.einsum('tnf,tfh->tnh', x, w1, precision=hp) + b1, 0.0)
    h = jnp.maximum(jnp.einsum('tnh,thk->tnk', h, w2, precision=hp) + b2, 0.0)
    eff = jnp.einsum('tnh,tho->tno', h, w3, precision=hp) + b3
    m = eff.mean(1, keepdims=True)
    s = jnp.sqrt(((eff - m) ** 2).sum(1, keepdims=True) / (batch - 1))
    ref = (eff - m) / (s + 1e-5)

    assert out.shape == (num_instances, batch, outdim)
    err = float(jnp.max(jnp.abs(out - ref)))
    assert jnp.allclose(out, ref, atol=1e-4, rtol=1e-4), f"max abs err = {err}"
    print("KERNEL_OK")
</pallas_src>

<mosaic_0001>
module attributes {stable_mosaic.version = 11 : i64} {
  func.func @nn_batch_kernel(%arg0: i32, %arg1: memref<16x32x8xf32, #tpu.memory_space<vmem>>, %arg2: memref<16x32x1xf32, #tpu.memory_space<vmem>>, %arg3: memref<16x8x10xf32, #tpu.memory_space<vmem>>, %arg4: memref<16x1x10xf32, #tpu.memory_space<vmem>>, %arg5: memref<16x1x10xf32, #tpu.memory_space<vmem>>, %arg6: memref<16x10x10xf32, #tpu.memory_space<vmem>>, %arg7: memref<16x1x10xf32, #tpu.memory_space<vmem>>, %arg8: memref<16x10x8xf32, #tpu.memory_space<vmem>>, %arg9: memref<16x1x8xf32, #tpu.memory_space<vmem>>, %arg10: memref<32x128xf32, #tpu.memory_space<vmem>>) attributes {dimension_semantics = [#tpu.dimension_semantics<parallel>], iteration_bounds = array<i64: 4>, scalar_prefetch = 0 : i64, scratch_operands = 0 : i64, tpu.core_type = #tpu.core_type<tc>, window_params = [{transform_indices = @transform_0, window_bounds = array<i64: 16, 32, 8>}, {transform_indices = @transform_1, window_bounds = array<i64: 16, 32, 1>}, {transform_indices = @transform_2, window_bounds = array<i64: 16, 8, 10>}, {transform_indices = @transform_3, window_bounds = array<i64: 16, 1, 10>}, {transform_indices = @transform_4, window_bounds = array<i64: 16, 1, 10>}, {transform_indices = @transform_5, window_bounds = array<i64: 16, 10, 10>}, {transform_indices = @transform_6, window_bounds = array<i64: 16, 1, 10>}, {transform_indices = @transform_7, window_bounds = array<i64: 16, 10, 8>}, {transform_indices = @transform_8, window_bounds = array<i64: 16, 1, 8>}, {transform_indices = @transform_9, window_bounds = array<i64: 32, 128>}]} {
    %c0 = arith.constant 0 : index
    %c0_0 = arith.constant 0 : index
    %c0_1 = arith.constant 0 : index
    %0 = vector.load %arg1[%c0, %c0_0, %c0_1] : memref<16x32x8xf32, #tpu.memory_space<vmem>>, vector<1x32x8xf32>
    %1 = vector.shape_cast %0 : vector<1x32x8xf32> to vector<32x8xf32>
    %c0_2 = arith.constant 0 : index
    %c0_3 = arith.constant 0 : index
    %c0_4 = arith.constant 0 : index
    %2 = vector.load %arg2[%c0_2, %c0_3, %c0_4] : memref<16x32x1xf32, #tpu.memory_space<vmem>>, vector<1x32x1xf32>
    %3 = vector.shape_cast %2 : vector<1x32x1xf32> to vector<32x1xf32>
    %c0_5 = arith.constant 0 : index
    %c0_6 = arith.constant 0 : index
    %c0_7 = arith.constant 0 : index
    %4 = vector.load %arg3[%c0_5, %c0_6, %c0_7] : memref<16x8x10xf32, #tpu.memory_space<vmem>>, vector<1x8x10xf32>
    %5 = vector.shape_cast %4 : vector<1x8x10xf32> to vector<8x10xf32>
    %cst = arith.constant dense<0.000000e+00> : vector<32x10xf32>
    %6 = tpu.matmul %1, %5, %cst {dimension_numbers = #tpu.dot_dimension_numbers<[1], [0], [0], [1], [0, 0, 1, 1], [], []>} : vector<32x8xf32>, vector<8x10xf32>, vector<32x10xf32> -> vector<32x10xf32>
    %c0_8 = arith.constant 0 : index
    %c0_9 = arith.constant 0 : index
    %c0_10 = arith.constant 0 : index
    %7 = vector.load %arg4[%c0_8, %c0_9, %c0_10] : memref<16x1x10xf32, #tpu.memory_space<vmem>>, vector<1x1x10xf32>
    %8 = vector.shape_cast %7 : vector<1x1x10xf32> to vector<1x10xf32>
    %9 = vector.broadcast %3 : vector<32x1xf32> to vector<32x10xf32>
    %10 = vector.broadcast %8 : vector<1x10xf32> to vector<32x10xf32>
    %11 = arith.mulf %9, %10 : vector<32x10xf32>
    %12 = arith.addf %6, %11 : vector<32x10xf32>
    %c0_11 = arith.constant 0 : index
    %c0_12 = arith.constant 0 : index
    %c0_13 = arith.constant 0 : index
    %13 = vector.load %arg5[%c0_11, %c0_12, %c0_13] : memref<16x1x10xf32, #tpu.memory_space<vmem>>, vector<1x1x10xf32>
    %14 = vector.shape_cast %13 : vector<1x1x10xf32> to vector<1x10xf32>
    %15 = vector.broadcast %14 : vector<1x10xf32> to vector<32x10xf32>
    %16 = arith.addf %12, %15 : vector<32x10xf32>
    %cst_14 = arith.constant 0.000000e+00 : f32
    %17 = vector.broadcast %cst_14 : f32 to vector<32x10xf32>
    %18 = arith.maximumf %16, %17 : vector<32x10xf32>
    %c0_15 = arith.constant 0 : index
    %c0_16 = arith.constant 0 : index
    %c0_17 = arith.constant 0 : index
    %19 = vector.load %arg6[%c0_15, %c0_16, %c0_17] : memref<16x10x10xf32, #tpu.memory_space<vmem>>, vector<1x10x10xf32>
    %20 = vector.shape_cast %19 : vector<1x10x10xf32> to vector<10x10xf32>
    %cst_18 = arith.constant dense<0.000000e+00> : vector<32x10xf32>
    %21 = tpu.matmul %18, %20, %cst_18 {dimension_numbers = #tpu.dot_dimension_numbers<[1], [0], [0], [1], [0, 0, 1, 1], [], []>} : vector<32x10xf32>, vector<10x10xf32>, vector<32x10xf32> -> vector<32x10xf32>
    %c0_19 = arith.constant 0 : index
    %c0_20 = arith.constant 0 : index
    %c0_21 = arith.constant 0 : index
    %22 = vector.load %arg7[%c0_19, %c0_20, %c0_21] : memref<16x1x10xf32, #tpu.memory_space<vmem>>, vector<1x1x10xf32>
    %23 = vector.shape_cast %22 : vector<1x1x10xf32> to vector<1x10xf32>
    %24 = vector.broadcast %23 : vector<1x10xf32> to vector<32x10xf32>
    %25 = arith.addf %21, %24 : vector<32x10xf32>
    %cst_22 = arith.constant 0.000000e+00 : f32
    %26 = vector.broadcast %cst_22 : f32 to vector<32x10xf32>
    %27 = arith.maximumf %25, %26 : vector<32x10xf32>
    %c0_23 = arith.constant 0 : index
    %c0_24 = arith.constant 0 : index
    %c0_25 = arith.constant 0 : index
    %28 = vector.load %arg8[%c0_23, %c0_24, %c0_25] : memref<16x10x8xf32, #tpu.memory_space<vmem>>, vector<1x10x8xf32>
    %29 = vector.shape_cast %28 : vector<1x10x8xf32> to vector<10x8xf32>
    %cst_26 = arith.constant dense<0.000000e+00> : vector<32x8xf32>
    %30 = tpu.matmul %27, %29, %cst_26 {dimension_numbers = #tpu.dot_dimension_numbers<[1], [0], [0], [1], [0, 0, 1, 1], [], []>} : vector<32x10xf32>, vector<10x8xf32>, vector<32x8xf32> -> vector<32x8xf32>
    %c0_27 = arith.constant 0 : index
    %c0_28 = arith.constant 0 : index
    %c0_29 = arith.constant 0 : index
    %31 = vector.load %arg9[%c0_27, %c0_28, %c0_29] : memref<16x1x8xf32, #tpu.memory_space<vmem>>, vector<1x1x8xf32>
    %32 = vector.shape_cast %31 : vector<1x1x8xf32> to vector<1x8xf32>
    %33 = vector.broadcast %32 : vector<1x8xf32> to vector<32x8xf32>
    %34 = arith.addf %30, %33 : vector<32x8xf32>
    %cst_30 = arith.constant dense<0.000000e+00> : vector<8xf32>
    %35 = vector.multi_reduction <add>, %34, %cst_30 [0] : vector<32x8xf32> to vector<8xf32>
    %36 = vector.shape_cast %35 : vector<8xf32> to vector<1x8xf32>
    %cst_31 = arith.constant 3.200000e+01 : f32
    %37 = vector.broadcast %cst_31 : f32 to vector<1x8xf32>
    %38 = arith.divf %36, %37 : vector<1x8xf32>
    %39 = vector.broadcast %38 : vector<1x8xf32> to vector<32x8xf32>
    %40 = arith.subf %34, %39 : vector<32x8xf32>
    %41 = arith.mulf %40, %40 : vector<32x8xf32>
    %cst_32 = arith.constant dense<0.000000e+00> : vector<8xf32>
    %42 = vector.multi_reduction <add>, %41, %cst_32 [0] : vector<32x8xf32> to vector<8xf32>
    %43 = vector.shape_cast %42 : vector<8xf32> to vector<1x8xf32>
    %cst_33 = arith.constant 0.0322580636 : f32
    %44 = vector.broadcast %cst_33 : f32 to vector<1x8xf32>
    %45 = arith.mulf %43, %44 : vector<1x8xf32>
    %46 = math.sqrt %45 : vector<1x8xf32>
    %cst_34 = arith.constant 9.99999974E-6 : f32
    %47 = vector.broadcast %cst_34 : f32 to vector<1x8xf32>
    %48 = arith.addf %46, %47 : vector<1x8xf32>
    %49 = tpu.reciprocal %48 : vector<1x8xf32> -> vector<1x8xf32>
    %50 = vector.broadcast %49 : vector<1x8xf32> to vector<32x8xf32>
    %51 = arith.mulf %40, %50 : vector<32x8xf32>
    %c0_35 = arith.constant 0 : index
    %c0_36 = arith.constant 0 : index
    %52 = vector.load %arg10[%c0_35, %c0_36] : memref<32x128xf32, #tpu.memory_space<vmem>>, vector<32x8xf32>
    tpu.vector_store %arg10[%c0_35, %c0_36], %51 {strides = array<i32>} : memref<32x128xf32, #tpu.memory_space<vmem>>, vector<32x8xf32>,
    %c1 = arith.constant 1 : index
    %c0_37 = arith.constant 0 : index
    %c0_38 = arith.constant 0 : index
    %53 = vector.load %arg1[%c1, %c0_37, %c0_38] : memref<16x32x8xf32, #tpu.memory_space<vmem>>, vector<1x32x8xf32>
    %54 = vector.shape_cast %53 : vector<1x32x8xf32> to vector<32x8xf32>
    %c1_39 = arith.constant 1 : index
    %c0_40 = arith.constant 0 : index
    %c0_41 = arith.constant 0 : index
    %55 = vector.load %arg2[%c1_39, %c0_40, %c0_41] : memref<16x32x1xf32, #tpu.memory_space<vmem>>, vector<1x32x1xf32>
    %56 = vector.shape_cast %55 : vector<1x32x1xf32> to vector<32x1xf32>
    %c1_42 = arith.constant 1 : index
    %c0_43 = arith.constant 0 : index
    %c0_44 = arith.constant 0 : index
    %57 = vector.load %arg3[%c1_42, %c0_43, %c0_44] : memref<16x8x10xf32, #tpu.memory_space<vmem>>, vector<1x8x10xf32>
    %58 = vector.shape_cast %57 : vector<1x8x10xf32> to vector<8x10xf32>
    %cst_45 = arith.constant dense<0.000000e+00> : vector<32x10xf32>
    %59 = tpu.matmul %54, %58, %cst_45 {dimension_numbers = #tpu.dot_dimension_numbers<[1], [0], [0], [1], [0, 0, 1, 1], [], []>} : vector<32x8xf32>, vector<8x10xf32>, vector<32x10xf32> -> vector<32x10xf32>
    %c1_46 = arith.constant 1 : index
    %c0_47 = arith.constant 0 : index
    %c0_48 = arith.constant 0 : index
    %60 = vector.load %arg4[%c1_46, %c0_47, %c0_48] : memref<16x1x10xf32, #tpu.memory_space<vmem>>, vector<1x1x10xf32>
    %61 = vector.shape_cast %60 : vector<1x1x10xf32> to vector<1x10xf32>
    %62 = vector.broadcast %56 : vector<32x1xf32> to vector<32x10xf32>
    %63 = vector.broadcast %61 : vector<1x10xf32> to vector<32x10xf32>
    %64 = arith.mulf %62, %63 : vector<32x10xf32>
    %65 = arith.addf %59, %64 : vector<32x10xf32>
    %c1_49 = arith.constant 1 : index
    %c0_50 = arith.constant 0 : index
    %c0_51 = arith.constant 0 : index
    %66 = vector.load %arg5[%c1_49, %c0_50, %c0_51] : memref<16x1x10xf32, #tpu.memory_space<vmem>>, vector<1x1x10xf32>
    %67 = vector.shape_cast %66 : vector<1x1x10xf32> to vector<1x10xf32>
    %68 = vector.broadcast %67 : vector<1x10xf32> to vector<32x10xf32>
    %69 = arith.addf %65, %68 : vector<32x10xf32>
    %cst_52 = arith.constant 0.000000e+00 : f32
    %70 = vector.broadcast %cst_52 : f32 to vector<32x10xf32>
    %71 = arith.maximumf %69, %70 : vector<32x10xf32>
    %c1_53 = arith.constant 1 : index
    %c0_54 = arith.constant 0 : index
    %c0_55 = arith.constant 0 : index
    %72 = vector.load %arg6[%c1_53, %c0_54, %c0_55] : memref<16x10x10xf32, #tpu.memory_space<vmem>>, vector<1x10x10xf32>
    %73 = vector.shape_cast %72 : vector<1x10x10xf32> to vector<10x10xf32>
    %cst_56 = arith.constant dense<0.000000e+00> : vector<32x10xf32>
    %74 = tpu.matmul %71, %73, %cst_56 {dimension_numbers = #tpu.dot_dimension_numbers<[1], [0], [0], [1], [0, 0, 1, 1], [], []>} : vector<32x10xf32>, vector<10x10xf32>, vector<32x10xf32> -> vector<32x10xf32>
    %c1_57 = arith.constant 1 : index
    %c0_58 = arith.constant 0 : index
    %c0_59 = arith.constant 0 : index
    %75 = vector.load %arg7[%c1_57, %c0_58, %c0_59] : memref<16x1x10xf32, #tpu.memory_space<vmem>>, vector<1x1x10xf32>
    %76 = vector.shape_cast %75 : vector<1x1x10xf32> to vector<1x10xf32>
    %77 = vector.broadcast %76 : vector<1x10xf32> to vector<32x10xf32>
    %78 = arith.addf %74, %77 : vector<32x10xf32>
    %cst_60 = arith.constant 0.000000e+00 : f32
    %79 = vector.broadcast %cst_60 : f32 to vector<32x10xf32>
    %80 = arith.maximumf %78, %79 : vector<32x10xf32>
    %c1_61 = arith.constant 1 : index
    %c0_62 = arith.constant 0 : index
    %c0_63 = arith.constant 0 : index
    %81 = vector.load %arg8[%c1_61, %c0_62, %c0_63] : memref<16x10x8xf32, #tpu.memory_space<vmem>>, vector<1x10x8xf32>
    %82 = vector.shape_cast %81 : vector<1x10x8xf32> to vector<10x8xf32>
    %cst_64 = arith.constant dense<0.000000e+00> : vector<32x8xf32>
    %83 = tpu.matmul %80, %82, %cst_64 {dimension_numbers = #tpu.dot_dimension_numbers<[1], [0], [0], [1], [0, 0, 1, 1], [], []>} : vector<32x10xf32>, vector<10x8xf32>, vector<32x8xf32> -> vector<32x8xf32>
    %c1_65 = arith.constant 1 : index
    %c0_66 = arith.constant 0 : index
    %c0_67 = arith.constant 0 : index
    %84 = vector.load %arg9[%c1_65, %c0_66, %c0_67] : memref<16x1x8xf32, #tpu.memory_space<vmem>>, vector<1x1x8xf32>
    %85 = vector.shape_cast %84 : vector<1x1x8xf32> to vector<1x8xf32>
    %86 = vector.broadcast %85 : vector<1x8xf32> to vector<32x8xf32>
    %87 = arith.addf %83, %86 : vector<32x8xf32>
    %cst_68 = arith.constant dense<0.000000e+00> : vector<8xf32>
    %88 = vector.multi_reduction <add>, %87, %cst_68 [0] : vector<32x8xf32> to vector<8xf32>
    %89 = vector.shape_cast %88 : vector<8xf32> to vector<1x8xf32>
    %cst_69 = arith.constant 3.200000e+01 : f32
    %90 = vector.broadcast %cst_69 : f32 to vector<1x8xf32>
    %91 = arith.divf %89, %90 : vector<1x8xf32>
    %92 = vector.broadcast %91 : vector<1x8xf32> to vector<32x8xf32>
    %93 = arith.subf %87, %92 : vector<32x8xf32>
    %94 = arith.mulf %93, %93 : vector<32x8xf32>
    %cst_70 = arith.constant dense<0.000000e+00> : vector<8xf32>
    %95 = vector.multi_reduction <add>, %94, %cst_70 [0] : vector<32x8xf32> to vector<8xf32>
    %96 = vector.shape_cast %95 : vector<8xf32> to vector<1x8xf32>
    %cst_71 = arith.constant 0.0322580636 : f32
    %97 = vector.broadcast %cst_71 : f32 to vector<1x8xf32>
    %98 = arith.mulf %96, %97 : vector<1x8xf32>
    %99 = math.sqrt %98 : vector<1x8xf32>
    %cst_72 = arith.constant 9.99999974E-6 : f32
    %100 = vector.broadcast %cst_72 : f32 to vector<1x8xf32>
    %101 = arith.addf %99, %100 : vector<1x8xf32>
    %102 = tpu.reciprocal %101 : vector<1x8xf32> -> vector<1x8xf32>
    %103 = vector.broadcast %102 : vector<1x8xf32> to vector<32x8xf32>
    %104 = arith.mulf %93, %103 : vector<32x8xf32>
    %c0_73 = arith.constant 0 : index
    %c8 = arith.constant 8 : index
    %105 = vector.load %arg10[%c0_73, %c8] : memref<32x128xf32, #tpu.memory_space<vmem>>, vector<32x8xf32>
    tpu.vector_store %arg10[%c0_73, %c8], %104 {strides = array<i32>} : memref<32x128xf32, #tpu.memory_space<vmem>>, vector<32x8xf32>,
    %c2 = arith.constant 2 : index
    %c0_74 = arith.constant 0 : index
    %c0_75 = arith.constant 0 : index
    %106 = vector.load %arg1[%c2, %c0_74, %c0_75] : memref<16x32x8xf32, #tpu.memory_space<vmem>>, vector<1x32x8xf32>
    %107 = vector.shape_cast %106 : vector<1x32x8xf32> to vector<32x8xf32>
    %c2_76 = arith.constant 2 : index
    %c0_77 = arith.constant 0 : index
    %c0_78 = arith.constant 0 : index
    %108 = vector.load %arg2[%c2_76, %c0_77, %c0_78] : memref<16x32x1xf32, #tpu.memory_space<vmem>>, vector<1x32x1xf32>
    %109 = vector.shape_cast %108 : vector<1x32x1xf32> to vector<32x1xf32>
    %c2_79 = arith.constant 2 : index
    %c0_80 = arith.constant 0 : index
    %c0_81 = arith.constant 0 : index
    %110 = vector.load %arg3[%c2_79, %c0_80, %c0_81] : memref<16x8x10xf32, #tpu.memory_space<vmem>>, vector<1x8x10xf32>
    %111 = vector.shape_cast %110 : vector<1x8x10xf32> to vector<8x10xf32>
    %cst_82 = arith.constant dense<0.000000e+00> : vector<32x10xf32>
    %112 = tpu.matmul %107, %111, %cst_82 {dimension_numbers = #tpu.dot_dimension_numbers<[1], [0], [0], [1], [0, 0, 1, 1], [], []>} : vector<32x8xf32>, vector<8x10xf32>, vector<32x10xf32> -> vector<32x10xf32>
    %c2_83 = arith.constant 2 : index
    %c0_84 = arith.constant 0 : index
    %c0_85 = arith.constant 0 : index
    %113 = vector.load %arg4[%c2_83, %c0_84, %c0_85] : memref<16x1x10xf32, #tpu.memory_space<vmem>>, vector<1x1x10xf32>
    %114 = vector.shape_cast %113 : vector<1x1x10xf32> to vector<1x10xf32>
    %115 = vector.broadcast %109 : vector<32x1xf32> to vector<32x10xf32>
    %116 = vector.broadcast %114 : vector<1x10xf32> to vector<32x10xf32>
    %117 = arith.mulf %115, %116 : vector<32x10xf32>
    %118 = arith.addf %112, %117 : vector<32x10xf32>
    %c2_86 = arith.constant 2 : index
    %c0_87 = arith.constant 0 : index
    %c0_88 = arith.constant 0 : index
    %119 = vector.load %arg5[%c2_86, %c0_87, %c0_88] : memref<16x1x10xf32, #tpu.memory_space<vmem>>, vector<1x1x10xf32>
    %120 = vector.shape_cast %119 : vector<1x1x10xf32> to vector<1x10xf32>
    %121 = vector.broadcast %120 : vector<1x10xf32> to vector<32x10xf32>
    %122 = arith.addf %118, %121 : vector<32x10xf32>
    %cst_89 = arith.constant 0.000000e+00 : f32
    %123 = vector.broadcast %cst_89 : f32 to vector<32x10xf32>
    %124 = arith.maximumf %122, %123 : vector<32x10xf32>
    %c2_90 = arith.constant 2 : index
    %c0_91 = arith.constant 0 : index
    %c0_92 = arith.constant 0 : index
    %125 = vector.load %arg6[%c2_90, %c0_91, %c0_92] : memref<16x10x10xf32, #tpu.memory_space<vmem>>, vector<1x10x10xf32>
    %126 = vector.shape_cast %125 : vector<1x10x10xf32> to vector<10x10xf32>
    %cst_93 = arith.constant dense<0.000000e+00> : vector<32x10xf32>
    %127 = tpu.matmul %124, %126, %cst_93 {dimension_numbers = #tpu.dot_dimension_numbers<[1], [0], [0], [1], [0, 0, 1, 1], [], []>} : vector<32x10xf32>, vector<10x10xf32>, vector<32x10xf32> -> vector<32x10xf32>
    %c2_94 = arith.constant 2 : index
    %c0_95 = arith.constant 0 : index
    %c0_96 = arith.constant 0 : index
    %128 = vector.load %arg7[%c2_94, %c0_95, %c0_96] : memref<16x1x10xf32, #tpu.memory_space<vmem>>, vector<1x1x10xf32>
    %129 = vector.shape_cast %128 : vector<1x1x10xf32> to vector<1x10xf32>
    %130 = vector.broadcast %129 : vector<1x10xf32> to vector<32x10xf32>
    %131 = arith.addf %127, %130 : vector<32x10xf32>
    %cst_97 = arith.constant 0.000000e+00 : f32
    %132 = vector.broadcast %cst_97 : f32 to vector<32x10xf32>
    %133 = arith.maximumf %131, %132 : vector<32x10xf32>
    %c2_98 = arith.constant 2 : index
    %c0_99 = arith.constant 0 : index
    %c0_100 = arith.constant 0 : index
    %134 = vector.load %arg8[%c2_98, %c0_99, %c0_100] : memref<16x10x8xf32, #tpu.memory_space<vmem>>, vector<1x10x8xf32>
    %135 = vector.shape_cast %134 : vector<1x10x8xf32> to vector<10x8xf32>
    %cst_101 = arith.constant dense<0.000000e+00> : vector<32x8xf32>
    %136 = tpu.matmul %133, %135, %cst_101 {dimension_numbers = #tpu.dot_dimension_numbers<[1], [0], [0], [1], [0, 0, 1, 1], [], []>} : vector<32x10xf32>, vector<10x8xf32>, vector<32x8xf32> -> vector<32x8xf32>
    %c2_102 = arith.constant 2 : index
    %c0_103 = arith.constant 0 : index
    %c0_104 = arith.constant 0 : index
    %137 = vector.load %arg9[%c2_102, %c0_103, %c0_104] : memref<16x1x8xf32, #tpu.memory_space<vmem>>, vector<1x1x8xf32>
    %138 = vector.shape_cast %137 : vector<1x1x8xf32> to vector<1x8xf32>
    %139 = vector.broadcast %138 : vector<1x8xf32> to vector<32x8xf32>
    %140 = arith.addf %136, %139 : vector<32x8xf32>
    %cst_105 = arith.constant dense<0.000000e+00> : vector<8xf32>
    %141 = vector.multi_reduction <add>, %140, %cst_105 [0] : vector<32x8xf32> to vector<8xf32>
    %142 = vector.shape_cast %141 : vector<8xf32> to vector<1x8xf32>
    %cst_106 = arith.constant 3.200000e+01 : f32
    %143 = vector.broadcast %cst_106 : f32 to vector<1x8xf32>
    %144 = arith.divf %142, %143 : vector<1x8xf32>
    %145 = vector.broadcast %144 : vector<1x8xf32> to vector<32x8xf32>
    %146 = arith.subf %140, %145 : vector<32x8xf32>
    %147 = arith.mulf %146, %146 : vector<32x8xf32>
    %cst_107 = arith.constant dense<0.000000e+00> : vector<8xf32>
    %148 = vector.multi_reduction <add>, %147, %cst_107 [0] : vector<32x8xf32> to vector<8xf32>
    %149 = vector.shape_cast %148 : vector<8xf32> to vector<1x8xf32>
    %cst_108 = arith.constant 0.0322580636 : f32
    %150 = vector.broadcast %cst_108 : f32 to vector<1x8xf32>
    %151 = arith.mulf %149, %150 : vector<1x8xf32>
    %152 = math.sqrt %151 : vector<1x8xf32>
    %cst_109 = arith.constant 9.99999974E-6 : f32
    %153 = vector.broadcast %cst_109 : f32 to vector<1x8xf32>
    %154 = arith.addf %152, %153 : vector<1x8xf32>
    %155 = tpu.reciprocal %154 : vector<1x8xf32> -> vector<1x8xf32>
    %156 = vector.broadcast %155 : vector<1x8xf32> to vector<32x8xf32>
    %157 = arith.mulf %146, %156 : vector<32x8xf32>
    %c0_110 = arith.constant 0 : index
    %c16 = arith.constant 16 : index
    %158 = vector.load %arg10[%c0_110, %c16] : memref<32x128xf32, #tpu.memory_space<vmem>>, vector<32x8xf32>
    tpu.vector_store %arg10[%c0_110, %c16], %157 {strides = array<i32>} : memref<32x128xf32, #tpu.memory_space<vmem>>, vector<32x8xf32>,
    %c3 = arith.constant 3 : index
    %c0_111 = arith.constant 0 : index
    %c0_112 = arith.constant 0 : index
    %159 = vector.load %arg1[%c3, %c0_111, %c0_112] : memref<16x32x8xf32, #tpu.memory_space<vmem>>, vector<1x32x8xf32>
    %160 = vector.shape_cast %159 : vector<1x32x8xf32> to vector<32x8xf32>
    %c3_113 = arith.constant 3 : index
    %c0_114 = arith.constant 0 : index
    %c0_115 = arith.constant 0 : index
    %161 = vector.load %arg2[%c3_113, %c0_114, %c0_115] : memref<16x32x1xf32, #tpu.memory_space<vmem>>, vector<1x32x1xf32>
    %162 = vector.shape_cast %161 : vector<1x32x1xf32> to vector<32x1xf32>
    %c3_116 = arith.constant 3 : index
    %c0_117 = arith.constant 0 : index
    %c0_118 = arith.constant 0 : index
    %163 = vector.load %arg3[%c3_116, %c0_117, %c0_118] : memref<16x8x10xf32, #tpu.memory_space<vmem>>, vector<1x8x10xf32>
    %164 = vector.shape_cast %163 : vector<1x8x10xf32> to vector<8x10xf32>
    %cst_119 = arith.constant dense<0.000000e+00> : vector<32x10xf32>
    %165 = tpu.matmul %160, %164, %cst_119 {dimension_numbers = #tpu.dot_dimension_numbers<[1], [0], [0], [1], [0, 0, 1, 1], [], []>} : vector<32x8xf32>, vector<8x10xf32>, vector<32x10xf32> -> vector<32x10xf32>
    %c3_120 = arith.constant 3 : index
    %c0_121 = arith.constant 0 : index
    %c0_122 = arith.constant 0 : index
    %166 = vector.load %arg4[%c3_120, %c0_121, %c0_122] : memref<16x1x10xf32, #tpu.memory_space<vmem>>, vector<1x1x10xf32>
    %167 = vector.shape_cast %166 : vector<1x1x10xf32> to vector<1x10xf32>
    %168 = vector.broadcast %162 : vector<32x1xf32> to vector<32x10xf32>
    %169 = vector.broadcast %167 : vector<1x10xf32> to vector<32x10xf32>
    %170 = arith.mulf %168, %169 : vector<32x10xf32>
    %171 = arith.addf %165, %170 : vector<32x10xf32>
    %c3_123 = arith.constant 3 : index
    %c0_124 = arith.constant 0 : index
    %c0_125 = arith.constant 0 : index
    %172 = vector.load %arg5[%c3_123, %c0_124, %c0_125] : memref<16x1x10xf32, #tpu.memory_space<vmem>>, vector<1x1x10xf32>
    %173 = vector.shape_cast %172 : vector<1x1x10xf32> to vector<1x10xf32>
    %174 = vector.broadcast %173 : vector<1x10xf32> to vector<32x10xf32>
    %175 = arith.addf %171, %174 : vector<32x10xf32>
    %cst_126 = arith.constant 0.000000e+00 : f32
    %176 = vector.broadcast %cst_126 : f32 to vector<32x10xf32>
    %177 = arith.maximumf %175, %176 : vector<32x10xf32>
    %c3_127 = arith.constant 3 : index
    %c0_128 = arith.constant 0 : index
    %c0_129 = arith.constant 0 : index
    %178 = vector.load %arg6[%c3_127, %c0_128, %c0_129] : memref<16x10x10xf32, #tpu.memory_space<vmem>>, vector<1x10x10xf32>
    %179 = vector.shape_cast %178 : vector<1x10x10xf32> to vector<10x10xf32>
    %cst_130 = arith.constant dense<0.000000e+00> : vector<32x10xf32>
    %180 = tpu.matmul %177, %179, %cst_130 {dimension_numbers = #tpu.dot_dimension_numbers<[1], [0], [0], [1], [0, 0, 1, 1], [], []>} : vector<32x10xf32>, vector<10x10xf32>, vector<32x10xf32> -> vector<32x10xf32>
    %c3_131 = arith.constant 3 : index
    %c0_132 = arith.constant 0 : index
    %c0_133 = arith.constant 0 : index
    %181 = vector.load %arg7[%c3_131, %c0_132, %c0_133] : memref<16x1x10xf32, #tpu.memory_space<vmem>>, vector<1x1x10xf32>
    %182 = vector.shape_cast %181 : vector<1x1x10xf32> to vector<1x10xf32>
    %183 = vector.broadcast %182 : vector<1x10xf32> to vector<32x10xf32>
    %184 = arith.addf %180, %183 : vector<32x10xf32>
    %cst_134 = arith.constant 0.000000e+00 : f32
    %185 = vector.broadcast %cst_134 : f32 to vector<32x10xf32>
    %186 = arith.maximumf %184, %185 : vector<32x10xf32>
    %c3_135 = arith.constant 3 : index
    %c0_136 = arith.constant 0 : index
    %c0_137 = arith.constant 0 : index
    %187 = vector.load %arg8[%c3_135, %c0_136, %c0_137] : memref<16x10x8xf32, #tpu.memory_space<vmem>>, vector<1x10x8xf32>
    %188 = vector.shape_cast %187 : vector<1x10x8xf32> to vector<10x8xf32>
    %cst_138 = arith.constant dense<0.000000e+00> : vector<32x8xf32>
    %189 = tpu.matmul %186, %188, %cst_138 {dimension_numbers = #tpu.dot_dimension_numbers<[1], [0], [0], [1], [0, 0, 1, 1], [], []>} : vector<32x10xf32>, vector<10x8xf32>, vector<32x8xf32> -> vector<32x8xf32>
    %c3_139 = arith.constant 3 : index
    %c0_140 = arith.constant 0 : index
    %c0_141 = arith.constant 0 : index
    %190 = vector.load %arg9[%c3_139, %c0_140, %c0_141] : memref<16x1x8xf32, #tpu.memory_space<vmem>>, vector<1x1x8xf32>
    %191 = vector.shape_cast %190 : vector<1x1x8xf32> to vector<1x8xf32>
    %192 = vector.broadcast %191 : vector<1x8xf32> to vector<32x8xf32>
    %193 = arith.addf %189, %192 : vector<32x8xf32>
    %cst_142 = arith.constant dense<0.000000e+00> : vector<8xf32>
    %194 = vector.multi_reduction <add>, %193, %cst_142 [0] : vector<32x8xf32> to vector<8xf32>
    %195 = vector.shape_cast %194 : vector<8xf32> to vector<1x8xf32>
    %cst_143 = arith.constant 3.200000e+01 : f32
    %196 = vector.broadcast %cst_143 : f32 to vector<1x8xf32>
    %197 = arith.divf %195, %196 : vector<1x8xf32>
    %198 = vector.broadcast %197 : vector<1x8xf32> to vector<32x8xf32>
    %199 = arith.subf %193, %198 : vector<32x8xf32>
    %200 = arith.mulf %199, %199 : vector<32x8xf32>
    %cst_144 = arith.constant dense<0.000000e+00> : vector<8xf32>
    %201 = vector.multi_reduction <add>, %200, %cst_144 [0] : vector<32x8xf32> to vector<8xf32>
    %202 = vector.shape_cast %201 : vector<8xf32> to vector<1x8xf32>
    %cst_145 = arith.constant 0.0322580636 : f32
    %203 = vector.broadcast %cst_145 : f32 to vector<1x8xf32>
    %204 = arith.mulf %202, %203 : vector<1x8xf32>
    %205 = math.sqrt %204 : vector<1x8xf32>
    %cst_146 = arith.constant 9.99999974E-6 : f32
    %206 = vector.broadcast %cst_146 : f32 to vector<1x8xf32>
    %207 = arith.addf %205, %206 : vector<1x8xf32>
    %208 = tpu.reciprocal %207 : vector<1x8xf32> -> vector<1x8xf32>
    %209 = vector.broadcast %208 : vector<1x8xf32> to vector<32x8xf32>
    %210 = arith.mulf %199, %209 : vector<32x8xf32>
    %c0_147 = arith.constant 0 : index
    %c24 = arith.constant 24 : index
    %211 = vector.load %arg10[%c0_147, %c24] : memref<32x128xf32, #tpu.memory_space<vmem>>, vector<32x8xf32>
    tpu.vector_store %arg10[%c0_147, %c24], %210 {strides = array<i32>} : memref<32x128xf32, #tpu.memory_space<vmem>>, vector<32x8xf32>,
    %c4 = arith.constant 4 : index
    %c0_148 = arith.constant 0 : index
    %c0_149 = arith.constant 0 : index
    %212 = vector.load %arg1[%c4, %c0_148, %c0_149] : memref<16x32x8xf32, #tpu.memory_space<vmem>>, vector<1x32x8xf32>
    %213 = vector.shape_cast %212 : vector<1x32x8xf32> to vector<32x8xf32>
    %c4_150 = arith.constant 4 : index
    %c0_151 = arith.constant 0 : index
    %c0_152 = arith.constant 0 : index
    %214 = vector.load %arg2[%c4_150, %c0_151, %c0_152] : memref<16x32x1xf32, #tpu.memory_space<vmem>>, vector<1x32x1xf32>
    %215 = vector.shape_cast %214 : vector<1x32x1xf32> to vector<32x1xf32>
    %c4_153 = arith.constant 4 : index
    %c0_154 = arith.constant 0 : index
    %c0_155 = arith.constant 0 : index
    %216 = vector.load %arg3[%c4_153, %c0_154, %c0_155] : memref<16x8x10xf32, #tpu.memory_space<vmem>>, vector<1x8x10xf32>
    %217 = vector.shape_cast %216 : vector<1x8x10xf32> to vector<8x10xf32>
    %cst_156 = arith.constant dense<0.000000e+00> : vector<32x10xf32>
    %218 = tpu.matmul %213, %217, %cst_156 {dimension_numbers = #tpu.dot_dimension_numbers<[1], [0], [0], [1], [0, 0, 1, 1], [], []>} : vector<32x8xf32>, vector<8x10xf32>, vector<32x10xf32> -> vector<32x10xf32>
    %c4_157 = arith.constant 4 : index
    %c0_158 = arith.constant 0 : index
    %c0_159 = arith.constant 0 : index
    %219 = vector.load %arg4[%c4_157, %c0_158, %c0_159] : memref<16x1x10xf32, #tpu.memory_space<vmem>>, vector<1x1x10xf32>
    %220 = vector.shape_cast %219 : vector<1x1x10xf32> to vector<1x10xf32>
    %221 = vector.broadcast %215 : vector<32x1xf32> to vector<32x10xf32>
    %222 = vector.broadcast %220 : vector<1x10xf32> to vector<32x10xf32>
    %223 = arith.mulf %221, %222 : vector<32x10xf32>
    %224 = arith.addf %218, %223 : vector<32x10xf32>
    %c4_160 = arith.constant 4 : index
    %c0_161 = arith.constant 0 : index
    %c0_162 = arith.constant 0 : index
    %225 = vector.load %arg5[%c4_160, %c0_161, %c0_162] : memref<16x1x10xf32, #tpu.memory_space<vmem>>, vector<1x1x10xf32>
    %226 = vector.shape_cast %225 : vector<1x1x10xf32> to vector<1x10xf32>
    %227 = vector.broadcast %226 : vector<1x10xf32> to vector<32x10xf32>
    %228 = arith.addf %224, %227 : vector<32x10xf32>
    %cst_163 = arith.constant 0.000000e+00 : f32
    %229 = vector.broadcast %cst_163 : f32 to vector<32x10xf32>
    %230 = arith.maximumf %228, %229 : vector<32x10xf32>
    %c4_164 = arith.constant 4 : index
    %c0_165 = arith.constant 0 : index
    %c0_166 = arith.constant 0 : index
    %231 = vector.load %arg6[%c4_164, %c0_165, %c0_166] : memref<16x10x10xf32, #tpu.memory_space<vmem>>, vector<1x10x10xf32>
    %232 = vector.shape_cast %231 : vector<1x10x10xf32> to vector<10x10xf32>
    %cst_167 = arith.constant dense<0.000000e+00> : vector<32x10xf32>
    %233 = tpu.matmul %230, %232, %cst_167 {dimension_numbers = #tpu.dot_dimension_numbers<[1], [0], [0], [1], [0, 0, 1, 1], [], []>} : vector<32x10xf32>, vector<10x10xf32>, vector<32x10xf32> -> vector<32x10xf32>
    %c4_168 = arith.constant 4 : index
    %c0_169 = arith.constant 0 : index
    %c0_170 = arith.constant 0 : index
    %234 = vector.load %arg7[%c4_168, %c0_169, %c0_170] : memref<16x1x10xf32, #tpu.memory_space<vmem>>, vector<1x1x10xf32>
    %235 = vector.shape_cast %234 : vector<1x1x10xf32> to vector<1x10xf32>
    %236 = vector.broadcast %235 : vector<1x10xf32> to vector<32x10xf32>
    %237 = arith.addf %233, %236 : vector<32x10xf32>
    %cst_171 = arith.constant 0.000000e+00 : f32
    %238 = vector.broadcast %cst_171 : f32 to vector<32x10xf32>
    %239 = arith.maximumf %237, %238 : vector<32x10xf32>
    %c4_172 = arith.constant 4 : index
    %c0_173 = arith.constant 0 : index
    %c0_174 = arith.constant 0 : index
    %240 = vector.load %arg8[%c4_172, %c0_173, %c0_174] : memref<16x10x8xf32, #tpu.memory_space<vmem>>, vector<1x10x8xf32>
    %241 = vector.shape_cast %240 : vector<1x10x8xf32> to vector<10x8xf32>
    %cst_175 = arith.constant dense<0.000000e+00> : vector<32x8xf32>
    %242 = tpu.matmul %239, %241, %cst_175 {dimension_numbers = #tpu.dot_dimension_numbers<[1], [0], [0], [1], [0, 0, 1, 1], [], []>} : vector<32x10xf32>, vector<10x8xf32>, vector<32x8xf32> -> vector<32x8xf32>
    %c4_176 = arith.constant 4 : index
    %c0_177 = arith.constant 0 : index
    %c0_178 = arith.constant 0 : index
    %243 = vector.load %arg9[%c4_176, %c0_177, %c0_178] : memref<16x1x8xf32, #tpu.memory_space<vmem>>, vector<1x1x8xf32>
    %244 = vector.shape_cast %243 : vector<1x1x8xf32> to vector<1x8xf32>
    %245 = vector.broadcast %244 : vector<1x8xf32> to vector<32x8xf32>
    %246 = arith.addf %242, %245 : vector<32x8xf32>
    %cst_179 = arith.constant dense<0.000000e+00> : vector<8xf32>
    %247 = vector.multi_reduction <add>, %246, %cst_179 [0] : vector<32x8xf32> to vector<8xf32>
    %248 = vector.shape_cast %247 : vector<8xf32> to vector<1x8xf32>
    %cst_180 = arith.constant 3.200000e+01 : f32
    %249 = vector.broadcast %cst_180 : f32 to vector<1x8xf32>
    %250 = arith.divf %248, %249 : vector<1x8xf32>
    %251 = vector.broadcast %250 : vector<1x8xf32> to vector<32x8xf32>
    %252 = arith.subf %246, %251 : vector<32x8xf32>
    %253 = arith.mulf %252, %252 : vector<32x8xf32>
    %cst_181 = arith.constant dense<0.000000e+00> : vector<8xf32>
    %254 = vector.multi_reduction <add>, %253, %cst_181 [0] : vector<32x8xf32> to vector<8xf32>
    %255 = vector.shape_cast %254 : vector<8xf32> to vector<1x8xf32>
    %cst_182 = arith.constant 0.0322580636 : f32
    %256 = vector.broadcast %cst_182 : f32 to vector<1x8xf32>
    %257 = arith.mulf %255, %256 : vector<1x8xf32>
    %258 = math.sqrt %257 : vector<1x8xf32>
    %cst_183 = arith.constant 9.99999974E-6 : f32
    %259 = vector.broadcast %cst_183 : f32 to vector<1x8xf32>
    %260 = arith.addf %258, %259 : vector<1x8xf32>
    %261 = tpu.reciprocal %260 : vector<1x8xf32> -> vector<1x8xf32>
    %262 = vector.broadcast %261 : vector<1x8xf32> to vector<32x8xf32>
    %263 = arith.mulf %252, %262 : vector<32x8xf32>
    %c0_184 = arith.constant 0 : index
    %c32 = arith.constant 32 : index
    %264 = vector.load %arg10[%c0_184, %c32] : memref<32x128xf32, #tpu.memory_space<vmem>>, vector<32x8xf32>
    tpu.vector_store %arg10[%c0_184, %c32], %263 {strides = array<i32>} : memref<32x128xf32, #tpu.memory_space<vmem>>, vector<32x8xf32>,
    %c5 = arith.constant 5 : index
    %c0_185 = arith.constant 0 : index
    %c0_186 = arith.constant 0 : index
    %265 = vector.load %arg1[%c5, %c0_185, %c0_186] : memref<16x32x8xf32, #tpu.memory_space<vmem>>, vector<1x32x8xf32>
    %266 = vector.shape_cast %265 : vector<1x32x8xf32> to vector<32x8xf32>
    %c5_187 = arith.constant 5 : index
    %c0_188 = arith.constant 0 : index
    %c0_189 = arith.constant 0 : index
    %267 = vector.load %arg2[%c5_187, %c0_188, %c0_189] : memref<16x32x1xf32, #tpu.memory_space<vmem>>, vector<1x32x1xf32>
    %268 = vector.shape_cast %267 : vector<1x32x1xf32> to vector<32x1xf32>
    %c5_190 = arith.constant 5 : index
    %c0_191 = arith.constant 0 : index
    %c0_192 = arith.constant 0 : index
    %269 = vector.load %arg3[%c5_190, %c0_191, %c0_192] : memref<16x8x10xf32, #tpu.memory_space<vmem>>, vector<1x8x10xf32>
    %270 = vector.shape_cast %269 : vector<1x8x10xf32> to vector<8x10xf32>
    %cst_193 = arith.constant dense<0.000000e+00> : vector<32x10xf32>
    %271 = tpu.matmul %266, %270, %cst_193 {dimension_numbers = #tpu.dot_dimension_numbers<[1], [0], [0], [1], [0, 0, 1, 1], [], []>} : vector<32x8xf32>, vector<8x10xf32>, vector<32x10xf32> -> vector<32x10xf32>
    %c5_194 = arith.constant 5 : index
    %c0_195 = arith.constant 0 : index
    %c0_196 = arith.constant 0 : index
    %272 = vector.load %arg4[%c5_194, %c0_195, %c0_196] : memref<16x1x10xf32, #tpu.memory_space<vmem>>, vector<1x1x10xf32>
    %273 = vector.shape_cast %272 : vector<1x1x10xf32> to vector<1x10xf32>
    %274 = vector.broadcast %268 : vector<32x1xf32> to vector<32x10xf32>
    %275 = vector.broadcast %273 : vector<1x10xf32> to vector<32x10xf32>
    %276 = arith.mulf %274, %275 : vector<32x10xf32>
    %277 = arith.addf %271, %276 : vector<32x10xf32>
    %c5_197 = arith.constant 5 : index
    %c0_198 = arith.constant 0 : index
    %c0_199 = arith.constant 0 : index
    %278 = vector.load %arg5[%c5_197, %c0_198, %c0_199] : memref<16x1x10xf32, #tpu.memory_space<vmem>>, vector<1x1x10xf32>
    %279 = vector.shape_cast %278 : vector<1x1x10xf32> to vector<1x10xf32>
    %280 = vector.broadcast %279 : vector<1x10xf32> to vector<32x10xf32>
    %281 = arith.addf %277, %280 : vector<32x10xf32>
    %cst_200 = arith.constant 0.000000e+00 : f32
    %282 = vector.broadcast %cst_200 : f32 to vector<32x10xf32>
    %283 = arith.maximumf %281, %282 : vector<32x10xf32>
    %c5_201 = arith.constant 5 : index
    %c0_202 = arith.constant 0 : index
    %c0_203 = arith.constant 0 : index
    %284 = vector.load %arg6[%c5_201, %c0_202, %c0_203] : memref<16x10x10xf32, #tpu.memory_space<vmem>>, vector<1x10x10xf32>
    %285 = vector.shape_cast %284 : vector<1x10x10xf32> to vector<10x10xf32>
    %cst_204 = arith.constant dense<0.000000e+00> : vector<32x10xf32>
    %286 = tpu.matmul %283, %285, %cst_204 {dimension_numbers = #tpu.dot_dimension_numbers<[1], [0], [0], [1], [0, 0, 1, 1], [], []>} : vector<32x10xf32>, vector<10x10xf32>, vector<32x10xf32> -> vector<32x10xf32>
    %c5_205 = arith.constant 5 : index
    %c0_206 = arith.constant 0 : index
    %c0_207 = arith.constant 0 : index
    %287 = vector.load %arg7[%c5_205, %c0_206, %c0_207] : memref<16x1x10xf32, #tpu.memory_space<vmem>>, vector<1x1x10xf32>
    %288 = vector.shape_cast %287 : vector<1x1x10xf32> to vector<1x10xf32>
    %289 = vector.broadcast %288 : vector<1x10xf32> to vector<32x10xf32>
    %290 = arith.addf %286, %289 : vector<32x10xf32>
    %cst_208 = arith.constant 0.000000e+00 : f32
    %291 = vector.broadcast %cst_208 : f32 to vector<32x10xf32>
    %292 = arith.maximumf %290, %291 : vector<32x10xf32>
    %c5_209 = arith.constant 5 : index
    %c0_210 = arith.constant 0 : index
    %c0_211 = arith.constant 0 : index
    %293 = vector.load %arg8[%c5_209, %c0_210, %c0_211] : memref<16x10x8xf32, #tpu.memory_space<vmem>>, vector<1x10x8xf32>
    %294 = vector.shape_cast %293 : vector<1x10x8xf32> to vector<10x8xf32>
    %cst_212 = arith.constant dense<0.000000e+00> : vector<32x8xf32>
    %295 = tpu.matmul %292, %294, %cst_212 {dimension_numbers = #tpu.dot_dimension_numbers<[1], [0], [0], [1], [0, 0, 1, 1], [], []>} : vector<32x10xf32>, vector<10x8xf32>, vector<32x8xf32> -> vector<32x8xf32>
    %c5_213 = arith.constant 5 : index
    %c0_214 = arith.constant 0 : index
    %c0_215 = arith.constant 0 : index
    %296 = vector.load %arg9[%c5_213, %c0_214, %c0_215] : memref<16x1x8xf32, #tpu.memory_space<vmem>>, vector<1x1x8xf32>
    %297 = vector.shape_cast %296 : vector<1x1x8xf32> to vector<1x8xf32>
    %298 = vector.broadcast %297 : vector<1x8xf32> to vector<32x8xf32>
    %299 = arith.addf %295, %298 : vector<32x8xf32>
    %cst_216 = arith.constant dense<0.000000e+00> : vector<8xf32>
    %300 = vector.multi_reduction <add>, %299, %cst_216 [0] : vector<32x8xf32> to vector<8xf32>
    %301 = vector.shape_cast %300 : vector<8xf32> to vector<1x8xf32>
    %cst_217 = arith.constant 3.200000e+01 : f32
    %302 = vector.broadcast %cst_217 : f32 to vector<1x8xf32>
    %303 = arith.divf %301, %302 : vector<1x8xf32>
    %304 = vector.broadcast %303 : vector<1x8xf32> to vector<32x8xf32>
    %305 = arith.subf %299, %304 : vector<32x8xf32>
    %306 = arith.mulf %305, %305 : vector<32x8xf32>
    %cst_218 = arith.constant dense<0.000000e+00> : vector<8xf32>
    %307 = vector.multi_reduction <add>, %306, %cst_218 [0] : vector<32x8xf32> to vector<8xf32>
    %308 = vector.shape_cast %307 : vector<8xf32> to vector<1x8xf32>
    %cst_219 = arith.constant 0.0322580636 : f32
    %309 = vector.broadcast %cst_219 : f32 to vector<1x8xf32>
    %310 = arith.mulf %308, %309 : vector<1x8xf32>
    %311 = math.sqrt %310 : vector<1x8xf32>
    %cst_220 = arith.constant 9.99999974E-6 : f32
    %312 = vector.broadcast %cst_220 : f32 to vector<1x8xf32>
    %313 = arith.addf %311, %312 : vector<1x8xf32>
    %314 = tpu.reciprocal %313 : vector<1x8xf32> -> vector<1x8xf32>
    %315 = vector.broadcast %314 : vector<1x8xf32> to vector<32x8xf32>
    %316 = arith.mulf %305, %315 : vector<32x8xf32>
    %c0_221 = arith.constant 0 : index
    %c40 = arith.constant 40 : index
    %317 = vector.load %arg10[%c0_221, %c40] : memref<32x128xf32, #tpu.memory_space<vmem>>, vector<32x8xf32>
    tpu.vector_store %arg10[%c0_221, %c40], %316 {strides = array<i32>} : memref<32x128xf32, #tpu.memory_space<vmem>>, vector<32x8xf32>,
    %c6 = arith.constant 6 : index
    %c0_222 = arith.constant 0 : index
    %c0_223 = arith.constant 0 : index
    %318 = vector.load %arg1[%c6, %c0_222, %c0_223] : memref<16x32x8xf32, #tpu.memory_space<vmem>>, vector<1x32x8xf32>
    %319 = vector.shape_cast %318 : vector<1x32x8xf32> to vector<32x8xf32>
    %c6_224 = arith.constant 6 : index
    %c0_225 = arith.constant 0 : index
    %c0_226 = arith.constant 0 : index
    %320 = vector.load %arg2[%c6_224, %c0_225, %c0_226] : memref<16x32x1xf32, #tpu.memory_space<vmem>>, vector<1x32x1xf32>
    %321 = vector.shape_cast %320 : vector<1x32x1xf32> to vector<32x1xf32>
    %c6_227 = arith.constant 6 : index
    %c0_228 = arith.constant 0 : index
    %c0_229 = arith.constant 0 : index
    %322 = vector.load %arg3[%c6_227, %c0_228, %c0_229] : memref<16x8x10xf32, #tpu.memory_space<vmem>>, vector<1x8x10xf32>
    %323 = vector.shape_cast %322 : vector<1x8x10xf32> to vector<8x10xf32>
    %cst_230 = arith.constant dense<0.000000e+00> : vector<32x10xf32>
    %324 = tpu.matmul %319, %323, %cst_230 {dimension_numbers = #tpu.dot_dimension_numbers<[1], [0], [0], [1], [0, 0, 1, 1], [], []>} : vector<32x8xf32>, vector<8x10xf32>, vector<32x10xf32> -> vector<32x10xf32>
    %c6_231 = arith.constant 6 : index
    %c0_232 = arith.constant 0 : index
    %c0_233 = arith.constant 0 : index
    %325 = vector.load %arg4[%c6_231, %c0_232, %c0_233] : memref<16x1x10xf32, #tpu.memory_space<vmem>>, vector<1x1x10xf32>
    %326 = vector.shape_cast %325 : vector<1x1x10xf32> to vector<1x10xf32>
    %327 = vector.broadcast %321 : vector<32x1xf32> to vector<32x10xf32>
    %328 = vector.broadcast %326 : vector<1x10xf32> to vector<32x10xf32>
    %329 = arith.mulf %327, %328 : vector<32x10xf32>
    %330 = arith.addf %324, %329 : vector<32x10xf32>
    %c6_234 = arith.constant 6 : index
    %c0_235 = arith.constant 0 : index
    %c0_236 = arith.constant 0 : index
    %331 = vector.load %arg5[%c6_234, %c0_235, %c0_236] : memref<16x1x10xf32, #tpu.memory_space<vmem>>, vector<1x1x10xf32>
    %332 = vector.shape_cast %331 : vector<1x1x10xf32> to vector<1x10xf32>
    %333 = vector.broadcast %332 : vector<1x10xf32> to vector<32x10xf32>
    %334 = arith.addf %330, %333 : vector<32x10xf32>
    %cst_237 = arith.constant 0.000000e+00 : f32
    %335 = vector.broadcast %cst_237 : f32 to vector<32x10xf32>
    %336 = arith.maximumf %334, %335 : vector<32x10xf32>
    %c6_238 = arith.constant 6 : index
    %c0_239 = arith.constant 0 : index
    %c0_240 = arith.constant 0 : index
    %337 = vector.load %arg6[%c6_238, %c0_239, %c0_240] : memref<16x10x10xf32, #tpu.memory_space<vmem>>, vector<1x10x10xf32>
    %338 = vector.shape_cast %337 : vector<1x10x10xf32> to vector<10x10xf32>
    %cst_241 = arith.constant dense<0.000000e+00> : vector<32x10xf32>
    %339 = tpu.matmul %336, %338, %cst_241 {dimension_numbers = #tpu.dot_dimension_numbers<[1], [0], [0], [1], [0, 0, 1, 1], [], []>} : vector<32x10xf32>, vector<10x10xf32>, vector<32x10xf32> -> vector<32x10xf32>
    %c6_242 = arith.constant 6 : index
    %c0_243 = arith.constant 0 : index
    %c0_244 = arith.constant 0 : index
    %340 = vector.load %arg7[%c6_242, %c0_243, %c0_244] : memref<16x1x10xf32, #tpu.memory_space<vmem>>, vector<1x1x10xf32>
    %341 = vector.shape_cast %340 : vector<1x1x10xf32> to vector<1x10xf32>
    %342 = vector.broadcast %341 : vector<1x10xf32> to vector<32x10xf32>
    %343 = arith.addf %339, %342 : vector<32x10xf32>
    %cst_245 = arith.constant 0.000000e+00 : f32
    %344 = vector.broadcast %cst_245 : f32 to vector<32x10xf32>
    %345 = arith.maximumf %343, %344 : vector<32x10xf32>
    %c6_246 = arith.constant 6 : index
    %c0_247 = arith.constant 0 : index
    %c0_248 = arith.constant 0 : index
    %346 = vector.load %arg8[%c6_246, %c0_247, %c0_248] : memref<16x10x8xf32, #tpu.memory_space<vmem>>, vector<1x10x8xf32>
    %347 = vector.shape_cast %346 : vector<1x10x8xf32> to vector<10x8xf32>
    %cst_249 = arith.constant dense<0.000000e+00> : vector<32x8xf32>
    %348 = tpu.matmul %345, %347, %cst_249 {dimension_numbers = #tpu.dot_dimension_numbers<[1], [0], [0], [1], [0, 0, 1, 1], [], []>} : vector<32x10xf32>, vector<10x8xf32>, vector<32x8xf32> -> vector<32x8xf32>
    %c6_250 = arith.constant 6 : index
    %c0_251 = arith.constant 0 : index
    %c0_252 = arith.constant 0 : index
    %349 = vector.load %arg9[%c6_250, %c0_251, %c0_252] : memref<16x1x8xf32, #tpu.memory_space<vmem>>, vector<1x1x8xf32>
    %350 = vector.shape_cast %349 : vector<1x1x8xf32> to vector<1x8xf32>
    %351 = vector.broadcast %350 : vector<1x8xf32> to vector<32x8xf32>
    %352 = arith.addf %348, %351 : vector<32x8xf32>
    %cst_253 = arith.constant dense<0.000000e+00> : vector<8xf32>
    %353 = vector.multi_reduction <add>, %352, %cst_253 [0] : vector<32x8xf32> to vector<8xf32>
    %354 = vector.shape_cast %353 : vector<8xf32> to vector<1x8xf32>
    %cst_254 = arith.constant 3.200000e+01 : f32
    %355 = vector.broadcast %cst_254 : f32 to vector<1x8xf32>
    %356 = arith.divf %354, %355 : vector<1x8xf32>
    %357 = vector.broadcast %356 : vector<1x8xf32> to vector<32x8xf32>
    %358 = arith.subf %352, %357 : vector<32x8xf32>
    %359 = arith.mulf %358, %358 : vector<32x8xf32>
    %cst_255 = arith.constant dense<0.000000e+00> : vector<8xf32>
    %360 = vector.multi_reduction <add>, %359, %cst_255 [0] : vector<32x8xf32> to vector<8xf32>
    %361 = vector.shape_cast %360 : vector<8xf32> to vector<1x8xf32>
    %cst_256 = arith.constant 0.0322580636 : f32
    %362 = vector.broadcast %cst_256 : f32 to vector<1x8xf32>
    %363 = arith.mulf %361, %362 : vector<1x8xf32>
    %364 = math.sqrt %363 : vector<1x8xf32>
    %cst_257 = arith.constant 9.99999974E-6 : f32
    %365 = vector.broadcast %cst_257 : f32 to vector<1x8xf32>
    %366 = arith.addf %364, %365 : vector<1x8xf32>
    %367 = tpu.reciprocal %366 : vector<1x8xf32> -> vector<1x8xf32>
    %368 = vector.broadcast %367 : vector<1x8xf32> to vector<32x8xf32>
    %369 = arith.mulf %358, %368 : vector<32x8xf32>
    %c0_258 = arith.constant 0 : index
    %c48 = arith.constant 48 : index
    %370 = vector.load %arg10[%c0_258, %c48] : memref<32x128xf32, #tpu.memory_space<vmem>>, vector<32x8xf32>
    tpu.vector_store %arg10[%c0_258, %c48], %369 {strides = array<i32>} : memref<32x128xf32, #tpu.memory_space<vmem>>, vector<32x8xf32>,
    %c7 = arith.constant 7 : index
    %c0_259 = arith.constant 0 : index
    %c0_260 = arith.constant 0 : index
    %371 = vector.load %arg1[%c7, %c0_259, %c0_260] : memref<16x32x8xf32, #tpu.memory_space<vmem>>, vector<1x32x8xf32>
    %372 = vector.shape_cast %371 : vector<1x32x8xf32> to vector<32x8xf32>
    %c7_261 = arith.constant 7 : index
    %c0_262 = arith.constant 0 : index
    %c0_263 = arith.constant 0 : index
    %373 = vector.load %arg2[%c7_261, %c0_262, %c0_263] : memref<16x32x1xf32, #tpu.memory_space<vmem>>, vector<1x32x1xf32>
    %374 = vector.shape_cast %373 : vector<1x32x1xf32> to vector<32x1xf32>
    %c7_264 = arith.constant 7 : index
    %c0_265 = arith.constant 0 : index
    %c0_266 = arith.constant 0 : index
    %375 = vector.load %arg3[%c7_264, %c0_265, %c0_266] : memref<16x8x10xf32, #tpu.memory_space<vmem>>, vector<1x8x10xf32>
    %376 = vector.shape_cast %375 : vector<1x8x10xf32> to vector<8x10xf32>
    %cst_267 = arith.constant dense<0.000000e+00> : vector<32x10xf32>
    %377 = tpu.matmul %372, %376, %cst_267 {dimension_numbers = #tpu.dot_dimension_numbers<[1], [0], [0], [1], [0, 0, 1, 1], [], []>} : vector<32x8xf32>, vector<8x10xf32>, vector<32x10xf32> -> vector<32x10xf32>
    %c7_268 = arith.constant 7 : index
    %c0_269 = arith.constant 0 : index
    %c0_270 = arith.constant 0 : index
    %378 = vector.load %arg4[%c7_268, %c0_269, %c0_270] : memref<16x1x10xf32, #tpu.memory_space<vmem>>, vector<1x1x10xf32>
    %379 = vector.shape_cast %378 : vector<1x1x10xf32> to vector<1x10xf32>
    %380 = vector.broadcast %374 : vector<32x1xf32> to vector<32x10xf32>
    %381 = vector.broadcast %379 : vector<1x10xf32> to vector<32x10xf32>
    %382 = arith.mulf %380, %381 : vector<32x10xf32>
    %383 = arith.addf %377, %382 : vector<32x10xf32>
    %c7_271 = arith.constant 7 : index
    %c0_272 = arith.constant 0 : index
    %c0_273 = arith.constant 0 : index
    %384 = vector.load %arg5[%c7_271, %c0_272, %c0_273] : memref<16x1x10xf32, #tpu.memory_space<vmem>>, vector<1x1x10xf32>
    %385 = vector.shape_cast %384 : vector<1x1x10xf32> to vector<1x10xf32>
    %386 = vector.broadcast %385 : vector<1x10xf32> to vector<32x10xf32>
    %387 = arith.addf %383, %386 : vector<32x10xf32>
    %cst_274 = arith.constant 0.000000e+00 : f32
    %388 = vector.broadcast %cst_274 : f32 to vector<32x10xf32>
    %389 = arith.maximumf %387, %388 : vector<32x10xf32>
    %c7_275 = arith.constant 7 : index
    %c0_276 = arith.constant 0 : index
    %c0_277 = arith.constant 0 : index
    %390 = vector.load %arg6[%c7_275, %c0_276, %c0_277] : memref<16x10x10xf32, #tpu.memory_space<vmem>>, vector<1x10x10xf32>
    %391 = vector.shape_cast %390 : vector<1x10x10xf32> to vector<10x10xf32>
    %cst_278 = arith.constant dense<0.000000e+00> : vector<32x10xf32>
    %392 = tpu.matmul %389, %391, %cst_278 {dimension_numbers = #tpu.dot_dimension_numbers<[1], [0], [0], [1], [0, 0, 1, 1], [], []>} : vector<32x10xf32>, vector<10x10xf32>, vector<32x10xf32> -> vector<32x10xf32>
    %c7_279 = arith.constant 7 : index
    %c0_280 = arith.constant 0 : index
    %c0_281 = arith.constant 0 : index
    %393 = vector.load %arg7[%c7_279, %c0_280, %c0_281] : memref<16x1x10xf32, #tpu.memory_space<vmem>>, vector<1x1x10xf32>
    %394 = vector.shape_cast %393 : vector<1x1x10xf32> to vector<1x10xf32>
    %395 = vector.broadcast %394 : vector<1x10xf32> to vector<32x10xf32>
    %396 = arith.addf %392, %395 : vector<32x10xf32>
    %cst_282 = arith.constant 0.000000e+00 : f32
    %397 = vector.broadcast %cst_282 : f32 to vector<32x10xf32>
    %398 = arith.maximumf %396, %397 : vector<32x10xf32>
    %c7_283 = arith.constant 7 : index
    %c0_284 = arith.constant 0 : index
    %c0_285 = arith.constant 0 : index
    %399 = vector.load %arg8[%c7_283, %c0_284, %c0_285] : memref<16x10x8xf32, #tpu.memory_space<vmem>>, vector<1x10x8xf32>
    %400 = vector.shape_cast %399 : vector<1x10x8xf32> to vector<10x8xf32>
    %cst_286 = arith.constant dense<0.000000e+00> : vector<32x8xf32>
    %401 = tpu.matmul %398, %400, %cst_286 {dimension_numbers = #tpu.dot_dimension_numbers<[1], [0], [0], [1], [0, 0, 1, 1], [], []>} : vector<32x10xf32>, vector<10x8xf32>, vector<32x8xf32> -> vector<32x8xf32>
    %c7_287 = arith.constant 7 : index
    %c0_288 = arith.constant 0 : index
    %c0_289 = arith.constant 0 : index
    %402 = vector.load %arg9[%c7_287, %c0_288, %c0_289] : memref<16x1x8xf32, #tpu.memory_space<vmem>>, vector<1x1x8xf32>
    %403 = vector.shape_cast %402 : vector<1x1x8xf32> to vector<1x8xf32>
    %404 = vector.broadcast %403 : vector<1x8xf32> to vector<32x8xf32>
    %405 = arith.addf %401, %404 : vector<32x8xf32>
    %cst_290 = arith.constant dense<0.000000e+00> : vector<8xf32>
    %406 = vector.multi_reduction <add>, %405, %cst_290 [0] : vector<32x8xf32> to vector<8xf32>
    %407 = vector.shape_cast %406 : vector<8xf32> to vector<1x8xf32>
    %cst_291 = arith.constant 3.200000e+01 : f32
    %408 = vector.broadcast %cst_291 : f32 to vector<1x8xf32>
    %409 = arith.divf %407, %408 : vector<1x8xf32>
    %410 = vector.broadcast %409 : vector<1x8xf32> to vector<32x8xf32>
    %411 = arith.subf %405, %410 : vector<32x8xf32>
    %412 = arith.mulf %411, %411 : vector<32x8xf32>
    %cst_292 = arith.constant dense<0.000000e+00> : vector<8xf32>
    %413 = vector.multi_reduction <add>, %412, %cst_292 [0] : vector<32x8xf32> to vector<8xf32>
    %414 = vector.shape_cast %413 : vector<8xf32> to vector<1x8xf32>
    %cst_293 = arith.constant 0.0322580636 : f32
    %415 = vector.broadcast %cst_293 : f32 to vector<1x8xf32>
    %416 = arith.mulf %414, %415 : vector<1x8xf32>
    %417 = math.sqrt %416 : vector<1x8xf32>
    %cst_294 = arith.constant 9.99999974E-6 : f32
    %418 = vector.broadcast %cst_294 : f32 to vector<1x8xf32>
    %419 = arith.addf %417, %418 : vector<1x8xf32>
    %420 = tpu.reciprocal %419 : vector<1x8xf32> -> vector<1x8xf32>
    %421 = vector.broadcast %420 : vector<1x8xf32> to vector<32x8xf32>
    %422 = arith.mulf %411, %421 : vector<32x8xf32>
    %c0_295 = arith.constant 0 : index
    %c56 = arith.constant 56 : index
    %423 = vector.load %arg10[%c0_295, %c56] : memref<32x128xf32, #tpu.memory_space<vmem>>, vector<32x8xf32>
    tpu.vector_store %arg10[%c0_295, %c56], %422 {strides = array<i32>} : memref<32x128xf32, #tpu.memory_space<vmem>>, vector<32x8xf32>,
    %c8_296 = arith.constant 8 : index
    %c0_297 = arith.constant 0 : index
    %c0_298 = arith.constant 0 : index
    %424 = vector.load %arg1[%c8_296, %c0_297, %c0_298] : memref<16x32x8xf32, #tpu.memory_space<vmem>>, vector<1x32x8xf32>
    %425 = vector.shape_cast %424 : vector<1x32x8xf32> to vector<32x8xf32>
    %c8_299 = arith.constant 8 : index
    %c0_300 = arith.constant 0 : index
    %c0_301 = arith.constant 0 : index
    %426 = vector.load %arg2[%c8_299, %c0_300, %c0_301] : memref<16x32x1xf32, #tpu.memory_space<vmem>>, vector<1x32x1xf32>
    %427 = vector.shape_cast %426 : vector<1x32x1xf32> to vector<32x1xf32>
    %c8_302 = arith.constant 8 : index
    %c0_303 = arith.constant 0 : index
    %c0_304 = arith.constant 0 : index
    %428 = vector.load %arg3[%c8_302, %c0_303, %c0_304] : memref<16x8x10xf32, #tpu.memory_space<vmem>>, vector<1x8x10xf32>
    %429 = vector.shape_cast %428 : vector<1x8x10xf32> to vector<8x10xf32>
    %cst_305 = arith.constant dense<0.000000e+00> : vector<32x10xf32>
    %430 = tpu.matmul %425, %429, %cst_305 {dimension_numbers = #tpu.dot_dimension_numbers<[1], [0], [0], [1], [0, 0, 1, 1], [], []>} : vector<32x8xf32>, vector<8x10xf32>, vector<32x10xf32> -> vector<32x10xf32>
    %c8_306 = arith.constant 8 : index
    %c0_307 = arith.constant 0 : index
    %c0_308 = arith.constant 0 : index
    %431 = vector.load %arg4[%c8_306, %c0_307, %c0_308] : memref<16x1x10xf32, #tpu.memory_space<vmem>>, vector<1x1x10xf32>
    %432 = vector.shape_cast %431 : vector<1x1x10xf32> to vector<1x10xf32>
    %433 = vector.broadcast %427 : vector<32x1xf32> to vector<32x10xf32>
    %434 = vector.broadcast %432 : vector<1x10xf32> to vector<32x10xf32>
    %435 = arith.mulf %433, %434 : vector<32x10xf32>
    %436 = arith.addf %430, %435 : vector<32x10xf32>
    %c8_309 = arith.constant 8 : index
    %c0_310 = arith.constant 0 : index
    %c0_311 = arith.constant 0 : index
    %437 = vector.load %arg5[%c8_309, %c0_310, %c0_311] : memref<16x1x10xf32, #tpu.memory_space<vmem>>, vector<1x1x10xf32>
    %438 = vector.shape_cast %437 : vector<1x1x10xf32> to vector<1x10xf32>
    %439 = vector.broadcast %438 : vector<1x10xf32> to vector<32x10xf32>
    %440 = arith.addf %436, %439 : vector<32x10xf32>
    %cst_312 = arith.constant 0.000000e+00 : f32
    %441 = vector.broadcast %cst_312 : f32 to vector<32x10xf32>
    %442 = arith.maximumf %440, %441 : vector<32x10xf32>
    %c8_313 = arith.constant 8 : index
    %c0_314 = arith.constant 0 : index
    %c0_315 = arith.constant 0 : index
    %443 = vector.load %arg6[%c8_313, %c0_314, %c0_315] : memref<16x10x10xf32, #tpu.memory_space<vmem>>, vector<1x10x10xf32>
    %444 = vector.shape_cast %443 : vector<1x10x10xf32> to vector<10x10xf32>
    %cst_316 = arith.constant dense<0.000000e+00> : vector<32x10xf32>
    %445 = tpu.matmul %442, %444, %cst_316 {dimension_numbers = #tpu.dot_dimension_numbers<[1], [0], [0], [1], [0, 0, 1, 1], [], []>} : vector<32x10xf32>, vector<10x10xf32>, vector<32x10xf32> -> vector<32x10xf32>
    %c8_317 = arith.constant 8 : index
    %c0_318 = arith.constant 0 : index
    %c0_319 = arith.constant 0 : index
    %446 = vector.load %arg7[%c8_317, %c0_318, %c0_319] : memref<16x1x10xf32, #tpu.memory_space<vmem>>, vector<1x1x10xf32>
    %447 = vector.shape_cast %446 : vector<1x1x10xf32> to vector<1x10xf32>
    %448 = vector.broadcast %447 : vector<1x10xf32> to vector<32x10xf32>
    %449 = arith.addf %445, %448 : vector<32x10xf32>
    %cst_320 = arith.constant 0.000000e+00 : f32
    %450 = vector.broadcast %cst_320 : f32 to vector<32x10xf32>
    %451 = arith.maximumf %449, %450 : vector<32x10xf32>
    %c8_321 = arith.constant 8 : index
    %c0_322 = arith.constant 0 : index
    %c0_323 = arith.constant 0 : index
    %452 = vector.load %arg8[%c8_321, %c0_322, %c0_323] : memref<16x10x8xf32, #tpu.memory_space<vmem>>, vector<1x10x8xf32>
    %453 = vector.shape_cast %452 : vector<1x10x8xf32> to vector<10x8xf32>
    %cst_324 = arith.constant dense<0.000000e+00> : vector<32x8xf32>
    %454 = tpu.matmul %451, %453, %cst_324 {dimension_numbers = #tpu.dot_dimension_numbers<[1], [0], [0], [1], [0, 0, 1, 1], [], []>} : vector<32x10xf32>, vector<10x8xf32>, vector<32x8xf32> -> vector<32x8xf32>
    %c8_325 = arith.constant 8 : index
    %c0_326 = arith.constant 0 : index
    %c0_327 = arith.constant 0 : index
    %455 = vector.load %arg9[%c8_325, %c0_326, %c0_327] : memref<16x1x8xf32, #tpu.memory_space<vmem>>, vector<1x1x8xf32>
    %456 = vector.shape_cast %455 : vector<1x1x8xf32> to vector<1x8xf32>
    %457 = vector.broadcast %456 : vector<1x8xf32> to vector<32x8xf32>
    %458 = arith.addf %454, %457 : vector<32x8xf32>
    %cst_328 = arith.constant dense<0.000000e+00> : vector<8xf32>
    %459 = vector.multi_reduction <add>, %458, %cst_328 [0] : vector<32x8xf32> to vector<8xf32>
    %460 = vector.shape_cast %459 : vector<8xf32> to vector<1x8xf32>
    %cst_329 = arith.constant 3.200000e+01 : f32
    %461 = vector.broadcast %cst_329 : f32 to vector<1x8xf32>
    %462 = arith.divf %460, %461 : vector<1x8xf32>
    %463 = vector.broadcast %462 : vector<1x8xf32> to vector<32x8xf32>
    %464 = arith.subf %458, %463 : vector<32x8xf32>
    %465 = arith.mulf %464, %464 : vector<32x8xf32>
    %cst_330 = arith.constant dense<0.000000e+00> : vector<8xf32>
    %466 = vector.multi_reduction <add>, %465, %cst_330 [0] : vector<32x8xf32> to vector<8xf32>
    %467 = vector.shape_cast %466 : vector<8xf32> to vector<1x8xf32>
    %cst_331 = arith.constant 0.0322580636 : f32
    %468 = vector.broadcast %cst_331 : f32 to vector<1x8xf32>
    %469 = arith.mulf %467, %468 : vector<1x8xf32>
    %470 = math.sqrt %469 : vector<1x8xf32>
    %cst_332 = arith.constant 9.99999974E-6 : f32
    %471 = vector.broadcast %cst_332 : f32 to vector<1x8xf32>
    %472 = arith.addf %470, %471 : vector<1x8xf32>
    %473 = tpu.reciprocal %472 : vector<1x8xf32> -> vector<1x8xf32>
    %474 = vector.broadcast %473 : vector<1x8xf32> to vector<32x8xf32>
    %475 = arith.mulf %464, %474 : vector<32x8xf32>
    %c0_333 = arith.constant 0 : index
    %c64 = arith.constant 64 : index
    %476 = vector.load %arg10[%c0_333, %c64] : memref<32x128xf32, #tpu.memory_space<vmem>>, vector<32x8xf32>
    tpu.vector_store %arg10[%c0_333, %c64], %475 {strides = array<i32>} : memref<32x128xf32, #tpu.memory_space<vmem>>, vector<32x8xf32>,
    %c9 = arith.constant 9 : index
    %c0_334 = arith.constant 0 : index
    %c0_335 = arith.constant 0 : index
    %477 = vector.load %arg1[%c9, %c0_334, %c0_335] : memref<16x32x8xf32, #tpu.memory_space<vmem>>, vector<1x32x8xf32>
    %478 = vector.shape_cast %477 : vector<1x32x8xf32> to vector<32x8xf32>
    %c9_336 = arith.constant 9 : index
    %c0_337 = arith.constant 0 : index
    %c0_338 = arith.constant 0 : index
    %479 = vector.load %arg2[%c9_336, %c0_337, %c0_338] : memref<16x32x1xf32, #tpu.memory_space<vmem>>, vector<1x32x1xf32>
    %480 = vector.shape_cast %479 : vector<1x32x1xf32> to vector<32x1xf32>
    %c9_339 = arith.constant 9 : index
    %c0_340 = arith.constant 0 : index
    %c0_341 = arith.constant 0 : index
    %481 = vector.load %arg3[%c9_339, %c0_340, %c0_341] : memref<16x8x10xf32, #tpu.memory_space<vmem>>, vector<1x8x10xf32>
    %482 = vector.shape_cast %481 : vector<1x8x10xf32> to vector<8x10xf32>
    %cst_342 = arith.constant dense<0.000000e+00> : vector<32x10xf32>
    %483 = tpu.matmul %478, %482, %cst_342 {dimension_numbers = #tpu.dot_dimension_numbers<[1], [0], [0], [1], [0, 0, 1, 1], [], []>} : vector<32x8xf32>, vector<8x10xf32>, vector<32x10xf32> -> vector<32x10xf32>
    %c9_343 = arith.constant 9 : index
    %c0_344 = arith.constant 0 : index
    %c0_345 = arith.constant 0 : index
    %484 = vector.load %arg4[%c9_343, %c0_344, %c0_345] : memref<16x1x10xf32, #tpu.memory_space<vmem>>, vector<1x1x10xf32>
    %485 = vector.shape_cast %484 : vector<1x1x10xf32> to vector<1x10xf32>
    %486 = vector.broadcast %480 : vector<32x1xf32> to vector<32x10xf32>
    %487 = vector.broadcast %485 : vector<1x10xf32> to vector<32x10xf32>
    %488 = arith.mulf %486, %487 : vector<32x10xf32>
    %489 = arith.addf %483, %488 : vector<32x10xf32>
    %c9_346 = arith.constant 9 : index
    %c0_347 = arith.constant 0 : index
    %c0_348 = arith.constant 0 : index
    %490 = vector.load %arg5[%c9_346, %c0_347, %c0_348] : memref<16x1x10xf32, #tpu.memory_space<vmem>>, vector<1x1x10xf32>
    %491 = vector.shape_cast %490 : vector<1x1x10xf32> to vector<1x10xf32>
    %492 = vector.broadcast %491 : vector<1x10xf32> to vector<32x10xf32>
    %493 = arith.addf %489, %492 : vector<32x10xf32>
    %cst_349 = arith.constant 0.000000e+00 : f32
    %494 = vector.broadcast %cst_349 : f32 to vector<32x10xf32>
    %495 = arith.maximumf %493, %494 : vector<32x10xf32>
    %c9_350 = arith.constant 9 : index
    %c0_351 = arith.constant 0 : index
    %c0_352 = arith.constant 0 : index
    %496 = vector.load %arg6[%c9_350, %c0_351, %c0_352] : memref<16x10x10xf32, #tpu.memory_space<vmem>>, vector<1x10x10xf32>
    %497 = vector.shape_cast %496 : vector<1x10x10xf32> to vector<10x10xf32>
    %cst_353 = arith.constant dense<0.000000e+00> : vector<32x10xf32>
    %498 = tpu.matmul %495, %497, %cst_353 {dimension_numbers = #tpu.dot_dimension_numbers<[1], [0], [0], [1], [0, 0, 1, 1], [], []>} : vector<32x10xf32>, vector<10x10xf32>, vector<32x10xf32> -> vector<32x10xf32>
    %c9_354 = arith.constant 9 : index
    %c0_355 = arith.constant 0 : index
    %c0_356 = arith.constant 0 : index
    %499 = vector.load %arg7[%c9_354, %c0_355, %c0_356] : memref<16x1x10xf32, #tpu.memory_space<vmem>>, vector<1x1x10xf32>
    %500 = vector.shape_cast %499 : vector<1x1x10xf32> to vector<1x10xf32>
    %501 = vector.broadcast %500 : vector<1x10xf32> to vector<32x10xf32>
    %502 = arith.addf %498, %501 : vector<32x10xf32>
    %cst_357 = arith.constant 0.000000e+00 : f32
    %503 = vector.broadcast %cst_357 : f32 to vector<32x10xf32>
    %504 = arith.maximumf %502, %503 : vector<32x10xf32>
    %c9_358 = arith.constant 9 : index
    %c0_359 = arith.constant 0 : index
    %c0_360 = arith.constant 0 : index
    %505 = vector.load %arg8[%c9_358, %c0_359, %c0_360] : memref<16x10x8xf32, #tpu.memory_space<vmem>>, vector<1x10x8xf32>
    %506 = vector.shape_cast %505 : vector<1x10x8xf32> to vector<10x8xf32>
    %cst_361 = arith.constant dense<0.000000e+00> : vector<32x8xf32>
    %507 = tpu.matmul %504, %506, %cst_361 {dimension_numbers = #tpu.dot_dimension_numbers<[1], [0], [0], [1], [0, 0, 1, 1], [], []>} : vector<32x10xf32>, vector<10x8xf32>, vector<32x8xf32> -> vector<32x8xf32>
    %c9_362 = arith.constant 9 : index
    %c0_363 = arith.constant 0 : index
    %c0_364 = arith.constant 0 : index
    %508 = vector.load %arg9[%c9_362, %c0_363, %c0_364] : memref<16x1x8xf32, #tpu.memory_space<vmem>>, vector<1x1x8xf32>
    %509 = vector.shape_cast %508 : vector<1x1x8xf32> to vector<1x8xf32>
    %510 = vector.broadcast %509 : vector<1x8xf32> to vector<32x8xf32>
    %511 = arith.addf %507, %510 : vector<32x8xf32>
    %cst_365 = arith.constant dense<0.000000e+00> : vector<8xf32>
    %512 = vector.multi_reduction <add>, %511, %cst_365 [0] : vector<32x8xf32> to vector<8xf32>
    %513 = vector.shape_cast %512 : vector<8xf32> to vector<1x8xf32>
    %cst_366 = arith.constant 3.200000e+01 : f32
    %514 = vector.broadcast %cst_366 : f32 to vector<1x8xf32>
    %515 = arith.divf %513, %514 : vector<1x8xf32>
    %516 = vector.broadcast %515 : vector<1x8xf32> to vector<32x8xf32>
    %517 = arith.subf %511, %516 : vector<32x8xf32>
    %518 = arith.mulf %517, %517 : vector<32x8xf32>
    %cst_367 = arith.constant dense<0.000000e+00> : vector<8xf32>
    %519 = vector.multi_reduction <add>, %518, %cst_367 [0] : vector<32x8xf32> to vector<8xf32>
    %520 = vector.shape_cast %519 : vector<8xf32> to vector<1x8xf32>
    %cst_368 = arith.constant 0.0322580636 : f32
    %521 = vector.broadcast %cst_368 : f32 to vector<1x8xf32>
    %522 = arith.mulf %520, %521 : vector<1x8xf32>
    %523 = math.sqrt %522 : vector<1x8xf32>
    %cst_369 = arith.constant 9.99999974E-6 : f32
    %524 = vector.broadcast %cst_369 : f32 to vector<1x8xf32>
    %525 = arith.addf %523, %524 : vector<1x8xf32>
    %526 = tpu.reciprocal %525 : vector<1x8xf32> -> vector<1x8xf32>
    %527 = vector.broadcast %526 : vector<1x8xf32> to vector<32x8xf32>
    %528 = arith.mulf %517, %527 : vector<32x8xf32>
    %c0_370 = arith.constant 0 : index
    %c72 = arith.constant 72 : index
    %529 = vector.load %arg10[%c0_370, %c72] : memref<32x128xf32, #tpu.memory_space<vmem>>, vector<32x8xf32>
    tpu.vector_store %arg10[%c0_370, %c72], %528 {strides = array<i32>} : memref<32x128xf32, #tpu.memory_space<vmem>>, vector<32x8xf32>,
    %c10 = arith.constant 10 : index
    %c0_371 = arith.constant 0 : index
    %c0_372 = arith.constant 0 : index
    %530 = vector.load %arg1[%c10, %c0_371, %c0_372] : memref<16x32x8xf32, #tpu.memory_space<vmem>>, vector<1x32x8xf32>
    %531 = vector.shape_cast %530 : vector<1x32x8xf32> to vector<32x8xf32>
    %c10_373 = arith.constant 10 : index
    %c0_374 = arith.constant 0 : index
    %c0_375 = arith.constant 0 : index
    %532 = vector.load %arg2[%c10_373, %c0_374, %c0_375] : memref<16x32x1xf32, #tpu.memory_space<vmem>>, vector<1x32x1xf32>
    %533 = vector.shape_cast %532 : vector<1x32x1xf32> to vector<32x1xf32>
    %c10_376 = arith.constant 10 : index
    %c0_377 = arith.constant 0 : index
    %c0_378 = arith.constant 0 : index
    %534 = vector.load %arg3[%c10_376, %c0_377, %c0_378] : memref<16x8x10xf32, #tpu.memory_space<vmem>>, vector<1x8x10xf32>
    %535 = vector.shape_cast %534 : vector<1x8x10xf32> to vector<8x10xf32>
    %cst_379 = arith.constant dense<0.000000e+00> : vector<32x10xf32>
    %536 = tpu.matmul %531, %535, %cst_379 {dimension_numbers = #tpu.dot_dimension_numbers<[1], [0], [0], [1], [0, 0, 1, 1], [], []>} : vector<32x8xf32>, vector<8x10xf32>, vector<32x10xf32> -> vector<32x10xf32>
    %c10_380 = arith.constant 10 : index
    %c0_381 = arith.constant 0 : index
    %c0_382 = arith.constant 0 : index
    %537 = vector.load %arg4[%c10_380, %c0_381, %c0_382] : memref<16x1x10xf32, #tpu.memory_space<vmem>>, vector<1x1x10xf32>
    %538 = vector.shape_cast %537 : vector<1x1x10xf32> to vector<1x10xf32>
    %539 = vector.broadcast %533 : vector<32x1xf32> to vector<32x10xf32>
    %540 = vector.broadcast %538 : vector<1x10xf32> to vector<32x10xf32>
    %541 = arith.mulf %539, %540 : vector<32x10xf32>
    %542 = arith.addf %536, %541 : vector<32x10xf32>
    %c10_383 = arith.constant 10 : index
    %c0_384 = arith.constant 0 : index
    %c0_385 = arith.constant 0 : index
    %543 = vector.load %arg5[%c10_383, %c0_384, %c0_385] : memref<16x1x10xf32, #tpu.memory_space<vmem>>, vector<1x1x10xf32>
    %544 = vector.shape_cast %543 : vector<1x1x10xf32> to vector<1x10xf32>
    %545 = vector.broadcast %544 : vector<1x10xf32> to vector<32x10xf32>
    %546 = arith.addf %542, %545 : vector<32x10xf32>
    %cst_386 = arith.constant 0.000000e+00 : f32
    %547 = vector.broadcast %cst_386 : f32 to vector<32x10xf32>
    %548 = arith.maximumf %546, %547 : vector<32x10xf32>
    %c10_387 = arith.constant 10 : index
    %c0_388 = arith.constant 0 : index
    %c0_389 = arith.constant 0 : index
    %549 = vector.load %arg6[%c10_387, %c0_388, %c0_389] : memref<16x10x10xf32, #tpu.memory_space<vmem>>, vector<1x10x10xf32>
    %550 = vector.shape_cast %549 : vector<1x10x10xf32> to vector<10x10xf32>
    %cst_390 = arith.constant dense<0.000000e+00> : vector<32x10xf32>
    %551 = tpu.matmul %548, %550, %cst_390 {dimension_numbers = #tpu.dot_dimension_numbers<[1], [0], [0], [1], [0, 0, 1, 1], [], []>} : vector<32x10xf32>, vector<10x10xf32>, vector<32x10xf32> -> vector<32x10xf32>
    %c10_391 = arith.constant 10 : index
    %c0_392 = arith.constant 0 : index
    %c0_393 = arith.constant 0 : index
    %552 = vector.load %arg7[%c10_391, %c0_392, %c0_393] : memref<16x1x10xf32, #tpu.memory_space<vmem>>, vector<1x1x10xf32>
    %553 = vector.shape_cast %552 : vector<1x1x10xf32> to vector<1x10xf32>
    %554 = vector.broadcast %553 : vector<1x10xf32> to vector<32x10xf32>
    %555 = arith.addf %551, %554 : vector<32x10xf32>
    %cst_394 = arith.constant 0.000000e+00 : f32
    %556 = vector.broadcast %cst_394 : f32 to vector<32x10xf32>
    %557 = arith.maximumf %555, %556 : vector<32x10xf32>
    %c10_395 = arith.constant 10 : index
    %c0_396 = arith.constant 0 : index
    %c0_397 = arith.constant 0 : index
    %558 = vector.load %arg8[%c10_395, %c0_396, %c0_397] : memref<16x10x8xf32, #tpu.memory_space<vmem>>, vector<1x10x8xf32>
    %559 = vector.shape_cast %558 : vector<1x10x8xf32> to vector<10x8xf32>
    %cst_398 = arith.constant dense<0.000000e+00> : vector<32x8xf32>
    %560 = tpu.matmul %557, %559, %cst_398 {dimension_numbers = #tpu.dot_dimension_numbers<[1], [0], [0], [1], [0, 0, 1, 1], [], []>} : vector<32x10xf32>, vector<10x8xf32>, vector<32x8xf32> -> vector<32x8xf32>
    %c10_399 = arith.constant 10 : index
    %c0_400 = arith.constant 0 : index
    %c0_401 = arith.constant 0 : index
    %561 = vector.load %arg9[%c10_399, %c0_400, %c0_401] : memref<16x1x8xf32, #tpu.memory_space<vmem>>, vector<1x1x8xf32>
    %562 = vector.shape_cast %561 : vector<1x1x8xf32> to vector<1x8xf32>
    %563 = vector.broadcast %562 : vector<1x8xf32> to vector<32x8xf32>
    %564 = arith.addf %560, %563 : vector<32x8xf32>
    %cst_402 = arith.constant dense<0.000000e+00> : vector<8xf32>
    %565 = vector.multi_reduction <add>, %564, %cst_402 [0] : vector<32x8xf32> to vector<8xf32>
    %566 = vector.shape_cast %565 : vector<8xf32> to vector<1x8xf32>
    %cst_403 = arith.constant 3.200000e+01 : f32
    %567 = vector.broadcast %cst_403 : f32 to vector<1x8xf32>
    %568 = arith.divf %566, %567 : vector<1x8xf32>
    %569 = vector.broadcast %568 : vector<1x8xf32> to vector<32x8xf32>
    %570 = arith.subf %564, %569 : vector<32x8xf32>
    %571 = arith.mulf %570, %570 : vector<32x8xf32>
    %cst_404 = arith.constant dense<0.000000e+00> : vector<8xf32>
    %572 = vector.multi_reduction <add>, %571, %cst_404 [0] : vector<32x8xf32> to vector<8xf32>
    %573 = vector.shape_cast %572 : vector<8xf32> to vector<1x8xf32>
    %cst_405 = arith.constant 0.0322580636 : f32
    %574 = vector.broadcast %cst_405 : f32 to vector<1x8xf32>
    %575 = arith.mulf %573, %574 : vector<1x8xf32>
    %576 = math.sqrt %575 : vector<1x8xf32>
    %cst_406 = arith.constant 9.99999974E-6 : f32
    %577 = vector.broadcast %cst_406 : f32 to vector<1x8xf32>
    %578 = arith.addf %576, %577 : vector<1x8xf32>
    %579 = tpu.reciprocal %578 : vector<1x8xf32> -> vector<1x8xf32>
    %580 = vector.broadcast %579 : vector<1x8xf32> to vector<32x8xf32>
    %581 = arith.mulf %570, %580 : vector<32x8xf32>
    %c0_407 = arith.constant 0 : index
    %c80 = arith.constant 80 : index
    %582 = vector.load %arg10[%c0_407, %c80] : memref<32x128xf32, #tpu.memory_space<vmem>>, vector<32x8xf32>
    tpu.vector_store %arg10[%c0_407, %c80], %581 {strides = array<i32>} : memref<32x128xf32, #tpu.memory_space<vmem>>, vector<32x8xf32>,
    %c11 = arith.constant 11 : index
    %c0_408 = arith.constant 0 : index
    %c0_409 = arith.constant 0 : index
    %583 = vector.load %arg1[%c11, %c0_408, %c0_409] : memref<16x32x8xf32, #tpu.memory_space<vmem>>, vector<1x32x8xf32>
    %584 = vector.shape_cast %583 : vector<1x32x8xf32> to vector<32x8xf32>
    %c11_410 = arith.constant 11 : index
    %c0_411 = arith.constant 0 : index
    %c0_412 = arith.constant 0 : index
    %585 = vector.load %arg2[%c11_410, %c0_411, %c0_412] : memref<16x32x1xf32, #tpu.memory_space<vmem>>, vector<1x32x1xf32>
    %586 = vector.shape_cast %585 : vector<1x32x1xf32> to vector<32x1xf32>
    %c11_413 = arith.constant 11 : index
    %c0_414 = arith.constant 0 : index
    %c0_415 = arith.constant 0 : index
    %587 = vector.load %arg3[%c11_413, %c0_414, %c0_415] : memref<16x8x10xf32, #tpu.memory_space<vmem>>, vector<1x8x10xf32>
    %588 = vector.shape_cast %587 : vector<1x8x10xf32> to vector<8x10xf32>
    %cst_416 = arith.constant dense<0.000000e+00> : vector<32x10xf32>
    %589 = tpu.matmul %584, %588, %cst_416 {dimension_numbers = #tpu.dot_dimension_numbers<[1], [0], [0], [1], [0, 0, 1, 1], [], []>} : vector<32x8xf32>, vector<8x10xf32>, vector<32x10xf32> -> vector<32x10xf32>
    %c11_417 = arith.constant 11 : index
    %c0_418 = arith.constant 0 : index
    %c0_419 = arith.constant 0 : index
    %590 = vector.load %arg4[%c11_417, %c0_418, %c0_419] : memref<16x1x10xf32, #tpu.memory_space<vmem>>, vector<1x1x10xf32>
    %591 = vector.shape_cast %590 : vector<1x1x10xf32> to vector<1x10xf32>
    %592 = vector.broadcast %586 : vector<32x1xf32> to vector<32x10xf32>
    %593 = vector.broadcast %591 : vector<1x10xf32> to vector<32x10xf32>
    %594 = arith.mulf %592, %593 : vector<32x10xf32>
    %595 = arith.addf %589, %594 : vector<32x10xf32>
    %c11_420 = arith.constant 11 : index
    %c0_421 = arith.constant 0 : index
    %c0_422 = arith.constant 0 : index
    %596 = vector.load %arg5[%c11_420, %c0_421, %c0_422] : memref<16x1x10xf32, #tpu.memory_space<vmem>>, vector<1x1x10xf32>
    %597 = vector.shape_cast %596 : vector<1x1x10xf32> to vector<1x10xf32>
    %598 = vector.broadcast %597 : vector<1x10xf32> to vector<32x10xf32>
    %599 = arith.addf %595, %598 : vector<32x10xf32>
    %cst_423 = arith.constant 0.000000e+00 : f32
    %600 = vector.broadcast %cst_423 : f32 to vector<32x10xf32>
    %601 = arith.maximumf %599, %600 : vector<32x10xf32>
    %c11_424 = arith.constant 11 : index
    %c0_425 = arith.constant 0 : index
    %c0_426 = arith.constant 0 : index
    %602 = vector.load %arg6[%c11_424, %c0_425, %c0_426] : memref<16x10x10xf32, #tpu.memory_space<vmem>>, vector<1x10x10xf32>
    %603 = vector.shape_cast %602 : vector<1x10x10xf32> to vector<10x10xf32>
    %cst_427 = arith.constant dense<0.000000e+00> : vector<32x10xf32>
    %604 = tpu.matmul %601, %603, %cst_427 {dimension_numbers = #tpu.dot_dimension_numbers<[1], [0], [0], [1], [0, 0, 1, 1], [], []>} : vector<32x10xf32>, vector<10x10xf32>, vector<32x10xf32> -> vector<32x10xf32>
    %c11_428 = arith.constant 11 : index
    %c0_429 = arith.constant 0 : index
    %c0_430 = arith.constant 0 : index
    %605 = vector.load %arg7[%c11_428, %c0_429, %c0_430] : memref<16x1x10xf32, #tpu.memory_space<vmem>>, vector<1x1x10xf32>
    %606 = vector.shape_cast %605 : vector<1x1x10xf32> to vector<1x10xf32>
    %607 = vector.broadcast %606 : vector<1x10xf32> to vector<32x10xf32>
    %608 = arith.addf %604, %607 : vector<32x10xf32>
    %cst_431 = arith.constant 0.000000e+00 : f32
    %609 = vector.broadcast %cst_431 : f32 to vector<32x10xf32>
    %610 = arith.maximumf %608, %609 : vector<32x10xf32>
    %c11_432 = arith.constant 11 : index
    %c0_433 = arith.constant 0 : index
    %c0_434 = arith.constant 0 : index
    %611 = vector.load %arg8[%c11_432, %c0_433, %c0_434] : memref<16x10x8xf32, #tpu.memory_space<vmem>>, vector<1x10x8xf32>
    %612 = vector.shape_cast %611 : vector<1x10x8xf32> to vector<10x8xf32>
    %cst_435 = arith.constant dense<0.000000e+00> : vector<32x8xf32>
    %613 = tpu.matmul %610, %612, %cst_435 {dimension_numbers = #tpu.dot_dimension_numbers<[1], [0], [0], [1], [0, 0, 1, 1], [], []>} : vector<32x10xf32>, vector<10x8xf32>, vector<32x8xf32> -> vector<32x8xf32>
    %c11_436 = arith.constant 11 : index
    %c0_437 = arith.constant 0 : index
    %c0_438 = arith.constant 0 : index
    %614 = vector.load %arg9[%c11_436, %c0_437, %c0_438] : memref<16x1x8xf32, #tpu.memory_space<vmem>>, vector<1x1x8xf32>
    %615 = vector.shape_cast %614 : vector<1x1x8xf32> to vector<1x8xf32>
    %616 = vector.broadcast %615 : vector<1x8xf32> to vector<32x8xf32>
    %617 = arith.addf %613, %616 : vector<32x8xf32>
    %cst_439 = arith.constant dense<0.000000e+00> : vector<8xf32>
    %618 = vector.multi_reduction <add>, %617, %cst_439 [0] : vector<32x8xf32> to vector<8xf32>
    %619 = vector.shape_cast %618 : vector<8xf32> to vector<1x8xf32>
    %cst_440 = arith.constant 3.200000e+01 : f32
    %620 = vector.broadcast %cst_440 : f32 to vector<1x8xf32>
    %621 = arith.divf %619, %620 : vector<1x8xf32>
    %622 = vector.broadcast %621 : vector<1x8xf32> to vector<32x8xf32>
    %623 = arith.subf %617, %622 : vector<32x8xf32>
    %624 = arith.mulf %623, %623 : vector<32x8xf32>
    %cst_441 = arith.constant dense<0.000000e+00> : vector<8xf32>
    %625 = vector.multi_reduction <add>, %624, %cst_441 [0] : vector<32x8xf32> to vector<8xf32>
    %626 = vector.shape_cast %625 : vector<8xf32> to vector<1x8xf32>
    %cst_442 = arith.constant 0.0322580636 : f32
    %627 = vector.broadcast %cst_442 : f32 to vector<1x8xf32>
    %628 = arith.mulf %626, %627 : vector<1x8xf32>
    %629 = math.sqrt %628 : vector<1x8xf32>
    %cst_443 = arith.constant 9.99999974E-6 : f32
    %630 = vector.broadcast %cst_443 : f32 to vector<1x8xf32>
    %631 = arith.addf %629, %630 : vector<1x8xf32>
    %632 = tpu.reciprocal %631 : vector<1x8xf32> -> vector<1x8xf32>
    %633 = vector.broadcast %632 : vector<1x8xf32> to vector<32x8xf32>
    %634 = arith.mulf %623, %633 : vector<32x8xf32>
    %c0_444 = arith.constant 0 : index
    %c88 = arith.constant 88 : index
    %635 = vector.load %arg10[%c0_444, %c88] : memref<32x128xf32, #tpu.memory_space<vmem>>, vector<32x8xf32>
    tpu.vector_store %arg10[%c0_444, %c88], %634 {strides = array<i32>} : memref<32x128xf32, #tpu.memory_space<vmem>>, vector<32x8xf32>,
    %c12 = arith.constant 12 : index
    %c0_445 = arith.constant 0 : index
    %c0_446 = arith.constant 0 : index
    %636 = vector.load %arg1[%c12, %c0_445, %c0_446] : memref<16x32x8xf32, #tpu.memory_space<vmem>>, vector<1x32x8xf32>
    %637 = vector.shape_cast %636 : vector<1x32x8xf32> to vector<32x8xf32>
    %c12_447 = arith.constant 12 : index
    %c0_448 = arith.constant 0 : index
    %c0_449 = arith.constant 0 : index
    %638 = vector.load %arg2[%c12_447, %c0_448, %c0_449] : memref<16x32x1xf32, #tpu.memory_space<vmem>>, vector<1x32x1xf32>
    %639 = vector.shape_cast %638 : vector<1x32x1xf32> to vector<32x1xf32>
    %c12_450 = arith.constant 12 : index
    %c0_451 = arith.constant 0 : index
    %c0_452 = arith.constant 0 : index
    %640 = vector.load %arg3[%c12_450, %c0_451, %c0_452] : memref<16x8x10xf32, #tpu.memory_space<vmem>>, vector<1x8x10xf32>
    %641 = vector.shape_cast %640 : vector<1x8x10xf32> to vector<8x10xf32>
    %cst_453 = arith.constant dense<0.000000e+00> : vector<32x10xf32>
    %642 = tpu.matmul %637, %641, %cst_453 {dimension_numbers = #tpu.dot_dimension_numbers<[1], [0], [0], [1], [0, 0, 1, 1], [], []>} : vector<32x8xf32>, vector<8x10xf32>, vector<32x10xf32> -> vector<32x10xf32>
    %c12_454 = arith.constant 12 : index
    %c0_455 = arith.constant 0 : index
    %c0_456 = arith.constant 0 : index
    %643 = vector.load %arg4[%c12_454, %c0_455, %c0_456] : memref<16x1x10xf32, #tpu.memory_space<vmem>>, vector<1x1x10xf32>
    %644 = vector.shape_cast %643 : vector<1x1x10xf32> to vector<1x10xf32>
    %645 = vector.broadcast %639 : vector<32x1xf32> to vector<32x10xf32>
    %646 = vector.broadcast %644 : vector<1x10xf32> to vector<32x10xf32>
    %647 = arith.mulf %645, %646 : vector<32x10xf32>
    %648 = arith.addf %642, %647 : vector<32x10xf32>
    %c12_457 = arith.constant 12 : index
    %c0_458 = arith.constant 0 : index
    %c0_459 = arith.constant 0 : index
    %649 = vector.load %arg5[%c12_457, %c0_458, %c0_459] : memref<16x1x10xf32, #tpu.memory_space<vmem>>, vector<1x1x10xf32>
    %650 = vector.shape_cast %649 : vector<1x1x10xf32> to vector<1x10xf32>
    %651 = vector.broadcast %650 : vector<1x10xf32> to vector<32x10xf32>
    %652 = arith.addf %648, %651 : vector<32x10xf32>
    %cst_460 = arith.constant 0.000000e+00 : f32
    %653 = vector.broadcast %cst_460 : f32 to vector<32x10xf32>
    %654 = arith.maximumf %652, %653 : vector<32x10xf32>
    %c12_461 = arith.constant 12 : index
    %c0_462 = arith.constant 0 : index
    %c0_463 = arith.constant 0 : index
    %655 = vector.load %arg6[%c12_461, %c0_462, %c0_463] : memref<16x10x10xf32, #tpu.memory_space<vmem>>, vector<1x10x10xf32>
    %656 = vector.shape_cast %655 : vector<1x10x10xf32> to vector<10x10xf32>
    %cst_464 = arith.constant dense<0.000000e+00> : vector<32x10xf32>
    %657 = tpu.matmul %654, %656, %cst_464 {dimension_numbers = #tpu.dot_dimension_numbers<[1], [0], [0], [1], [0, 0, 1, 1], [], []>} : vector<32x10xf32>, vector<10x10xf32>, vector<32x10xf32> -> vector<32x10xf32>
    %c12_465 = arith.constant 12 : index
    %c0_466 = arith.constant 0 : index
    %c0_467 = arith.constant 0 : index
    %658 = vector.load %arg7[%c12_465, %c0_466, %c0_467] : memref<16x1x10xf32, #tpu.memory_space<vmem>>, vector<1x1x10xf32>
    %659 = vector.shape_cast %658 : vector<1x1x10xf32> to vector<1x10xf32>
    %660 = vector.broadcast %659 : vector<1x10xf32> to vector<32x10xf32>
    %661 = arith.addf %657, %660 : vector<32x10xf32>
    %cst_468 = arith.constant 0.000000e+00 : f32
    %662 = vector.broadcast %cst_468 : f32 to vector<32x10xf32>
    %663 = arith.maximumf %661, %662 : vector<32x10xf32>
    %c12_469 = arith.constant 12 : index
    %c0_470 = arith.constant 0 : index
    %c0_471 = arith.constant 0 : index
    %664 = vector.load %arg8[%c12_469, %c0_470, %c0_471] : memref<16x10x8xf32, #tpu.memory_space<vmem>>, vector<1x10x8xf32>
    %665 = vector.shape_cast %664 : vector<1x10x8xf32> to vector<10x8xf32>
    %cst_472 = arith.constant dense<0.000000e+00> : vector<32x8xf32>
    %666 = tpu.matmul %663, %665, %cst_472 {dimension_numbers = #tpu.dot_dimension_numbers<[1], [0], [0], [1], [0, 0, 1, 1], [], []>} : vector<32x10xf32>, vector<10x8xf32>, vector<32x8xf32> -> vector<32x8xf32>
    %c12_473 = arith.constant 12 : index
    %c0_474 = arith.constant 0 : index
    %c0_475 = arith.constant 0 : index
    %667 = vector.load %arg9[%c12_473, %c0_474, %c0_475] : memref<16x1x8xf32, #tpu.memory_space<vmem>>, vector<1x1x8xf32>
    %668 = vector.shape_cast %667 : vector<1x1x8xf32> to vector<1x8xf32>
    %669 = vector.broadcast %668 : vector<1x8xf32> to vector<32x8xf32>
    %670 = arith.addf %666, %669 : vector<32x8xf32>
    %cst_476 = arith.constant dense<0.000000e+00> : vector<8xf32>
    %671 = vector.multi_reduction <add>, %670, %cst_476 [0] : vector<32x8xf32> to vector<8xf32>
    %672 = vector.shape_cast %671 : vector<8xf32> to vector<1x8xf32>
    %cst_477 = arith.constant 3.200000e+01 : f32
    %673 = vector.broadcast %cst_477 : f32 to vector<1x8xf32>
    %674 = arith.divf %672, %673 : vector<1x8xf32>
    %675 = vector.broadcast %674 : vector<1x8xf32> to vector<32x8xf32>
    %676 = arith.subf %670, %675 : vector<32x8xf32>
    %677 = arith.mulf %676, %676 : vector<32x8xf32>
    %cst_478 = arith.constant dense<0.000000e+00> : vector<8xf32>
    %678 = vector.multi_reduction <add>, %677, %cst_478 [0] : vector<32x8xf32> to vector<8xf32>
    %679 = vector.shape_cast %678 : vector<8xf32> to vector<1x8xf32>
    %cst_479 = arith.constant 0.0322580636 : f32
    %680 = vector.broadcast %cst_479 : f32 to vector<1x8xf32>
    %681 = arith.mulf %679, %680 : vector<1x8xf32>
    %682 = math.sqrt %681 : vector<1x8xf32>
    %cst_480 = arith.constant 9.99999974E-6 : f32
    %683 = vector.broadcast %cst_480 : f32 to vector<1x8xf32>
    %684 = arith.addf %682, %683 : vector<1x8xf32>
    %685 = tpu.reciprocal %684 : vector<1x8xf32> -> vector<1x8xf32>
    %686 = vector.broadcast %685 : vector<1x8xf32> to vector<32x8xf32>
    %687 = arith.mulf %676, %686 : vector<32x8xf32>
    %c0_481 = arith.constant 0 : index
    %c96 = arith.constant 96 : index
    %688 = vector.load %arg10[%c0_481, %c96] : memref<32x128xf32, #tpu.memory_space<vmem>>, vector<32x8xf32>
    tpu.vector_store %arg10[%c0_481, %c96], %687 {strides = array<i32>} : memref<32x128xf32, #tpu.memory_space<vmem>>, vector<32x8xf32>,
    %c13 = arith.constant 13 : index
    %c0_482 = arith.constant 0 : index
    %c0_483 = arith.constant 0 : index
    %689 = vector.load %arg1[%c13, %c0_482, %c0_483] : memref<16x32x8xf32, #tpu.memory_space<vmem>>, vector<1x32x8xf32>
    %690 = vector.shape_cast %689 : vector<1x32x8xf32> to vector<32x8xf32>
    %c13_484 = arith.constant 13 : index
    %c0_485 = arith.constant 0 : index
    %c0_486 = arith.constant 0 : index
    %691 = vector.load %arg2[%c13_484, %c0_485, %c0_486] : memref<16x32x1xf32, #tpu.memory_space<vmem>>, vector<1x32x1xf32>
    %692 = vector.shape_cast %691 : vector<1x32x1xf32> to vector<32x1xf32>
    %c13_487 = arith.constant 13 : index
    %c0_488 = arith.constant 0 : index
    %c0_489 = arith.constant 0 : index
    %693 = vector.load %arg3[%c13_487, %c0_488, %c0_489] : memref<16x8x10xf32, #tpu.memory_space<vmem>>, vector<1x8x10xf32>
    %694 = vector.shape_cast %693 : vector<1x8x10xf32> to vector<8x10xf32>
    %cst_490 = arith.constant dense<0.000000e+00> : vector<32x10xf32>
    %695 = tpu.matmul %690, %694, %cst_490 {dimension_numbers = #tpu.dot_dimension_numbers<[1], [0], [0], [1], [0, 0, 1, 1], [], []>} : vector<32x8xf32>, vector<8x10xf32>, vector<32x10xf32> -> vector<32x10xf32>
    %c13_491 = arith.constant 13 : index
    %c0_492 = arith.constant 0 : index
    %c0_493 = arith.constant 0 : index
    %696 = vector.load %arg4[%c13_491, %c0_492, %c0_493] : memref<16x1x10xf32, #tpu.memory_space<vmem>>, vector<1x1x10xf32>
    %697 = vector.shape_cast %696 : vector<1x1x10xf32> to vector<1x10xf32>
    %698 = vector.broadcast %692 : vector<32x1xf32> to vector<32x10xf32>
    %699 = vector.broadcast %697 : vector<1x10xf32> to vector<32x10xf32>
    %700 = arith.mulf %698, %699 : vector<32x10xf32>
    %701 = arith.addf %695, %700 : vector<32x10xf32>
    %c13_494 = arith.constant 13 : index
    %c0_495 = arith.constant 0 : index
    %c0_496 = arith.constant 0 : index
    %702 = vector.load %arg5[%c13_494, %c0_495, %c0_496] : memref<16x1x10xf32, #tpu.memory_space<vmem>>, vector<1x1x10xf32>
    %703 = vector.shape_cast %702 : vector<1x1x10xf32> to vector<1x10xf32>
    %704 = vector.broadcast %703 : vector<1x10xf32> to vector<32x10xf32>
    %705 = arith.addf %701, %704 : vector<32x10xf32>
    %cst_497 = arith.constant 0.000000e+00 : f32
    %706 = vector.broadcast %cst_497 : f32 to vector<32x10xf32>
    %707 = arith.maximumf %705, %706 : vector<32x10xf32>
    %c13_498 = arith.constant 13 : index
    %c0_499 = arith.constant 0 : index
    %c0_500 = arith.constant 0 : index
    %708 = vector.load %arg6[%c13_498, %c0_499, %c0_500] : memref<16x10x10xf32, #tpu.memory_space<vmem>>, vector<1x10x10xf32>
    %709 = vector.shape_cast %708 : vector<1x10x10xf32> to vector<10x10xf32>
    %cst_501 = arith.constant dense<0.000000e+00> : vector<32x10xf32>
    %710 = tpu.matmul %707, %709, %cst_501 {dimension_numbers = #tpu.dot_dimension_numbers<[1], [0], [0], [1], [0, 0, 1, 1], [], []>} : vector<32x10xf32>, vector<10x10xf32>, vector<32x10xf32> -> vector<32x10xf32>
    %c13_502 = arith.constant 13 : index
    %c0_503 = arith.constant 0 : index
    %c0_504 = arith.constant 0 : index
    %711 = vector.load %arg7[%c13_502, %c0_503, %c0_504] : memref<16x1x10xf32, #tpu.memory_space<vmem>>, vector<1x1x10xf32>
    %712 = vector.shape_cast %711 : vector<1x1x10xf32> to vector<1x10xf32>
    %713 = vector.broadcast %712 : vector<1x10xf32> to vector<32x10xf32>
    %714 = arith.addf %710, %713 : vector<32x10xf32>
    %cst_505 = arith.constant 0.000000e+00 : f32
    %715 = vector.broadcast %cst_505 : f32 to vector<32x10xf32>
    %716 = arith.maximumf %714, %715 : vector<32x10xf32>
    %c13_506 = arith.constant 13 : index
    %c0_507 = arith.constant 0 : index
    %c0_508 = arith.constant 0 : index
    %717 = vector.load %arg8[%c13_506, %c0_507, %c0_508] : memref<16x10x8xf32, #tpu.memory_space<vmem>>, vector<1x10x8xf32>
    %718 = vector.shape_cast %717 : vector<1x10x8xf32> to vector<10x8xf32>
    %cst_509 = arith.constant dense<0.000000e+00> : vector<32x8xf32>
    %719 = tpu.matmul %716, %718, %cst_509 {dimension_numbers = #tpu.dot_dimension_numbers<[1], [0], [0], [1], [0, 0, 1, 1], [], []>} : vector<32x10xf32>, vector<10x8xf32>, vector<32x8xf32> -> vector<32x8xf32>
    %c13_510 = arith.constant 13 : index
    %c0_511 = arith.constant 0 : index
    %c0_512 = arith.constant 0 : index
    %720 = vector.load %arg9[%c13_510, %c0_511, %c0_512] : memref<16x1x8xf32, #tpu.memory_space<vmem>>, vector<1x1x8xf32>
    %721 = vector.shape_cast %720 : vector<1x1x8xf32> to vector<1x8xf32>
    %722 = vector.broadcast %721 : vector<1x8xf32> to vector<32x8xf32>
    %723 = arith.addf %719, %722 : vector<32x8xf32>
    %cst_513 = arith.constant dense<0.000000e+00> : vector<8xf32>
    %724 = vector.multi_reduction <add>, %723, %cst_513 [0] : vector<32x8xf32> to vector<8xf32>
    %725 = vector.shape_cast %724 : vector<8xf32> to vector<1x8xf32>
    %cst_514 = arith.constant 3.200000e+01 : f32
    %726 = vector.broadcast %cst_514 : f32 to vector<1x8xf32>
    %727 = arith.divf %725, %726 : vector<1x8xf32>
    %728 = vector.broadcast %727 : vector<1x8xf32> to vector<32x8xf32>
    %729 = arith.subf %723, %728 : vector<32x8xf32>
    %730 = arith.mulf %729, %729 : vector<32x8xf32>
    %cst_515 = arith.constant dense<0.000000e+00> : vector<8xf32>
    %731 = vector.multi_reduction <add>, %730, %cst_515 [0] : vector<32x8xf32> to vector<8xf32>
    %732 = vector.shape_cast %731 : vector<8xf32> to vector<1x8xf32>
    %cst_516 = arith.constant 0.0322580636 : f32
    %733 = vector.broadcast %cst_516 : f32 to vector<1x8xf32>
    %734 = arith.mulf %732, %733 : vector<1x8xf32>
    %735 = math.sqrt %734 : vector<1x8xf32>
    %cst_517 = arith.constant 9.99999974E-6 : f32
    %736 = vector.broadcast %cst_517 : f32 to vector<1x8xf32>
    %737 = arith.addf %735, %736 : vector<1x8xf32>
    %738 = tpu.reciprocal %737 : vector<1x8xf32> -> vector<1x8xf32>
    %739 = vector.broadcast %738 : vector<1x8xf32> to vector<32x8xf32>
    %740 = arith.mulf %729, %739 : vector<32x8xf32>
    %c0_518 = arith.constant 0 : index
    %c104 = arith.constant 104 : index
    %741 = vector.load %arg10[%c0_518, %c104] : memref<32x128xf32, #tpu.memory_space<vmem>>, vector<32x8xf32>
    tpu.vector_store %arg10[%c0_518, %c104], %740 {strides = array<i32>} : memref<32x128xf32, #tpu.memory_space<vmem>>, vector<32x8xf32>,
    %c14 = arith.constant 14 : index
    %c0_519 = arith.constant 0 : index
    %c0_520 = arith.constant 0 : index
    %742 = vector.load %arg1[%c14, %c0_519, %c0_520] : memref<16x32x8xf32, #tpu.memory_space<vmem>>, vector<1x32x8xf32>
    %743 = vector.shape_cast %742 : vector<1x32x8xf32> to vector<32x8xf32>
    %c14_521 = arith.constant 14 : index
    %c0_522 = arith.constant 0 : index
    %c0_523 = arith.constant 0 : index
    %744 = vector.load %arg2[%c14_521, %c0_522, %c0_523] : memref<16x32x1xf32, #tpu.memory_space<vmem>>, vector<1x32x1xf32>
    %745 = vector.shape_cast %744 : vector<1x32x1xf32> to vector<32x1xf32>
    %c14_524 = arith.constant 14 : index
    %c0_525 = arith.constant 0 : index
    %c0_526 = arith.constant 0 : index
    %746 = vector.load %arg3[%c14_524, %c0_525, %c0_526] : memref<16x8x10xf32, #tpu.memory_space<vmem>>, vector<1x8x10xf32>
    %747 = vector.shape_cast %746 : vector<1x8x10xf32> to vector<8x10xf32>
    %cst_527 = arith.constant dense<0.000000e+00> : vector<32x10xf32>
    %748 = tpu.matmul %743, %747, %cst_527 {dimension_numbers = #tpu.dot_dimension_numbers<[1], [0], [0], [1], [0, 0, 1, 1], [], []>} : vector<32x8xf32>, vector<8x10xf32>, vector<32x10xf32> -> vector<32x10xf32>
    %c14_528 = arith.constant 14 : index
    %c0_529 = arith.constant 0 : index
    %c0_530 = arith.constant 0 : index
    %749 = vector.load %arg4[%c14_528, %c0_529, %c0_530] : memref<16x1x10xf32, #tpu.memory_space<vmem>>, vector<1x1x10xf32>
    %750 = vector.shape_cast %749 : vector<1x1x10xf32> to vector<1x10xf32>
    %751 = vector.broadcast %745 : vector<32x1xf32> to vector<32x10xf32>
    %752 = vector.broadcast %750 : vector<1x10xf32> to vector<32x10xf32>
    %753 = arith.mulf %751, %752 : vector<32x10xf32>
    %754 = arith.addf %748, %753 : vector<32x10xf32>
    %c14_531 = arith.constant 14 : index
    %c0_532 = arith.constant 0 : index
    %c0_533 = arith.constant 0 : index
    %755 = vector.load %arg5[%c14_531, %c0_532, %c0_533] : memref<16x1x10xf32, #tpu.memory_space<vmem>>, vector<1x1x10xf32>
    %756 = vector.shape_cast %755 : vector<1x1x10xf32> to vector<1x10xf32>
    %757 = vector.broadcast %756 : vector<1x10xf32> to vector<32x10xf32>
    %758 = arith.addf %754, %757 : vector<32x10xf32>
    %cst_534 = arith.constant 0.000000e+00 : f32
    %759 = vector.broadcast %cst_534 : f32 to vector<32x10xf32>
    %760 = arith.maximumf %758, %759 : vector<32x10xf32>
    %c14_535 = arith.constant 14 : index
    %c0_536 = arith.constant 0 : index
    %c0_537 = arith.constant 0 : index
    %761 = vector.load %arg6[%c14_535, %c0_536, %c0_537] : memref<16x10x10xf32, #tpu.memory_space<vmem>>, vector<1x10x10xf32>
    %762 = vector.shape_cast %761 : vector<1x10x10xf32> to vector<10x10xf32>
    %cst_538 = arith.constant dense<0.000000e+00> : vector<32x10xf32>
    %763 = tpu.matmul %760, %762, %cst_538 {dimension_numbers = #tpu.dot_dimension_numbers<[1], [0], [0], [1], [0, 0, 1, 1], [], []>} : vector<32x10xf32>, vector<10x10xf32>, vector<32x10xf32> -> vector<32x10xf32>
    %c14_539 = arith.constant 14 : index
    %c0_540 = arith.constant 0 : index
    %c0_541 = arith.constant 0 : index
    %764 = vector.load %arg7[%c14_539, %c0_540, %c0_541] : memref<16x1x10xf32, #tpu.memory_space<vmem>>, vector<1x1x10xf32>
    %765 = vector.shape_cast %764 : vector<1x1x10xf32> to vector<1x10xf32>
    %766 = vector.broadcast %765 : vector<1x10xf32> to vector<32x10xf32>
    %767 = arith.addf %763, %766 : vector<32x10xf32>
    %cst_542 = arith.constant 0.000000e+00 : f32
    %768 = vector.broadcast %cst_542 : f32 to vector<32x10xf32>
    %769 = arith.maximumf %767, %768 : vector<32x10xf32>
    %c14_543 = arith.constant 14 : index
    %c0_544 = arith.constant 0 : index
    %c0_545 = arith.constant 0 : index
    %770 = vector.load %arg8[%c14_543, %c0_544, %c0_545] : memref<16x10x8xf32, #tpu.memory_space<vmem>>, vector<1x10x8xf32>
    %771 = vector.shape_cast %770 : vector<1x10x8xf32> to vector<10x8xf32>
    %cst_546 = arith.constant dense<0.000000e+00> : vector<32x8xf32>
    %772 = tpu.matmul %769, %771, %cst_546 {dimension_numbers = #tpu.dot_dimension_numbers<[1], [0], [0], [1], [0, 0, 1, 1], [], []>} : vector<32x10xf32>, vector<10x8xf32>, vector<32x8xf32> -> vector<32x8xf32>
    %c14_547 = arith.constant 14 : index
    %c0_548 = arith.constant 0 : index
    %c0_549 = arith.constant 0 : index
    %773 = vector.load %arg9[%c14_547, %c0_548, %c0_549] : memref<16x1x8xf32, #tpu.memory_space<vmem>>, vector<1x1x8xf32>
    %774 = vector.shape_cast %773 : vector<1x1x8xf32> to vector<1x8xf32>
    %775 = vector.broadcast %774 : vector<1x8xf32> to vector<32x8xf32>
    %776 = arith.addf %772, %775 : vector<32x8xf32>
    %cst_550 = arith.constant dense<0.000000e+00> : vector<8xf32>
    %777 = vector.multi_reduction <add>, %776, %cst_550 [0] : vector<32x8xf32> to vector<8xf32>
    %778 = vector.shape_cast %777 : vector<8xf32> to vector<1x8xf32>
    %cst_551 = arith.constant 3.200000e+01 : f32
    %779 = vector.broadcast %cst_551 : f32 to vector<1x8xf32>
    %780 = arith.divf %778, %779 : vector<1x8xf32>
    %781 = vector.broadcast %780 : vector<1x8xf32> to vector<32x8xf32>
    %782 = arith.subf %776, %781 : vector<32x8xf32>
    %783 = arith.mulf %782, %782 : vector<32x8xf32>
    %cst_552 = arith.constant dense<0.000000e+00> : vector<8xf32>
    %784 = vector.multi_reduction <add>, %783, %cst_552 [0] : vector<32x8xf32> to vector<8xf32>
    %785 = vector.shape_cast %784 : vector<8xf32> to vector<1x8xf32>
    %cst_553 = arith.constant 0.0322580636 : f32
    %786 = vector.broadcast %cst_553 : f32 to vector<1x8xf32>
    %787 = arith.mulf %785, %786 : vector<1x8xf32>
    %788 = math.sqrt %787 : vector<1x8xf32>
    %cst_554 = arith.constant 9.99999974E-6 : f32
    %789 = vector.broadcast %cst_554 : f32 to vector<1x8xf32>
    %790 = arith.addf %788, %789 : vector<1x8xf32>
    %791 = tpu.reciprocal %790 : vector<1x8xf32> -> vector<1x8xf32>
    %792 = vector.broadcast %791 : vector<1x8xf32> to vector<32x8xf32>
    %793 = arith.mulf %782, %792 : vector<32x8xf32>
    %c0_555 = arith.constant 0 : index
    %c112 = arith.constant 112 : index
    %794 = vector.load %arg10[%c0_555, %c112] : memref<32x128xf32, #tpu.memory_space<vmem>>, vector<32x8xf32>
    tpu.vector_store %arg10[%c0_555, %c112], %793 {strides = array<i32>} : memref<32x128xf32, #tpu.memory_space<vmem>>, vector<32x8xf32>,
    %c15 = arith.constant 15 : index
    %c0_556 = arith.constant 0 : index
    %c0_557 = arith.constant 0 : index
    %795 = vector.load %arg1[%c15, %c0_556, %c0_557] : memref<16x32x8xf32, #tpu.memory_space<vmem>>, vector<1x32x8xf32>
    %796 = vector.shape_cast %795 : vector<1x32x8xf32> to vector<32x8xf32>
    %c15_558 = arith.constant 15 : index
    %c0_559 = arith.constant 0 : index
    %c0_560 = arith.constant 0 : index
    %797 = vector.load %arg2[%c15_558, %c0_559, %c0_560] : memref<16x32x1xf32, #tpu.memory_space<vmem>>, vector<1x32x1xf32>
    %798 = vector.shape_cast %797 : vector<1x32x1xf32> to vector<32x1xf32>
    %c15_561 = arith.constant 15 : index
    %c0_562 = arith.constant 0 : index
    %c0_563 = arith.constant 0 : index
    %799 = vector.load %arg3[%c15_561, %c0_562, %c0_563] : memref<16x8x10xf32, #tpu.memory_space<vmem>>, vector<1x8x10xf32>
    %800 = vector.shape_cast %799 : vector<1x8x10xf32> to vector<8x10xf32>
    %cst_564 = arith.constant dense<0.000000e+00> : vector<32x10xf32>
    %801 = tpu.matmul %796, %800, %cst_564 {dimension_numbers = #tpu.dot_dimension_numbers<[1], [0], [0], [1], [0, 0, 1, 1], [], []>} : vector<32x8xf32>, vector<8x10xf32>, vector<32x10xf32> -> vector<32x10xf32>
    %c15_565 = arith.constant 15 : index
    %c0_566 = arith.constant 0 : index
    %c0_567 = arith.constant 0 : index
    %802 = vector.load %arg4[%c15_565, %c0_566, %c0_567] : memref<16x1x10xf32, #tpu.memory_space<vmem>>, vector<1x1x10xf32>
    %803 = vector.shape_cast %802 : vector<1x1x10xf32> to vector<1x10xf32>
    %804 = vector.broadcast %798 : vector<32x1xf32> to vector<32x10xf32>
    %805 = vector.broadcast %803 : vector<1x10xf32> to vector<32x10xf32>
    %806 = arith.mulf %804, %805 : vector<32x10xf32>
    %807 = arith.addf %801, %806 : vector<32x10xf32>
    %c15_568 = arith.constant 15 : index
    %c0_569 = arith.constant 0 : index
    %c0_570 = arith.constant 0 : index
    %808 = vector.load %arg5[%c15_568, %c0_569, %c0_570] : memref<16x1x10xf32, #tpu.memory_space<vmem>>, vector<1x1x10xf32>
    %809 = vector.shape_cast %808 : vector<1x1x10xf32> to vector<1x10xf32>
    %810 = vector.broadcast %809 : vector<1x10xf32> to vector<32x10xf32>
    %811 = arith.addf %807, %810 : vector<32x10xf32>
    %cst_571 = arith.constant 0.000000e+00 : f32
    %812 = vector.broadcast %cst_571 : f32 to vector<32x10xf32>
    %813 = arith.maximumf %811, %812 : vector<32x10xf32>
    %c15_572 = arith.constant 15 : index
    %c0_573 = arith.constant 0 : index
    %c0_574 = arith.constant 0 : index
    %814 = vector.load %arg6[%c15_572, %c0_573, %c0_574] : memref<16x10x10xf32, #tpu.memory_space<vmem>>, vector<1x10x10xf32>
    %815 = vector.shape_cast %814 : vector<1x10x10xf32> to vector<10x10xf32>
    %cst_575 = arith.constant dense<0.000000e+00> : vector<32x10xf32>
    %816 = tpu.matmul %813, %815, %cst_575 {dimension_numbers = #tpu.dot_dimension_numbers<[1], [0], [0], [1], [0, 0, 1, 1], [], []>} : vector<32x10xf32>, vector<10x10xf32>, vector<32x10xf32> -> vector<32x10xf32>
    %c15_576 = arith.constant 15 : index
    %c0_577 = arith.constant 0 : index
    %c0_578 = arith.constant 0 : index
    %817 = vector.load %arg7[%c15_576, %c0_577, %c0_578] : memref<16x1x10xf32, #tpu.memory_space<vmem>>, vector<1x1x10xf32>
    %818 = vector.shape_cast %817 : vector<1x1x10xf32> to vector<1x10xf32>
    %819 = vector.broadcast %818 : vector<1x10xf32> to vector<32x10xf32>
    %820 = arith.addf %816, %819 : vector<32x10xf32>
    %cst_579 = arith.constant 0.000000e+00 : f32
    %821 = vector.broadcast %cst_579 : f32 to vector<32x10xf32>
    %822 = arith.maximumf %820, %821 : vector<32x10xf32>
    %c15_580 = arith.constant 15 : index
    %c0_581 = arith.constant 0 : index
    %c0_582 = arith.constant 0 : index
    %823 = vector.load %arg8[%c15_580, %c0_581, %c0_582] : memref<16x10x8xf32, #tpu.memory_space<vmem>>, vector<1x10x8xf32>
    %824 = vector.shape_cast %823 : vector<1x10x8xf32> to vector<10x8xf32>
    %cst_583 = arith.constant dense<0.000000e+00> : vector<32x8xf32>
    %825 = tpu.matmul %822, %824, %cst_583 {dimension_numbers = #tpu.dot_dimension_numbers<[1], [0], [0], [1], [0, 0, 1, 1], [], []>} : vector<32x10xf32>, vector<10x8xf32>, vector<32x8xf32> -> vector<32x8xf32>
    %c15_584 = arith.constant 15 : index
    %c0_585 = arith.constant 0 : index
    %c0_586 = arith.constant 0 : index
    %826 = vector.load %arg9[%c15_584, %c0_585, %c0_586] : memref<16x1x8xf32, #tpu.memory_space<vmem>>, vector<1x1x8xf32>
    %827 = vector.shape_cast %826 : vector<1x1x8xf32> to vector<1x8xf32>
    %828 = vector.broadcast %827 : vector<1x8xf32> to vector<32x8xf32>
    %829 = arith.addf %825, %828 : vector<32x8xf32>
    %cst_587 = arith.constant dense<0.000000e+00> : vector<8xf32>
    %830 = vector.multi_reduction <add>, %829, %cst_587 [0] : vector<32x8xf32> to vector<8xf32>
    %831 = vector.shape_cast %830 : vector<8xf32> to vector<1x8xf32>
    %cst_588 = arith.constant 3.200000e+01 : f32
    %832 = vector.broadcast %cst_588 : f32 to vector<1x8xf32>
    %833 = arith.divf %831, %832 : vector<1x8xf32>
    %834 = vector.broadcast %833 : vector<1x8xf32> to vector<32x8xf32>
    %835 = arith.subf %829, %834 : vector<32x8xf32>
    %836 = arith.mulf %835, %835 : vector<32x8xf32>
    %cst_589 = arith.constant dense<0.000000e+00> : vector<8xf32>
    %837 = vector.multi_reduction <add>, %836, %cst_589 [0] : vector<32x8xf32> to vector<8xf32>
    %838 = vector.shape_cast %837 : vector<8xf32> to vector<1x8xf32>
    %cst_590 = arith.constant 0.0322580636 : f32
    %839 = vector.broadcast %cst_590 : f32 to vector<1x8xf32>
    %840 = arith.mulf %838, %839 : vector<1x8xf32>
    %841 = math.sqrt %840 : vector<1x8xf32>
    %cst_591 = arith.constant 9.99999974E-6 : f32
    %842 = vector.broadcast %cst_591 : f32 to vector<1x8xf32>
    %843 = arith.addf %841, %842 : vector<1x8xf32>
    %844 = tpu.reciprocal %843 : vector<1x8xf32> -> vector<1x8xf32>
    %845 = vector.broadcast %844 : vector<1x8xf32> to vector<32x8xf32>
    %846 = arith.mulf %835, %845 : vector<32x8xf32>
    %c0_592 = arith.constant 0 : index
    %c120 = arith.constant 120 : index
    %847 = vector.load %arg10[%c0_592, %c120] : memref<32x128xf32, #tpu.memory_space<vmem>>, vector<32x8xf32>
    tpu.vector_store %arg10[%c0_592, %c120], %846 {strides = array<i32>} : memref<32x128xf32, #tpu.memory_space<vmem>>, vector<32x8xf32>,
    return
  }
  func.func @transform_0(%arg0: i32) -> (i32, i32, i32) {
    %c0_i32 = arith.constant 0 : i32
    %c0_i32_0 = arith.constant 0 : i32
    %c0_i32_1 = arith.constant 0 : i32
    return %arg0, %c0_i32, %c0_i32_0 : i32, i32, i32
  }
  func.func @transform_1(%arg0: i32) -> (i32, i32, i32) {
    %c0_i32 = arith.constant 0 : i32
    %c0_i32_0 = arith.constant 0 : i32
    %c0_i32_1 = arith.constant 0 : i32
    return %arg0, %c0_i32, %c0_i32_0 : i32, i32, i32
  }
  func.func @transform_2(%arg0: i32) -> (i32, i32, i32) {
    %c0_i32 = arith.constant 0 : i32
    %c0_i32_0 = arith.constant 0 : i32
    %c0_i32_1 = arith.constant 0 : i32
    return %arg0, %c0_i32, %c0_i32_0 : i32, i32, i32
  }
  func.func @transform_3(%arg0: i32) -> (i32, i32, i32) {
    %c0_i32 = arith.constant 0 : i32
    %c0_i32_0 = arith.constant 0 : i32
    %c0_i32_1 = arith.constant 0 : i32
    return %arg0, %c0_i32, %c0_i32_0 : i32, i32, i32
  }
  func.func @transform_4(%arg0: i32) -> (i32, i32, i32) {
    %c0_i32 = arith.constant 0 : i32
    %c0_i32_0 = arith.constant 0 : i32
    %c0_i32_1 = arith.constant 0 : i32
    return %arg0, %c0_i32, %c0_i32_0 : i32, i32, i32
  }
  func.func @transform_5(%arg0: i32) -> (i32, i32, i32) {
    %c0_i32 = arith.constant 0 : i32
    %c0_i32_0 = arith.constant 0 : i32
    %c0_i32_1 = arith.constant 0 : i32
    return %arg0, %c0_i32, %c0_i32_0 : i32, i32, i32
  }
  func.func @transform_6(%arg0: i32) -> (i32, i32, i32) {
    %c0_i32 = arith.constant 0 : i32
    %c0_i32_0 = arith.constant 0 : i32
    %c0_i32_1 = arith.constant 0 : i32
    return %arg0, %c0_i32, %c0_i32_0 : i32, i32, i32
  }
  func.func @transform_7(%arg0: i32) -> (i32, i32, i32) {
    %c0_i32 = arith.constant 0 : i32
    %c0_i32_0 = arith.constant 0 : i32
    %c0_i32_1 = arith.constant 0 : i32
    return %arg0, %c0_i32, %c0_i32_0 : i32, i32, i32
  }
  func.func @transform_8(%arg0: i32) -> (i32, i32, i32) {
    %c0_i32 = arith.constant 0 : i32
    %c0_i32_0 = arith.constant 0 : i32
    %c0_i32_1 = arith.constant 0 : i32
    return %arg0, %c0_i32, %c0_i32_0 : i32, i32, i32
  }
  func.func @transform_9(%arg0: i32) -> (i32, i32) {
    %c0_i32 = arith.constant 0 : i32
    %c0_i32_0 = arith.constant 0 : i32
    return %c0_i32, %arg0 : i32, i32
  }
}

</mosaic_0001>

<bundles_post_ra>
// kernel: tpu_custom_call.1
= control target key start
LH: loop header
LB: loop body
LE: loop exit
PB: predicated region body
PF: predicated region fallthrough
CT: control target
= control target key end

     0   :  { %14 = vsyncpa [#allocation3], 0  ;;  %s10616_s0 = inlined_call_operand.vmem [shape: f32[64,32,8], index: 0, kind: input, shape index: {}]   ;;  %s10617_s1 = inlined_call_operand.vmem [shape: f32[64,32,1], index: 1, kind: input, shape index: {}]   ;;  %s10618_s2 = inlined_call_operand.vmem [shape: f32[64,8,10], index: 2, kind: input, shape index: {}]   ;;  %s10619_s3 = inlined_call_operand.vmem [shape: f32[64,1,10], index: 3, kind: input, shape index: {}]   ;;  %s10620_s4 = inlined_call_operand.vmem [shape: f32[64,1,10], index: 4, kind: input, shape index: {}]   ;;  %s10621_s5 = inlined_call_operand.vmem [shape: f32[64,10,10], index: 5, kind: input, shape index: {}]   ;;  %s10622_s6 = inlined_call_operand.vmem [shape: f32[64,1,10], index: 6, kind: input, shape index: {}]   ;;  %s10623_s7 = inlined_call_operand.vmem [shape: f32[64,10,8], index: 7, kind: input, shape index: {}]   ;;  %s10624_s8 = inlined_call_operand.vmem [shape: f32[64,1,8], index: 8, kind: input, shape index: {}]   ;;  %s10625_s9 = inlined_call_operand.hbm [shape: f32[32,512], index: 9, kind: output, shape index: {}]  }
   0x1   :  { %16 = vsyncpa [#allocation3 + $0x1], 0  ;;  %s9442_s30 = smov 0   ;;  %s9444_s10 = smov 0  }
   0x2   :  { %s9446_s11 = smov 0   ;;  %s9448_s12 = smov 0  }
   0x3 LB: > { %s9463_s13 = sadd.s32 4294967295, %s9371_s12   ;;  %s7894_s14 = sadd.s32 4294967294, %s9371_s12   ;;  %s9371_s12 = sphi %s9448_s12, %s10649_s12   ;;  %s9367_s11 = sphi %s9446_s11, %s10648_s11   ;;  %s9363_s10 = sphi %s9444_s10, %s10647_s10   ;;  %s9359_s30 = sphi %s9442_s30, %s10646_s30  }
   0x4   : > { %s9467_s15 = sadd.s32 1, %s9371_s12   ;;  %s263_s16 = sadd.s32 1, %s9367_s11 }
   0x5   : > { %s260_s17 = ssub.s32 %s9371_s12, %s9467_s15  ;;  %p273_p0 = scmp.ne.s32.totalorder %s9367_s11, %s9363_s10 }
   0x6   : > { %p261_p1 = scmp.eq.s32.totalorder %s260_s17, 0  ;;  %p274_p2 = scmp.eq.s32.totalorder %s9463_s13, 3 }
   0x7   : > { %p279_p3 = scmp.ne.s32.totalorder %s9363_s10, %s9359_s30  ;;  %p280_p4 = scmp.eq.s32.totalorder %s7894_s14, 3 }
   0x8   : > { %s9478_s18 = scalar_select %p261_p1, %s9367_s11, %s263_s16  }
   0x9   : > { %p9480_p5 = por %p274_p2, %p273_p0  ;;  %p9484_p6 = por %p280_p4, %p279_p3 }
   0xa   : > { %p7897_p7 = scmp.ge.s32.totalorder %s9371_s12, 1  ;;  %p379_p8 = scmp.lt.s32.totalorder %s9371_s12, 5 }
   0xc   : > { %p380_p9 = pnand %p7897_p7, %p379_p8 }
   0xe   : > { %383 = sbr.rel (%p380_p9) target bundleno = 3996 (0xf9c), region = 56 }
  0x13   : > { %s7899_s21 = sshll.u32 %s9463_s13, 4  ;;  %v9373_v0 = vmov 0   ;;  %vm549_vm0 = vcmask 64512   ;;  %vm684_vm1 = vcmask 1041408   ;;  %vm671_vm2 = vcmask 80896   ;;  %s9374_s27 = smov 8  }
  0x14   : > { %9246 = vset.pattern.permute.xlu1 %v9373_v0  ;;  %9245 = vset.pattern.permute.xlu0 %v9373_v0  ;;  %p456_p10 = scmp.lt.s32.totalorder %s7899_s21, 63  ;;  %vm1388_vm7 = vcmask 130112   ;;  %vm1841_vm10 = vcmask 195712   ;;  %vm2294_vm13 = vcmask 261312  }
  0x16   : > { %s10651_s21 = smov (!%p456_p10, %s7899_s21), 63 }
  0x17   : > { %s8464_s22 = sshll.u32 %s10651_s21, 5  ;;  %s7906_s23 = sshll.u32 %s10651_s21, 3 }
  0x18   : > { %s9498_s26 = scalar_lea.vmem %s10616_s0, %s8464_s22  ;;  %s9503_s29 = scalar_lea.vmem %s10617_s1, %s8464_s22 }
  0x19   : > { %s9508_s17 = scalar_lea.vmem %s10618_s2, %s7906_s23  ;;  %v515_v1 = vld [vmem:[%s9503_s29 + $0x10] sm:$0xff]  ;;  %v513_v2 = vld [vmem:[%s9503_s29] sm:$0xff]  ;;  %v510_v5 = vld [vmem:[%s9498_s26 + $0x8] sm:$0xff]  ;;  %s8466_s22 = sshll.u32 %s10651_s21, 4 }
  0x1a   : > { %v509_v3 = vld [vmem:[%s9498_s26] sm:$0xff]  ;;  %531 = vperm.xlu1 %9246, %v515_v1   ;;  %521 = vperm.xlu0 %9245, %v513_v2   ;;  %v516_v6 = vld [vmem:[%s9503_s29 + $0x18] sm:$0xff]  ;;  %v514_v7 = vld [vmem:[%s9503_s29 + $0x8] sm:$0xff]  ;;  %s9561_s25 = scalar_lea.vmem %s10621_s5, %s8466_s22  ;;  %s9603_s14 = scalar_lea.vmem %s10619_s3, %s10651_s21 }
  0x1b   : > { %v517_v4 = vld [vmem:[%s9508_s17] sm:$0xff]  ;;  %8742 = vmatprep.mubr.msk.f32.mxu0 %vm549_vm0, %v509_v3  ;;  %v511_v8 = vld [vmem:[%s9498_s26 + $0x10] sm:$0xff]  ;;  %v512_v9 = vld [vmem:[%s9498_s26 + $0x18] sm:$0xff]  ;;  %s9610_s24 = scalar_lea.vmem %s10620_s4, %s10651_s21  ;;  %s9631_s28 = scalar_lea.vmem %s10623_s7, %s8466_s22 }
  0x1c   : > { %8740 = vmatprep.subr.mxu0 %v517_v4  ;;  %v7940_v10 = vld [vmem:[%s9503_s29 + $0x28] sm:$0xff]  ;;  %v7939_v11 = vld [vmem:[%s9503_s29 + $0x20] sm:$0xff]  ;;  %v7942_v12 = vld [vmem:[%s9503_s29 + $0x38] sm:$0xff]  ;;  %s9677_s16 = scalar_lea.vmem %s10624_s8, %s10651_s21 }
  0x1d   : > { %8741 = vmatpush3.msra.mxu0 %v517_v4  ;;  %v7941_v13 = vld [vmem:[%s9503_s29 + $0x30] sm:$0xff]  ;;  %v7975_v14 = vld [vmem:[%s9503_s29 + $0x48] sm:$0xff]  ;;  %v7974_v15 = vld [vmem:[%s9503_s29 + $0x40] sm:$0xff] }
  0x1e   : > { %8743 = vmatmul.mubr.msk.f32.vlgmr.msra.gmra.mxu0 %vm549_vm0, %v510_v5  ;;  %536 = vperm.xlu1 %9246, %v516_v6   ;;  %v7977_v16 = vld [vmem:[%s9503_s29 + $0x58] sm:$0xff]  ;;  %v7976_v17 = vld [vmem:[%s9503_s29 + $0x50] sm:$0xff]  ;;  %v8010_v18 = vld [vmem:[%s9503_s29 + $0x68] sm:$0xff] }
  0x1f   : > { %526 = vperm.xlu0 %9245, %v514_v7   ;;  %8745 = vmatprep.mubr.msk.f32.mxu0 %vm549_vm0, %v511_v8  ;;  %v8009_v19 = vld [vmem:[%s9503_s29 + $0x60] sm:$0xff]  ;;  %v8012_v20 = vld [vmem:[%s9503_s29 + $0x78] sm:$0xff]  ;;  %v8011_v21 = vld [vmem:[%s9503_s29 + $0x70] sm:$0xff] }
  0x20   : > { %v8045_v22 = vld [vmem:[%s9503_s29 + $0x88] sm:$0xff]  ;;  %v8044_v23 = vld [vmem:[%s9503_s29 + $0x80] sm:$0xff]  ;;  %v8047_v24 = vld [vmem:[%s9503_s29 + $0x98] sm:$0xff] }
  0x21   : > { %v8046_v25 = vld [vmem:[%s9503_s29 + $0x90] sm:$0xff]  ;;  %v8080_v26 = vld [vmem:[%s9503_s29 + $0xa8] sm:$0xff]  ;;  %v8079_v27 = vld [vmem:[%s9503_s29 + $0xa0] sm:$0xff] }
  0x22   : > { %8746 = vmatmul.mubr.msk.f32.gmra.mxu0 %vm549_vm0, %v512_v9  ;;  %961 = vperm.xlu1 %9246, %v7940_v10   ;;  %v8082_v28 = vld [vmem:[%s9503_s29 + $0xb8] sm:$0xff]  ;;  %v8081_v29 = vld [vmem:[%s9503_s29 + $0xb0] sm:$0xff]  ;;  %v8115_v30 = vld [vmem:[%s9503_s29 + $0xc8] sm:$0xff] }
  0x23   : > { %956 = vperm.xlu0 %9245, %v7939_v11   ;;  %v8114_v31 = vld [vmem:[%s9503_s29 + $0xc0] sm:$0xff]  ;;  %v8117_v32 = vld [vmem:[%s9503_s29 + $0xd8] sm:$0xff]  ;;  %v8116_v33 = vld [vmem:[%s9503_s29 + $0xd0] sm:$0xff] }
  0x24   : > { %v8150_v34 = vld [vmem:[%s9503_s29 + $0xe8] sm:$0xff]  ;;  %v8149_v35 = vld [vmem:[%s9503_s29 + $0xe0] sm:$0xff]  ;;  %v8152_v36 = vld [vmem:[%s9503_s29 + $0xf8] sm:$0xff] }
  0x25   : > { %v8151_v37 = vld [vmem:[%s9503_s29 + $0xf0] sm:$0xff]  ;;  %v8185_v38 = vld [vmem:[%s9503_s29 + $0x108] sm:$0xff]  ;;  %v8184_v39 = vld [vmem:[%s9503_s29 + $0x100] sm:$0xff] }
  0x26   : > { %971 = vperm.xlu1 %9246, %v7942_v12   ;;  %v8187_v40 = vld [vmem:[%s9503_s29 + $0x118] sm:$0xff]  ;;  %v8186_v41 = vld [vmem:[%s9503_s29 + $0x110] sm:$0xff]  ;;  %v8220_v42 = vld [vmem:[%s9503_s29 + $0x128] sm:$0xff] }
  0x27   : > { %966 = vperm.xlu0 %9245, %v7941_v13   ;;  %v8219_v43 = vld [vmem:[%s9503_s29 + $0x120] sm:$0xff]  ;;  %v663_v44 = vld [vmem:[%s9561_s25 + $0x8] sm:$0x3]  ;;  %v8222_v45 = vld [vmem:[%s9503_s29 + $0x138] sm:$0xff] }
  0x28   : > { %v8221_v46 = vld [vmem:[%s9503_s29 + $0x130] sm:$0xff]  ;;  %8748 = vmatprep.subr.msk.mxu1 %vm684_vm1, %v663_v44  ;;  %v662_v47 = vld [vmem:[%s9561_s25] sm:$0xff]  ;;  %v8255_v48 = vld [vmem:[%s9503_s29 + $0x148] sm:$0xff] }
  0x29   : > { %8749 = vmatpush3.msk.msra.mxu1 %vm684_vm1, %v663_v44  ;;  %v8254_v49 = vld [vmem:[%s9503_s29 + $0x140] sm:$0xff]  ;;  %v9574_v50 = vld [vmem:[%s9508_s17 + $0x8] sm:$0xff]  ;;  %v8257_v51 = vld [vmem:[%s9503_s29 + $0x158] sm:$0xff] }
  0x2a   : > { %1414 = vperm.xlu1 %9246, %v7975_v14   ;;  %8750 = vmatprep.subr.mxu1 %v662_v47  ;;  %v8256_v52 = vld [vmem:[%s9503_s29 + $0x150] sm:$0xff]  ;;  %v8290_v53 = vld [vmem:[%s9503_s29 + $0x168] sm:$0xff]  ;;  %v8289_v54 = vld [vmem:[%s9503_s29 + $0x160] sm:$0xff] }
  0x2b   : > { %1409 = vperm.xlu0 %9245, %v7974_v15   ;;  %8751 = vmatpush3.msra.mxu1 %v662_v47  ;;  %v8292_v55 = vld [vmem:[%s9503_s29 + $0x178] sm:$0xff]  ;;  %v8291_v56 = vld [vmem:[%s9503_s29 + $0x170] sm:$0xff]  ;;  %v8325_v57 = vld [vmem:[%s9503_s29 + $0x188] sm:$0xff] }
  0x2c   : > { %8768 = vmatprep.subr.mxu1 %v9574_v50  ;;  %v8324_v58 = vld [vmem:[%s9503_s29 + $0x180] sm:$0xff]  ;;  %v8327_v59 = vld [vmem:[%s9503_s29 + $0x198] sm:$0xff]  ;;  %v8326_v60 = vld [vmem:[%s9503_s29 + $0x190] sm:$0xff] }
  0x2d   : > { %v8360_v61 = vld [vmem:[%s9503_s29 + $0x1a8] sm:$0xff]  ;;  %v8359_v62 = vld [vmem:[%s9503_s29 + $0x1a0] sm:$0xff]  ;;  %v8362_v63 = vld [vmem:[%s9503_s29 + $0x1b8] sm:$0xff] }
  0x2e   : > { %1424 = vperm.xlu1 %9246, %v7977_v16   ;;  %v8361_v0 = vld [vmem:[%s9503_s29 + $0x1b0] sm:$0xff]  ;;  %v8395_v1 = vld [vmem:[%s9503_s29 + $0x1c8] sm:$0xff]  ;;  %v8394_v2 = vld [vmem:[%s9503_s29 + $0x1c0] sm:$0xff] }
  0x2f   : > { %1419 = vperm.xlu0 %9245, %v7976_v17   ;;  %v8397_v3 = vld [vmem:[%s9503_s29 + $0x1d8] sm:$0xff]  ;;  %v8396_v4 = vld [vmem:[%s9503_s29 + $0x1d0] sm:$0xff]  ;;  %v8430_v5 = vld [vmem:[%s9503_s29 + $0x1e8] sm:$0xff] }
  0x30   : > { %v8429_v6 = vld [vmem:[%s9503_s29 + $0x1e0] sm:$0xff]  ;;  %v8432_v7 = vld [vmem:[%s9503_s29 + $0x1f8] sm:$0xff]  ;;  %v8431_v8 = vld [vmem:[%s9503_s29 + $0x1f0] sm:$0xff]  ;;  %s9643_s29 = scalar_lea.vmem %s10622_s6, %s10651_s21  ;;  %s452_s21 = sand.u32 1, %s9363_s10  }
  0x31   : > { %v7917_v10 = vld [vmem:[%s9603_s14] ss:$0 sm:$0xff]  ;;  %s7898_s23 = sshll.u32 %s452_s21, 5 }
  0x32   : > { %1867 = vperm.xlu1 %9246, %v8010_v18   ;;  %s9729_s22 = scalar_lea.vmem [#allocation2], %s7898_s23  ;;  %s9375_s23 = smov 16  }
  0x33   : > { %1862 = vperm.xlu0 %9245, %v8009_v19   ;;  %v7922_v19 = vld [vmem:[%s9610_s24] ss:$0 sm:$0xff] }
  0x36   : > { %1877 = vperm.xlu1 %9246, %v8012_v20  }
  0x37   : > { %1872 = vperm.xlu0 %9245, %v8011_v21  }
  0x3a   : > { %2320 = vperm.xlu1 %9246, %v8045_v22  }
  0x3b   : > { %2315 = vperm.xlu0 %9245, %v8044_v23  }
  0x3e   : > { %2330 = vperm.xlu1 %9246, %v8047_v24  }
  0x3f   : > { %2325 = vperm.xlu0 %9245, %v8046_v25  }
  0x42   : > { %2773 = vperm.xlu1 %9246, %v8080_v26  }
  0x43   : > { %2768 = vperm.xlu0 %9245, %v8079_v27  }
  0x46   : > { %2783 = vperm.xlu1 %9246, %v8082_v28  }
  0x47   : > { %2778 = vperm.xlu0 %9245, %v8081_v29  }
  0x4a   : > { %3226 = vperm.xlu1 %9246, %v8115_v30  }
  0x4b   : > { %3221 = vperm.xlu0 %9245, %v8114_v31  }
  0x4e   : > { %3236 = vperm.xlu1 %9246, %v8117_v32  }
  0x4f   : > { %3231 = vperm.xlu0 %9245, %v8116_v33  }
  0x52   : > { %3679 = vperm.xlu1 %9246, %v8150_v34  }
  0x53   : > { %3674 = vperm.xlu0 %9245, %v8149_v35   ;;  %v7935_v35 = vld [vmem:[%s9498_s26 + $0x20] sm:$0xff] }
  0x56   : > { %3689 = vperm.xlu1 %9246, %v8152_v36   ;;  %v7936_v36 = vld [vmem:[%s9498_s26 + $0x28] sm:$0xff] }
  0x57   : > { %3684 = vperm.xlu0 %9245, %v8151_v37   ;;  %v7937_v37 = vld [vmem:[%s9498_s26 + $0x30] sm:$0xff] }
  0x5a   : > { %4132 = vperm.xlu1 %9246, %v8185_v38   ;;  %v7938_v38 = vld [vmem:[%s9498_s26 + $0x38] sm:$0xff] }
  0x5b   : > { %4127 = vperm.xlu0 %9245, %v8184_v39   ;;  %v778_v39 = vld [vmem:[%s9631_s28 + $0x8] sm:$0x3] }
  0x5c   : > { %8758 = vmatprep.subr.msk.mxu0 %vm684_vm1, %v778_v39 }
  0x5d   : > { %8759 = vmatpush3.msk.msra.mxu0 %vm684_vm1, %v778_v39  ;;  %v7955_v39 = vld [vmem:[%s9643_s29 + $0x1] ss:$0 sm:$0xff] }
  0x5e   : > { %4142 = vperm.xlu1 %9246, %v8187_v40   ;;  %v777_v40 = vld [vmem:[%s9631_s28] sm:$0xff] }
  0x5f   : > { %4137 = vperm.xlu0 %9245, %v8186_v41   ;;  %8760 = vmatprep.subr.mxu0 %v777_v40  ;;  %v7953_v41 = vld [vmem:[%s9561_s25 + $0x18] sm:$0x3] }
  0x60   : > { %8761 = vmatpush3.msra.mxu0 %v777_v40 }
  0x61   : > { %8776 = vmatprep.subr.msk.mxu0 %vm684_vm1, %v7953_v41 }
  0x62   : > { %4585 = vperm.xlu1 %9246, %v8220_v42   ;;  %v7923_v42 = vld [vmem:[%s9643_s29] ss:$0 sm:$0xff] }
  0x63   : > { %4580 = vperm.xlu0 %9245, %v8219_v43  }
  0x66   : > { %4595 = vperm.xlu1 %9246, %v8222_v45  }
  0x67   : > { %4590 = vperm.xlu0 %9245, %v8221_v46  }
  0x6a   : > { %5038 = vperm.xlu1 %9246, %v8255_v48  }
  0x6b   : > { %5033 = vperm.xlu0 %9245, %v8254_v49  }
  0x6e   : > { %5048 = vperm.xlu1 %9246, %v8257_v51  }
  0x6f   : > { %5043 = vperm.xlu0 %9245, %v8256_v52  }
  0x72   : > { %5491 = vperm.xlu1 %9246, %v8290_v53  }
  0x73   : > { %5486 = vperm.xlu0 %9245, %v8289_v54  }
  0x76   : > { %5501 = vperm.xlu1 %9246, %v8292_v55  }
  0x77   : > { %5496 = vperm.xlu0 %9245, %v8291_v56  }
  0x7a   : > { %5944 = vperm.xlu1 %9246, %v8325_v57   ;;  %v7952_v57 = vld [vmem:[%s9561_s25 + $0x10] sm:$0xff] }
  0x7b   : > { %5939 = vperm.xlu0 %9245, %v8324_v58  }
  0x7e   : > { %5954 = vperm.xlu1 %9246, %v8327_v59  }
  0x7f   : > { %5949 = vperm.xlu0 %9245, %v8326_v60  }
  0x82   : > { %6397 = vperm.xlu1 %9246, %v8360_v61  }
  0x83   : > { %6392 = vperm.xlu0 %9245, %v8359_v62   ;;  %v7951_v62 = vld [vmem:[%s9610_s24 + $0x1] ss:$0 sm:$0xff] }
  0x86   : > { %6407 = vperm.xlu1 %9246, %v8362_v63   ;;  %v7978_v63 = vld [vmem:[%s9508_s17 + $0x10] sm:$0xff] }
  0x87   : > { %6402 = vperm.xlu0 %9245, %v8361_v0  }
  0x8a   : > { %6850 = vperm.xlu1 %9246, %v8395_v1  }
  0x8b   : > { %6845 = vperm.xlu0 %9245, %v8394_v2  }
  0x8e   : > { %6860 = vperm.xlu1 %9246, %v8397_v3  }
  0x8f   : > { %6855 = vperm.xlu0 %9245, %v8396_v4  }
  0x92   : > { %7303 = vperm.xlu1 %9246, %v8430_v5  }
  0x93   : > { %7298 = vperm.xlu0 %9245, %v8429_v6  }
  0x95   : > { %v522_v9 = vpop.permute.xlu0 %521  ;;  %v532_v11 = vpop.permute.xlu1 %531 }
  0x96   : > { %7313 = vperm.xlu1 %9246, %v8432_v7   ;;  %v545_v16 = vmul.f32 %v7917_v10, %v522_v9  ;;  %v547_v24 = vmul.f32 %v7917_v10, %v532_v11 }
  0x97   : > { %7308 = vperm.xlu0 %9245, %v8431_v8  }
  0x99   : > { %v537_v14 = vpop.permute.xlu1 %536 }
  0x9a   : > { %v527_v12 = vpop.permute.xlu0 %526  ;;  %v548_v17 = vmul.f32 %v7917_v10, %v537_v14 }
  0x9b   : > { %v546_v13 = vmul.f32 %v7917_v10, %v527_v12 }
  0x9d   : > { %v962_v47 = vpop.permute.xlu1 %961 }
  0x9e   : > { %v957_v51 = vpop.permute.xlu0 %956 }
  0xa1   : > { %v972_v0 = vpop.permute.xlu1 %971 }
  0xa2   : > { %v967_v5 = vpop.permute.xlu0 %966 }
  0xde   : > { %v8744_v15 = vpop.f32.mrf.mxu0 }
  0xdf   : > { %v634_v18 = vadd.f32 %v8744_v15, %v546_v13 }
  0xe0   : > { %v628_v20 = vpop.f32.mrf.mxu0 }
  0xe1   : > { %v629_v21 = vadd.f32 %v628_v20, %v545_v16  ;;  %v655_v22 = vadd.f32 %v7922_v19, %v634_v18  ;;  %v7971_v20 = vld [vmem:[%s9498_s26 + $0x48] sm:$0xff] }
  0xe2   : > { %v8747_v23 = vpop.f32.mrf.mxu0 }
  0xe3   : > { %v644_v25 = vadd.f32 %v8747_v23, %v548_v17  ;;  %v654_v26 = vadd.f32 %v7922_v19, %v629_v21  ;;  %v659_v30 = vmax.f32 %v655_v22, 0.0  ;;  %v7972_v21 = vld [vmem:[%s9498_s26 + $0x50] sm:$0xff]  ;;  %v7973_v22 = vld [vmem:[%s9498_s26 + $0x58] sm:$0xff] }
  0xe4   : > { %v638_v27 = vpop.f32.mrf.mxu0  ;;  %v7962_v23 = vld [vmem:[%s9631_s28 + $0x18] sm:$0x3] }
  0xe5   : > { %v639_v28 = vadd.f32 %v638_v27, %v547_v24  ;;  %v658_v29 = vmax.f32 %v654_v26, 0.0  ;;  %v657_v31 = vadd.f32 %v7922_v19, %v644_v25  ;;  %v7961_v24 = vld [vmem:[%s9631_s28 + $0x10] sm:$0xff]  ;;  %v7988_v25 = vld [vmem:[%s9561_s25 + $0x28] sm:$0x3]  ;;  %v7929_v27 = vld [vmem:[%s9677_s16] ss:$0 sm:$0xff] }
  0xe7   : > { %v656_v32 = vadd.f32 %v7922_v19, %v639_v28  ;;  %8752 = vmatprep.mubr.msk.f32.mxu1 %vm671_vm2, %v658_v29  ;;  %v661_v34 = vmax.f32 %v657_v31, 0.0  ;;  %v7970_v19 = vld [vmem:[%s9498_s26 + $0x40] sm:$0xff] }
  0xe8   : > { %8753 = vmatmul.mubr.msk.f32.vlgmr.msra.gmra.mxu1 %vm671_vm2, %v659_v30 }
  0xe9   : > { %v660_v33 = vmax.f32 %v656_v32, 0.0  ;;  %8769 = vmatpush3.msra.mxu1 %v9574_v50  ;;  %v7945_v50 = vld [vmem:[%s9603_s14 + $0x1] ss:$0 sm:$0xff] }
  0xea   : > { %v981_v55 = vmul.f32 %v7945_v50, %v962_v47  ;;  %v980_v59 = vmul.f32 %v7945_v50, %v957_v51  ;;  %v983_v3 = vmul.f32 %v7945_v50, %v972_v0  ;;  %v982_v8 = vmul.f32 %v7945_v50, %v967_v5  ;;  %8786 = vmatprep.subr.msk.mxu1 %vm684_vm1, %v7962_v23  ;;  %v1415_v47 = vpop.permute.xlu1 %1414  ;;  %v7980_v51 = vld [vmem:[%s9603_s14 + $0x2] ss:$0 sm:$0xff] }
  0xeb   : > { %8755 = vmatprep.mubr.msk.f32.mxu1 %vm671_vm2, %v660_v33 }
  0xec   : > { %8756 = vmatmul.mubr.msk.f32.gmra.mxu1 %vm671_vm2, %v661_v34 }
  0xed   : > { %8770 = vmatprep.mubr.msk.f32.mxu1 %vm549_vm0, %v7935_v35 }
  0xf0   : > { %8771 = vmatmul.mubr.msk.f32.vlgmr.msra.gmra.mxu1 %vm549_vm0, %v7936_v36 }
  0xf1   : > { %8773 = vmatprep.mubr.msk.f32.mxu1 %vm549_vm0, %v7937_v37  ;;  %8787 = vmatpush3.msk.msra.mxu1 %vm684_vm1, %v7962_v23 }
  0xf2   : > { %8788 = vmatprep.subr.mxu1 %v7961_v24 }
  0xf3   : > { %8789 = vmatpush3.msra.mxu1 %v7961_v24 }
  0xf4   : > { %8774 = vmatmul.mubr.msk.f32.gmra.mxu1 %vm549_vm0, %v7938_v38  ;;  %8804 = vmatprep.subr.msk.mxu1 %vm684_vm1, %v7988_v25 }
 0x1a8   : > { %v8754_v43 = vpop.f32.mrf.mxu1 }
 0x1a9   : > { %v760_v44 = vadd.f32 %v8754_v43, %v7923_v42 }
 0x1aa   : > { %v754_v45 = vpop.f32.mrf.mxu1 }
 0x1ab   : > { %v755_v46 = vadd.f32 %v7923_v42, %v754_v45  ;;  %v774_v52 = vmax.f32 %v760_v44, 0.0 }
 0x1ac   : > { %v8757_v48 = vpop.f32.mrf.mxu1 }
 0x1ad   : > { %v773_v49 = vmax.f32 %v755_v46, 0.0  ;;  %v770_v53 = vadd.f32 %v8757_v48, %v7923_v42 }
 0x1ae   : > { %v764_v54 = vpop.f32.mrf.mxu1 }
 0x1af   : > { %v765_v56 = vadd.f32 %v7923_v42, %v764_v54  ;;  %8762 = vmatprep.mubr.msk.f32.mxu0 %vm671_vm2, %v773_v49  ;;  %v776_v1 = vmax.f32 %v770_v53, 0.0 }
 0x1b0   : > { %8763 = vmatmul.mubr.msk.f32.vlgmr.msra.gmra.mxu0 %vm671_vm2, %v774_v52  ;;  %v8772_v58 = vpop.f32.mrf.mxu1  ;;  %v1410_v52 = vpop.permute.xlu0 %1409 }
 0x1b1   : > { %v775_v60 = vmax.f32 %v765_v56, 0.0  ;;  %v1068_v61 = vadd.f32 %v8772_v58, %v981_v55  ;;  %8777 = vmatpush3.msk.msra.mxu0 %vm684_vm1, %v7953_v41 }
 0x1b2   : > { %v1062_v2 = vpop.f32.mrf.mxu1  ;;  %8778 = vmatprep.subr.mxu0 %v7952_v57 }
 0x1b3   : > { %v1063_v4 = vadd.f32 %v1062_v2, %v980_v59  ;;  %8765 = vmatprep.mubr.msk.f32.mxu0 %vm671_vm2, %v775_v60  ;;  %8779 = vmatpush3.msra.mxu0 %v7952_v57  ;;  %v1090_v6 = vadd.f32 %v7951_v62, %v1068_v61  ;;  %v1434_v57 = vmul.f32 %v7980_v51, %v1415_v47  ;;  %v7987_v59 = vld [vmem:[%s9561_s25 + $0x20] sm:$0xff]  ;;  %v8013_v2 = vld [vmem:[%s9508_s17 + $0x18] sm:$0xff] }
 0x1b4   : > { %8766 = vmatmul.mubr.msk.f32.gmra.mxu0 %vm671_vm2, %v776_v1  ;;  %v8775_v7 = vpop.f32.mrf.mxu1  ;;  %8796 = vmatprep.subr.mxu0 %v7978_v63  ;;  %v7986_v1 = vld [vmem:[%s9610_s24 + $0x2] ss:$0 sm:$0xff] }
 0x1b5   : > { %v1089_v9 = vadd.f32 %v7951_v62, %v1063_v4  ;;  %v1078_v10 = vadd.f32 %v8775_v7, %v983_v3  ;;  %v1094_v14 = vmax.f32 %v1090_v6, 0.0  ;;  %v1425_v3 = vpop.permute.xlu1 %1424 }
 0x1b6   : > { %v1072_v11 = vpop.f32.mrf.mxu1  ;;  %v1436_v7 = vmul.f32 %v7980_v51, %v1425_v3  ;;  %v7964_v3 = vld [vmem:[%s9677_s16 + $0x1] ss:$0 sm:$0xff] }
 0x1b7   : > { %v1093_v12 = vmax.f32 %v1089_v9, 0.0  ;;  %v1073_v13 = vadd.f32 %v1072_v11, %v982_v8  ;;  %v1092_v15 = vadd.f32 %v7951_v62, %v1078_v10  ;;  %v1420_v9 = vpop.permute.xlu0 %1419 }
 0x1b9   : > { %v1091_v16 = vadd.f32 %v7951_v62, %v1073_v13  ;;  %8780 = vmatprep.mubr.msk.f32.mxu0 %vm671_vm2, %v1093_v12  ;;  %v1096_v18 = vmax.f32 %v1092_v15, 0.0  ;;  %v1433_v62 = vmul.f32 %v7980_v51, %v1410_v52  ;;  %v1435_v13 = vmul.f32 %v7980_v51, %v1420_v9 }
 0x1ba   : > { %8781 = vmatmul.mubr.msk.f32.vlgmr.msra.gmra.mxu0 %vm671_vm2, %v1094_v14 }
 0x1bb   : > { %v1095_v17 = vmax.f32 %v1091_v16, 0.0  ;;  %8797 = vmatpush3.msra.mxu0 %v7978_v63 }
 0x1bd   : > { %8783 = vmatprep.mubr.msk.f32.mxu0 %vm671_vm2, %v1095_v17 }
 0x1be   : > { %8784 = vmatmul.mubr.msk.f32.gmra.mxu0 %vm671_vm2, %v1096_v18 }
 0x1bf   : > { %8798 = vmatprep.mubr.msk.f32.mxu0 %vm549_vm0, %v7970_v19 }
 0x1c2   : > { %8799 = vmatmul.mubr.msk.f32.vlgmr.msra.gmra.mxu0 %vm549_vm0, %v7971_v20 }
 0x1c3   : > { %8801 = vmatprep.mubr.msk.f32.mxu0 %vm549_vm0, %v7972_v21 }
 0x1c6   : > { %8802 = vmatmul.mubr.msk.f32.gmra.mxu0 %vm549_vm0, %v7973_v22 }
 0x270   : > { %v8764_v26 = vpop.f32.mrf.mxu0 }
 0x271   : > { %v9680_v29 = vadd.f32 %v8764_v26, %v7929_v27 }
 0x272   : > { %v867_v28 = vpop.f32.mrf.mxu0 }
 0x273   : > { %v9682_v30 = vadd.f32 %v7929_v27, %v867_v28  ;;  %v887_v34 = vsel %vm549_vm0, %v9680_v29, 0.0 }
 0x274   : > { %v8767_v31 = vpop.f32.mrf.mxu0 }
 0x275   : > { %v886_v32 = vsel %vm549_vm0, %v9682_v30, 0.0  ;;  %v9688_v35 = vadd.f32 %v8767_v31, %v7929_v27 }
 0x276   : > { %v877_v33 = vpop.f32.mrf.mxu0  ;;  %v888_v37 = vadd.f32 %v887_v34, %v886_v32 }
 0x277   : > { %v9690_v36 = vadd.f32 %v7929_v27, %v877_v33  ;;  %v891_v42 = vsel %vm549_vm0, %v9688_v35, 0.0 }
 0x279   : > { %v889_v38 = vsel %vm549_vm0, %v9690_v36, 0.0 }
 0x27a   : > { %v890_v40 = vadd.f32 %v889_v38, %v888_v37  ;;  %v8782_v41 = vpop.f32.mrf.mxu0  ;;  %v8005_v37 = vld [vmem:[%s9498_s26 + $0x60] sm:$0xff]  ;;  %v8006_v38 = vld [vmem:[%s9498_s26 + $0x68] sm:$0xff] }
 0x27b   : > { %v1195_v44 = vadd.f32 %v8782_v41, %v7955_v39 }
 0x27c   : > { %v892_v43 = vadd.f32 %v891_v42, %v890_v40  ;;  %v1189_v45 = vpop.f32.mrf.mxu0  ;;  %v8007_v40 = vld [vmem:[%s9498_s26 + $0x70] sm:$0xff] }
 0x27d   : > { %v1190_v46 = vadd.f32 %v7955_v39, %v1189_v45  ;;  %v1209_v54 = vmax.f32 %v1195_v44, 0.0  ;;  %v8008_v44 = vld [vmem:[%s9498_s26 + $0x78] sm:$0xff] }
 0x27e   : > { %v893_v48 = vrot.slane %v892_v43, 4  ;;  %v8785_v49 = vpop.f32.mrf.mxu0 }
 0x27f   : > { %v1208_v50 = vmax.f32 %v1190_v46, 0.0  ;;  %v1205_v55 = vadd.f32 %v8785_v49, %v7955_v39 }
 0x280   : > { %v894_v53 = vadd.f32 %v893_v48, %v892_v43  ;;  %v1199_v56 = vpop.f32.mrf.mxu0 }
 0x281   : > { %v1200_v58 = vadd.f32 %v7955_v39, %v1199_v56  ;;  %8790 = vmatprep.mubr.msk.f32.mxu1 %vm671_vm2, %v1208_v50  ;;  %v1211_v5 = vmax.f32 %v1205_v55, 0.0 }
 0x282   : > { %v895_v60 = vrot.slane %v894_v53, 2  ;;  %8791 = vmatmul.mubr.msk.f32.vlgmr.msra.gmra.mxu1 %vm671_vm2, %v1209_v54  ;;  %v8800_v61 = vpop.f32.mrf.mxu0 }
 0x283   : > { %v1210_v63 = vmax.f32 %v1200_v58, 0.0  ;;  %v1521_v0 = vadd.f32 %v8800_v61, %v1434_v57  ;;  %8805 = vmatpush3.msk.msra.mxu1 %vm684_vm1, %v7988_v25 }
 0x284   : > { %v896_v4 = vadd.f32 %v895_v60, %v894_v53  ;;  %v1515_v6 = vpop.f32.mrf.mxu0  ;;  %8806 = vmatprep.subr.mxu1 %v7987_v59 }
 0x285   : > { %v1516_v8 = vadd.f32 %v1515_v6, %v1433_v62  ;;  %8793 = vmatprep.mubr.msk.f32.mxu1 %vm671_vm2, %v1210_v63  ;;  %8807 = vmatpush3.msra.mxu1 %v7987_v59  ;;  %v1543_v11 = vadd.f32 %v7986_v1, %v1521_v0  ;;  %v7997_v63 = vld [vmem:[%s9631_s28 + $0x28] sm:$0x3]  ;;  %v7996_v0 = vld [vmem:[%s9631_s28 + $0x20] sm:$0xff] }
 0x286   : > { %v897_v10 = vrot.slane %v896_v4, 1  ;;  %8794 = vmatmul.mubr.msk.f32.gmra.mxu1 %vm671_vm2, %v1211_v5  ;;  %v8803_v12 = vpop.f32.mrf.mxu0  ;;  %8824 = vmatprep.subr.mxu1 %v8013_v2 }
 0x287   : > { %v1542_v14 = vadd.f32 %v7986_v1, %v1516_v8  ;;  %v1531_v15 = vadd.f32 %v8803_v12, %v1436_v7  ;;  %v1547_v21 = vmax.f32 %v1543_v11, 0.0  ;;  %8814 = vmatprep.subr.msk.mxu0 %vm684_vm1, %v7997_v63 }
 0x288   : > { %v898_v16 = vadd.f32 %v897_v10, %v896_v4  ;;  %v1525_v17 = vpop.f32.mrf.mxu0  ;;  %8815 = vmatpush3.msk.msra.mxu0 %vm684_vm1, %v7997_v63 }
 0x289   : > { %v1546_v18 = vmax.f32 %v1542_v14, 0.0  ;;  %v1526_v19 = vadd.f32 %v1525_v17, %v1435_v13  ;;  %v1545_v22 = vadd.f32 %v7986_v1, %v1531_v15  ;;  %8816 = vmatprep.subr.mxu0 %v7996_v0  ;;  %v7990_v15 = vld [vmem:[%s9643_s29 + $0x2] ss:$0 sm:$0xff] }
 0x28a   : > { %v900_v20 = vmul.f32 0.03125, %v898_v16  ;;  %8817 = vmatpush3.msra.mxu0 %v7996_v0 }
 0x28b   : > { %v1544_v23 = vadd.f32 %v7986_v1, %v1526_v19  ;;  %8808 = vmatprep.mubr.msk.f32.mxu1 %vm671_vm2, %v1546_v18  ;;  %v1549_v34 = vmax.f32 %v1545_v22, 0.0  ;;  %v8023_v1 = vld [vmem:[%s9561_s25 + $0x38] sm:$0x3] }
 0x28c   : > { %v901_v24 = vsub.f32 %v9682_v30, %v900_v20  ;;  %v902_v25 = vsub.f32 %v9680_v29, %v900_v20  ;;  %v903_v26 = vsub.f32 %v9690_v36, %v900_v20  ;;  %v904_v27 = vsub.f32 %v9688_v35, %v900_v20  ;;  %8809 = vmatmul.mubr.msk.f32.vlgmr.msra.gmra.mxu1 %vm671_vm2, %v1547_v21 }
 0x28d   : > { %v1548_v28 = vmax.f32 %v1544_v23, 0.0  ;;  %8825 = vmatpush3.msra.mxu1 %v8013_v2  ;;  %8832 = vmatprep.subr.msk.mxu0 %vm684_vm1, %v8023_v1  ;;  %v1868_v23 = vpop.permute.xlu1 %1867 }
 0x28e   : > { %v905_v31 = vmul.f32 %v901_v24, %v901_v24  ;;  %v906_v32 = vmul.f32 %v902_v25, %v902_v25  ;;  %v907_v33 = vmul.f32 %v903_v26, %v903_v26  ;;  %v908_v30 = vmul.f32 %v904_v27, %v904_v27 }
 0x28f   : > { %8811 = vmatprep.mubr.msk.f32.mxu1 %vm671_vm2, %v1548_v28  ;;  %v1863_v28 = vpop.permute.xlu0 %1862 }
 0x290   : > { %v909_v29 = vsel %vm549_vm0, %v905_v31, 0.0  ;;  %v910_v36 = vsel %vm549_vm0, %v906_v32, 0.0  ;;  %8812 = vmatmul.mubr.msk.f32.gmra.mxu1 %vm671_vm2, %v1549_v34  ;;  %v912_v39 = vsel %vm549_vm0, %v907_v33, 0.0  ;;  %v914_v42 = vsel %vm549_vm0, %v908_v30, 0.0 }
 0x291   : > { %v911_v35 = vadd.f32 %v910_v36, %v909_v29  ;;  %8826 = vmatprep.mubr.msk.f32.mxu1 %vm549_vm0, %v8005_v37  ;;  %v8022_v29 = vld [vmem:[%s9561_s25 + $0x30] sm:$0xff] }
 0x293   : > { %v913_v41 = vadd.f32 %v912_v39, %v911_v35 }
 0x294   : > { %8827 = vmatmul.mubr.msk.f32.vlgmr.msra.gmra.mxu1 %vm549_vm0, %v8006_v38 }
 0x295   : > { %v915_v43 = vadd.f32 %v914_v42, %v913_v41  ;;  %8829 = vmatprep.mubr.msk.f32.mxu1 %vm549_vm0, %v8007_v40  ;;  %v8021_v41 = vld [vmem:[%s9610_s24 + $0x3] ss:$0 sm:$0xff] }
 0x296   : > { %v8048_v42 = vld [vmem:[%s9508_s17 + $0x20] sm:$0xff] }
 0x297   : > { %v916_v45 = vrot.slane %v915_v43, 4 }
 0x298   : > { %8830 = vmatmul.mubr.msk.f32.gmra.mxu1 %vm549_vm0, %v8008_v44 }
 0x299   : > { %v917_v46 = vadd.f32 %v916_v45, %v915_v43  ;;  %v1878_v43 = vpop.permute.xlu1 %1877 }
 0x29b   : > { %v918_v47 = vrot.slane %v917_v46, 2 }
 0x29d   : > { %v919_v48 = vadd.f32 %v918_v47, %v917_v46 }
 0x29f   : > { %v920_v49 = vrot.slane %v919_v48, 1 }
 0x2a1   : > { %v921_v50 = vadd.f32 %v920_v49, %v919_v48  ;;  %v1873_v49 = vpop.permute.xlu0 %1872 }
 0x2a3   : > { %v922_v51 = vmul.f32 0.032258064, %v921_v50 }
 0x2a5   : > { %9247 = vrsqrt.f32 %v922_v51  ;;  %vm925_vm3 = vcmp.eq.f32.partialorder %v922_v51, inf  ;;  %v928_v54 = vand.u32 2147483648, %v922_v51  ;;  %vm927_vm4 = vcmp.eq.f32.partialorder %v922_v51, 0.0 }
 0x2b2   : > { %v9248_v52 = vpop.eup %9247 }
 0x2b3   : > { %v924_v53 = vmul.f32 %v9248_v52, %v922_v51 }
 0x2b5   : > { %v926_v55 = vsel %vm925_vm3, %v922_v51, %v924_v53  ;;  %vm2747_vm3 = vcmask 326912  }
 0x2b6   : > { %v929_v56 = vsel %vm927_vm4, %v928_v54, %v926_v55 }
 0x2b7   : > { %v930_v57 = vadd.f32 1e-05, %v929_v56 }
 0x2b9   : > { %9249 = vrcp.f32 %v930_v57 }
 0x2c6   : > { %v9250_v58 = vpop.eup %9249 }
 0x2c7   : > { %v934_v59 = vmul.f32 %v9250_v58, %v903_v26  ;;  %v933_v60 = vmul.f32 %v9250_v58, %v902_v25  ;;  %v932_v61 = vmul.f32 %v9250_v58, %v901_v24  ;;  %v935_v62 = vmul.f32 %v9250_v58, %v904_v27  ;;  %v8015_v27 = vld [vmem:[%s9603_s14 + $0x3] ss:$0 sm:$0xff] }
 0x2c8   : > { %v1887_v37 = vmul.f32 %v8015_v27, %v1868_v23  ;;  %v1886_v38 = vmul.f32 %v8015_v27, %v1863_v28  ;;  %v1889_v47 = vmul.f32 %v8015_v27, %v1878_v43  ;;  %v1888_v53 = vmul.f32 %v8015_v27, %v1873_v49  ;;  %v9796_v28 = vpop.permute.xlu1 %2320 }
 0x2c9   : > { %937 = vst.msk [vmem:[%s9729_s22 + $0x8] sm:$0xff] %vm549_vm0, %v933_v60  ;;  %938 = vst.msk [vmem:[%s9729_s22 + $0x10] sm:$0xff] %vm549_vm0, %v934_v59 }
 0x2ca   : > { %936 = vst.msk [vmem:[%s9729_s22] sm:$0xff] %vm549_vm0, %v932_v61  ;;  %939 = vst.msk [vmem:[%s9729_s22 + $0x18] sm:$0xff] %vm549_vm0, %v935_v62 }
 0x342   : > { %v8792_v2 = vpop.f32.mrf.mxu1 }
 0x343   : > { %v9746_v5 = vadd.f32 %v8792_v2, %v7964_v3 }
 0x344   : > { %v1304_v4 = vpop.f32.mrf.mxu1 }
 0x345   : > { %v9748_v6 = vadd.f32 %v7964_v3, %v1304_v4  ;;  %v1324_v10 = vsel %vm549_vm0, %v9746_v5, 0.0 }
 0x346   : > { %v8795_v7 = vpop.f32.mrf.mxu1 }
 0x347   : > { %v1323_v8 = vsel %vm549_vm0, %v9748_v6, 0.0  ;;  %v9754_v11 = vadd.f32 %v8795_v7, %v7964_v3 }
 0x348   : > { %v1314_v9 = vpop.f32.mrf.mxu1  ;;  %v1325_v13 = vadd.f32 %v1324_v10, %v1323_v8 }
 0x349   : > { %v1315_v12 = vadd.f32 %v7964_v3, %v1314_v9  ;;  %v1328_v18 = vsel %vm549_vm0, %v9754_v11, 0.0  ;;  %v8040_v9 = vld [vmem:[%s9498_s26 + $0x80] sm:$0xff] }
 0x34b   : > { %v1326_v14 = vsel %vm549_vm0, %v1315_v12, 0.0 }
 0x34c   : > { %v1327_v16 = vadd.f32 %v1326_v14, %v1325_v13  ;;  %v8810_v17 = vpop.f32.mrf.mxu1  ;;  %v8041_v13 = vld [vmem:[%s9498_s26 + $0x88] sm:$0xff] }
 0x34d   : > { %v1648_v20 = vadd.f32 %v8810_v17, %v7990_v15 }
 0x34e   : > { %v1329_v19 = vadd.f32 %v1328_v18, %v1327_v16  ;;  %v1642_v21 = vpop.f32.mrf.mxu1  ;;  %v8042_v16 = vld [vmem:[%s9498_s26 + $0x90] sm:$0xff] }
 0x34f   : > { %v1643_v22 = vadd.f32 %v7990_v15, %v1642_v21  ;;  %v1662_v32 = vmax.f32 %v1648_v20, 0.0 }
 0x350   : > { %v1330_v24 = vrot.slane %v1329_v19, 4  ;;  %v8813_v25 = vpop.f32.mrf.mxu1 }
 0x351   : > { %v1661_v26 = vmax.f32 %v1643_v22, 0.0  ;;  %v1658_v33 = vadd.f32 %v8813_v25, %v7990_v15 }
 0x352   : > { %v1331_v31 = vadd.f32 %v1330_v24, %v1329_v19  ;;  %v1652_v34 = vpop.f32.mrf.mxu1  ;;  %v8043_v19 = vld [vmem:[%s9498_s26 + $0x98] sm:$0xff] }
 0x353   : > { %v1653_v30 = vadd.f32 %v7990_v15, %v1652_v34  ;;  %8818 = vmatprep.mubr.msk.f32.mxu0 %vm671_vm2, %v1661_v26  ;;  %v1664_v45 = vmax.f32 %v1658_v33, 0.0  ;;  %v9800_v33 = vpop.permute.xlu1 %2330 }
 0x354   : > { %v1332_v36 = vrot.slane %v1331_v31, 2  ;;  %8819 = vmatmul.mubr.msk.f32.vlgmr.msra.gmra.mxu0 %vm671_vm2, %v1662_v32  ;;  %v8828_v35 = vpop.f32.mrf.mxu1 }
 0x355   : > { %v1663_v39 = vmax.f32 %v1653_v30, 0.0  ;;  %v1974_v40 = vadd.f32 %v8828_v35, %v1887_v37  ;;  %8833 = vmatpush3.msk.msra.mxu0 %vm684_vm1, %v8023_v1 }
 0x356   : > { %v1333_v44 = vadd.f32 %v1332_v36, %v1331_v31  ;;  %v1968_v46 = vpop.f32.mrf.mxu1  ;;  %8834 = vmatprep.subr.mxu0 %v8022_v29  ;;  %v9798_v31 = vpop.permute.xlu0 %2315 }
 0x357   : > { %v1969_v48 = vadd.f32 %v1968_v46, %v1886_v38  ;;  %8821 = vmatprep.mubr.msk.f32.mxu0 %vm671_vm2, %v1663_v39  ;;  %8835 = vmatpush3.msra.mxu0 %v8022_v29  ;;  %v1996_v51 = vadd.f32 %v8021_v41, %v1974_v40  ;;  %v9804_v38 = vpop.permute.xlu1 %2773 }
 0x358   : > { %v1334_v50 = vrot.slane %v1333_v44, 1  ;;  %8822 = vmatmul.mubr.msk.f32.gmra.mxu0 %vm671_vm2, %v1664_v45  ;;  %v8831_v52 = vpop.f32.mrf.mxu1  ;;  %8852 = vmatprep.subr.mxu0 %v8048_v42 }
 0x359   : > { %v1995_v54 = vadd.f32 %v8021_v41, %v1969_v48  ;;  %v1984_v55 = vadd.f32 %v8831_v52, %v1889_v47  ;;  %v2000_v61 = vmax.f32 %v1996_v51, 0.0  ;;  %v8032_v51 = vld [vmem:[%s9631_s28 + $0x38] sm:$0x3] }
 0x35a   : > { %v1335_v56 = vadd.f32 %v1334_v50, %v1333_v44  ;;  %v1978_v57 = vpop.f32.mrf.mxu1  ;;  %v9802_v34 = vpop.permute.xlu0 %2325  ;;  %8842 = vmatprep.subr.msk.mxu1 %vm684_vm1, %v8032_v51 }
 0x35b   : > { %v1999_v58 = vmax.f32 %v1995_v54, 0.0  ;;  %v1979_v59 = vadd.f32 %v1978_v57, %v1888_v53  ;;  %v1998_v62 = vadd.f32 %v8021_v41, %v1984_v55  ;;  %v9808_v40 = vpop.permute.xlu1 %2783  ;;  %8843 = vmatpush3.msk.msra.mxu1 %vm684_vm1, %v8032_v51  ;;  %v8031_v54 = vld [vmem:[%s9631_s28 + $0x30] sm:$0xff]  ;;  %v9839_v57 = vld [vmem:[%s9561_s25 + $0x48] sm:$0x3] }
 0x35c   : > { %v1336_v60 = vmul.f32 0.03125, %v1335_v56  ;;  %8844 = vmatprep.subr.mxu1 %v8031_v54 }
 0x35d   : > { %v1997_v63 = vadd.f32 %v8021_v41, %v1979_v59  ;;  %8836 = vmatprep.mubr.msk.f32.mxu0 %vm671_vm2, %v1999_v58  ;;  %v2002_v8 = vmax.f32 %v1998_v62, 0.0  ;;  %8845 = vmatpush3.msra.mxu1 %v8031_v54 }
 0x35e   : > { %v9770_v0 = vsub.f32 %v1315_v12, %v1336_v60  ;;  %v9773_v1 = vsub.f32 %v9754_v11, %v1336_v60  ;;  %8837 = vmatmul.mubr.msk.f32.vlgmr.msra.gmra.mxu0 %vm671_vm2, %v2000_v61  ;;  %v1337_v2 = vsub.f32 %v9748_v6, %v1336_v60  ;;  %v1338_v3 = vsub.f32 %v9746_v5, %v1336_v60  ;;  %v9806_v39 = vpop.permute.xlu0 %2768 }
 0x35f   : > { %v2001_v4 = vmax.f32 %v1997_v63, 0.0  ;;  %8853 = vmatpush3.msra.mxu0 %v8048_v42  ;;  %v9812_v42 = vpop.permute.xlu1 %3226  ;;  %8860 = vmatprep.subr.msk.mxu1 %vm684_vm1, %v9839_v57 }
 0x360   : > { %v1343_v7 = vmul.f32 %v9770_v0, %v9770_v0  ;;  %v1341_v10 = vmul.f32 %v1337_v2, %v1337_v2  ;;  %v1342_v12 = vmul.f32 %v1338_v3, %v1338_v3  ;;  %v1344_v6 = vmul.f32 %v9773_v1, %v9773_v1 }
 0x361   : > { %8839 = vmatprep.mubr.msk.f32.mxu0 %vm671_vm2, %v2001_v4 }
 0x362   : > { %8840 = vmatmul.mubr.msk.f32.gmra.mxu0 %vm671_vm2, %v2002_v8  ;;  %v1345_v5 = vsel %vm549_vm0, %v1341_v10, 0.0  ;;  %v1346_v11 = vsel %vm549_vm0, %v1342_v12, 0.0  ;;  %v1348_v15 = vsel %vm549_vm0, %v1343_v7, 0.0  ;;  %v1350_v18 = vsel %vm549_vm0, %v1344_v6, 0.0  ;;  %v9810_v41 = vpop.permute.xlu0 %2778 }
 0x363   : > { %8854 = vmatprep.mubr.msk.f32.mxu0 %vm549_vm0, %v8040_v9  ;;  %v1347_v14 = vadd.f32 %v1346_v11, %v1345_v5  ;;  %v9818_v47 = vpop.permute.xlu1 %3236 }
 0x365   : > { %v1349_v17 = vadd.f32 %v1348_v15, %v1347_v14 }
 0x366   : > { %8855 = vmatmul.mubr.msk.f32.vlgmr.msra.gmra.mxu0 %vm549_vm0, %v8041_v13  ;;  %v9814_v43 = vpop.permute.xlu0 %3221 }
 0x367   : > { %8857 = vmatprep.mubr.msk.f32.mxu0 %vm549_vm0, %v8042_v16  ;;  %v1351_v20 = vadd.f32 %v1350_v18, %v1349_v17  ;;  %v9828_v52 = vpop.permute.xlu1 %3679 }
 0x369   : > { %v1352_v21 = vrot.slane %v1351_v20, 4 }
 0x36a   : > { %8858 = vmatmul.mubr.msk.f32.gmra.mxu0 %vm549_vm0, %v8043_v19  ;;  %v9820_v48 = vpop.permute.xlu0 %3231 }
 0x36b   : > { %v1353_v22 = vadd.f32 %v1352_v21, %v1351_v20  ;;  %v9834_v55 = vpop.permute.xlu1 %3689 }
 0x36d   : > { %v1354_v23 = vrot.slane %v1353_v22, 2 }
 0x36e   : > { %v9830_v53 = vpop.permute.xlu0 %3674 }
 0x36f   : > { %v1355_v24 = vadd.f32 %v1354_v23, %v1353_v22  ;;  %v9843_v58 = vpop.permute.xlu1 %4132 }
 0x371   : > { %v1356_v25 = vrot.slane %v1355_v24, 1 }
 0x372   : > { %v9836_v56 = vpop.permute.xlu0 %3684 }
 0x373   : > { %v1357_v26 = vadd.f32 %v1356_v25, %v1355_v24  ;;  %v9847_v60 = vpop.permute.xlu1 %4142 }
 0x375   : > { %v1358_v27 = vmul.f32 0.032258064, %v1357_v26 }
 0x376   : > { %v9845_v59 = vpop.permute.xlu0 %4127 }
 0x377   : > { %9251 = vrsqrt.f32 %v1358_v27  ;;  %vm1361_vm5 = vcmp.eq.f32.partialorder %v1358_v27, inf  ;;  %v1364_v30 = vand.u32 2147483648, %v1358_v27  ;;  %vm1363_vm6 = vcmp.eq.f32.partialorder %v1358_v27, 0.0  ;;  %v9851_v62 = vpop.permute.xlu1 %4585 }
 0x37a   : > { %v9849_v61 = vpop.permute.xlu0 %4137 }
 0x37e   : > { %v9853_v63 = vpop.permute.xlu0 %4580 }
 0x384   : > { %v9252_v32 = vpop.eup %9251 }
 0x385   : > { %v1360_v37 = vmul.f32 %v9252_v32, %v1358_v27 }
 0x387   : > { %v1362_v29 = vsel %vm1361_vm5, %v1358_v27, %v1360_v37 }
 0x388   : > { %v1365_v36 = vsel %vm1363_vm6, %v1364_v30, %v1362_v29  ;;  %v7999_v29 = vld [vmem:[%s9677_s16 + $0x2] ss:$0 sm:$0xff]  ;;  %vm3200_vm6 = vcmask 392512  }
 0x389   : > { %v1366_v35 = vadd.f32 1e-05, %v1365_v36 }
 0x38b   : > { %9253 = vrcp.f32 %v1366_v35 }
 0x398   : > { %v9254_v44 = vpop.eup %9253 }
 0x399   : > { %v1369_v45 = vmul.f32 %v9254_v44, %v1338_v3  ;;  %v1368_v46 = vmul.f32 %v9254_v44, %v1337_v2  ;;  %v1371_v49 = vmul.f32 %v9254_v44, %v9773_v1  ;;  %v1370_v50 = vmul.f32 %v9254_v44, %v9770_v0  ;;  %v9855_v0 = vpop.permute.xlu1 %4595  ;;  %v9857_v1 = vpop.permute.xlu0 %4590 }
 0x39b   : > { %1378 = vrot.lane.b32.xlu1 %v1369_v45, %s9374_s27  ;;  %1376 = vrot.lane.b32.xlu0 %v1368_v46, %s9374_s27 }
 0x39d   : > { %v9859_v2 = vpop.permute.xlu1 %5038  ;;  %v9861_v3 = vpop.permute.xlu0 %5033 }
 0x39f   : > { %1382 = vrot.lane.b32.xlu1 %v1371_v49, %s9374_s27  ;;  %1380 = vrot.lane.b32.xlu0 %v1370_v50, %s9374_s27 }
 0x3a1   : > { %v9863_v4 = vpop.permute.xlu1 %5048  ;;  %v9865_v7 = vpop.permute.xlu0 %5043 }
 0x3a5   : > { %v9867_v8 = vpop.permute.xlu1 %5491  ;;  %v9869_v9 = vpop.permute.xlu0 %5486 }
 0x3a9   : > { %v9871_v10 = vpop.permute.xlu1 %5501  ;;  %v9873_v12 = vpop.permute.xlu0 %5496 }
 0x3ad   : > { %v9875_v6 = vpop.permute.xlu1 %5944  ;;  %v9877_v5 = vpop.permute.xlu0 %5939 }
 0x3b1   : > { %v9879_v11 = vpop.permute.xlu1 %5954  ;;  %v9881_v13 = vpop.permute.xlu0 %5949 }
 0x3b5   : > { %v9883_v14 = vpop.permute.xlu1 %6397  ;;  %v9885_v15 = vpop.permute.xlu0 %6392 }
 0x3b9   : > { %v9887_v16 = vpop.permute.xlu1 %6407  ;;  %v9889_v17 = vpop.permute.xlu0 %6402 }
 0x3ba   : > { %10628 = vst [vmem:[#allocation5_spill] sm:$0xff] %v9889_v17  ;;  %v8056_v17 = vld [vmem:[%s9610_s24 + $0x4] ss:$0 sm:$0xff] }
 0x3bd   : > { %v9891_v18 = vpop.permute.xlu1 %6850  ;;  %v9893_v19 = vpop.permute.xlu0 %6845 }
 0x3be   : > { %10629 = vst [vmem:[#allocation6_spill] sm:$0xff] %v9891_v18  ;;  %10630 = vst [vmem:[#allocation7_spill] sm:$0xff] %v9893_v19  ;;  %v8050_v18 = vld [vmem:[%s9603_s14 + $0x4] ss:$0 sm:$0xff] }
 0x3c1   : > { %v9895_v20 = vpop.permute.xlu1 %6860  ;;  %v9897_v21 = vpop.permute.xlu0 %6855 }
 0x3c2   : > { %10631 = vst [vmem:[#allocation8_spill] sm:$0xff] %v9895_v20  ;;  %10632 = vst [vmem:[#allocation9_spill] sm:$0xff] %v9897_v21 }
 0x3c5   : > { %v9899_v22 = vpop.permute.xlu1 %7303  ;;  %v9901_v23 = vpop.permute.xlu0 %7298 }
 0x3c6   : > { %10633 = vst [vmem:[#allocation10_spill] sm:$0xff] %v9899_v22  ;;  %10634 = vst [vmem:[#allocation11_spill] sm:$0xff] %v9901_v23 }
 0x3c9   : > { %v9903_v24 = vpop.permute.xlu1 %7313  ;;  %v9905_v25 = vpop.permute.xlu0 %7308 }
 0x3ca   : > { %10635 = vst [vmem:[#allocation12_spill] sm:$0xff] %v9903_v24  ;;  %10636 = vst [vmem:[#allocation13_spill] sm:$0xff] %v9905_v25 }
 0x40d   : > { %v1379_v26 = vpop.permute.xlu1 %1378  ;;  %v1377_v27 = vpop.permute.xlu0 %1376 }
 0x40e   : > { %1390 = vst.msk [vmem:[%s9729_s22 + $0x8] sm:$0xff] %vm1388_vm7, %v1379_v26  ;;  %1389 = vst.msk [vmem:[%s9729_s22] sm:$0xff] %vm1388_vm7, %v1377_v27 }
 0x411   : > { %v1383_v32 = vpop.permute.xlu1 %1382  ;;  %v1381_v37 = vpop.permute.xlu0 %1380 }
 0x412   : > { %1392 = vst.msk [vmem:[%s9729_s22 + $0x18] sm:$0xff] %vm1388_vm7, %v1383_v32  ;;  %1391 = vst.msk [vmem:[%s9729_s22 + $0x10] sm:$0xff] %vm1388_vm7, %v1381_v37  ;;  %v8025_v32 = vld [vmem:[%s9643_s29 + $0x3] ss:$0 sm:$0xff] }
 0x414   : > { %v8820_v30 = vpop.f32.mrf.mxu0 }
 0x415   : > { %v9912_v35 = vadd.f32 %v8820_v30, %v7999_v29 }
 0x416   : > { %v1757_v36 = vpop.f32.mrf.mxu0 }
 0x417   : > { %v9914_v44 = vadd.f32 %v7999_v29, %v1757_v36  ;;  %v1777_v50 = vsel %vm549_vm0, %v9912_v35, 0.0 }
 0x418   : > { %v8823_v45 = vpop.f32.mrf.mxu0 }
 0x419   : > { %v1776_v46 = vsel %vm549_vm0, %v9914_v44, 0.0  ;;  %v1773_v51 = vadd.f32 %v8823_v45, %v7999_v29 }
 0x41a   : > { %v1767_v49 = vpop.f32.mrf.mxu0  ;;  %v1778_v26 = vadd.f32 %v1777_v50, %v1776_v46  ;;  %v2340_v50 = vmul.f32 %v8050_v18, %v9796_v28 }
 0x41b   : > { %v1768_v54 = vadd.f32 %v7999_v29, %v1767_v49  ;;  %v1781_v36 = vsel %vm549_vm0, %v1773_v51, 0.0 }
 0x41d   : > { %v1779_v27 = vsel %vm549_vm0, %v1768_v54, 0.0 }
 0x41e   : > { %v1780_v37 = vadd.f32 %v1779_v27, %v1778_v26  ;;  %v8838_v30 = vpop.f32.mrf.mxu0  ;;  %v8057_v27 = vld [vmem:[%s9561_s25 + $0x40] sm:$0xff] }
 0x41f   : > { %v2101_v24 = vadd.f32 %v8838_v30, %v8025_v32  ;;  %v2339_v30 = vmul.f32 %v8050_v18, %v9798_v31 }
 0x420   : > { %v1782_v25 = vadd.f32 %v1781_v36, %v1780_v37  ;;  %v2095_v23 = vpop.f32.mrf.mxu0 }
 0x421   : > { %v2096_v22 = vadd.f32 %v8025_v32, %v2095_v23  ;;  %v2115_v29 = vmax.f32 %v2101_v24, 0.0 }
 0x422   : > { %v1783_v21 = vrot.slane %v1782_v25, 4  ;;  %v8841_v20 = vpop.f32.mrf.mxu0 }
 0x423   : > { %v2114_v19 = vmax.f32 %v2096_v22, 0.0  ;;  %v2111_v46 = vadd.f32 %v8841_v20, %v8025_v32  ;;  %v8083_v20 = vld [vmem:[%s9508_s17 + $0x28] sm:$0xff] }
 0x424   : > { %v1784_v45 = vadd.f32 %v1783_v21, %v1782_v25  ;;  %v2105_v49 = vpop.f32.mrf.mxu0 }
 0x425   : > { %v2106_v26 = vadd.f32 %v8025_v32, %v2105_v49  ;;  %8846 = vmatprep.mubr.msk.f32.mxu1 %vm671_vm2, %v2114_v19  ;;  %v2117_v24 = vmax.f32 %v2111_v46, 0.0  ;;  %v2342_v19 = vmul.f32 %v8050_v18, %v9800_v33  ;;  %v2341_v49 = vmul.f32 %v8050_v18, %v9802_v34 }
 0x426   : > { %v1785_v37 = vrot.slane %v1784_v45, 2  ;;  %8847 = vmatmul.mubr.msk.f32.vlgmr.msra.gmra.mxu1 %vm671_vm2, %v2115_v29  ;;  %v8856_v23 = vpop.f32.mrf.mxu0 }
 0x427   : > { %v2116_v22 = vmax.f32 %v2106_v26, 0.0  ;;  %v2427_v36 = vadd.f32 %v8856_v23, %v2340_v50  ;;  %8861 = vmatpush3.msk.msra.mxu1 %vm684_vm1, %v9839_v57 }
 0x428   : > { %v1786_v21 = vadd.f32 %v1785_v37, %v1784_v45  ;;  %v2421_v28 = vpop.f32.mrf.mxu0  ;;  %8862 = vmatprep.subr.mxu1 %v8057_v27 }
 0x429   : > { %v2422_v25 = vadd.f32 %v2421_v28, %v2339_v30  ;;  %8849 = vmatprep.mubr.msk.f32.mxu1 %vm671_vm2, %v2116_v22  ;;  %8863 = vmatpush3.msra.mxu1 %v8057_v27  ;;  %v2449_v29 = vadd.f32 %v8056_v17, %v2427_v36 }
 0x42a   : > { %v1787_v32 = vrot.slane %v1786_v21, 1  ;;  %8850 = vmatmul.mubr.msk.f32.gmra.mxu1 %vm671_vm2, %v2117_v24  ;;  %v8859_v31 = vpop.f32.mrf.mxu0  ;;  %8880 = vmatprep.subr.mxu1 %v8083_v20 }
 0x42b   : > { %v2448_v57 = vadd.f32 %v8056_v17, %v2422_v25  ;;  %v2437_v50 = vadd.f32 %v8859_v31, %v2342_v19  ;;  %v2453_v23 = vmax.f32 %v2449_v29, 0.0  ;;  %v8075_v19 = vld [vmem:[%s9498_s26 + $0xa0] sm:$0xff]  ;;  %v8077_v29 = vld [vmem:[%s9498_s26 + $0xb0] sm:$0xff] }
 0x42c   : > { %v1788_v45 = vadd.f32 %v1787_v32, %v1786_v21  ;;  %v2431_v46 = vpop.f32.mrf.mxu0 }
 0x42d   : > { %v2452_v26 = vmax.f32 %v2448_v57, 0.0  ;;  %v2432_v37 = vadd.f32 %v2431_v46, %v2341_v49  ;;  %v2451_v30 = vadd.f32 %v8056_v17, %v2437_v50  ;;  %v8078_v57 = vld [vmem:[%s9498_s26 + $0xb8] sm:$0xff] }
 0x42e   : > { %v1789_v33 = vmul.f32 0.03125, %v1788_v45 }
 0x42f   : > { %v2450_v22 = vadd.f32 %v8056_v17, %v2432_v37  ;;  %8864 = vmatprep.mubr.msk.f32.mxu1 %vm671_vm2, %v2452_v26  ;;  %v2455_v28 = vmax.f32 %v2451_v30, 0.0 }
 0x430   : > { %v1792_v27 = vsub.f32 %v1768_v54, %v1789_v33  ;;  %v1793_v36 = vsub.f32 %v1773_v51, %v1789_v33  ;;  %8865 = vmatmul.mubr.msk.f32.vlgmr.msra.gmra.mxu1 %vm671_vm2, %v2453_v23  ;;  %v1790_v34 = vsub.f32 %v9914_v44, %v1789_v33  ;;  %v1791_v18 = vsub.f32 %v9912_v35, %v1789_v33  ;;  %v8076_v35 = vld [vmem:[%s9498_s26 + $0xa8] sm:$0xff] }
 0x431   : > { %v2454_v21 = vmax.f32 %v2450_v22, 0.0  ;;  %8881 = vmatpush3.msra.mxu1 %v8083_v20 }
 0x432   : > { %v1796_v24 = vmul.f32 %v1792_v27, %v1792_v27  ;;  %v1794_v25 = vmul.f32 %v1790_v34, %v1790_v34  ;;  %v1795_v17 = vmul.f32 %v1791_v18, %v1791_v18  ;;  %v1797_v51 = vmul.f32 %v1793_v36, %v1793_v36 }
 0x433   : > { %8867 = vmatprep.mubr.msk.f32.mxu1 %vm671_vm2, %v2454_v21 }
 0x434   : > { %8868 = vmatmul.mubr.msk.f32.gmra.mxu1 %vm671_vm2, %v2455_v28  ;;  %v1798_v54 = vsel %vm549_vm0, %v1794_v25, 0.0  ;;  %v1799_v44 = vsel %vm549_vm0, %v1795_v17, 0.0  ;;  %v1801_v20 = vsel %vm549_vm0, %v1796_v24, 0.0  ;;  %v1803_v49 = vsel %vm549_vm0, %v1797_v51, 0.0 }
 0x435   : > { %8882 = vmatprep.mubr.msk.f32.mxu1 %vm549_vm0, %v8075_v19  ;;  %v1800_v32 = vadd.f32 %v1799_v44, %v1798_v54 }
 0x437   : > { %v1802_v31 = vadd.f32 %v1801_v20, %v1800_v32  ;;  %v8067_v32 = vld [vmem:[%s9631_s28 + $0x48] sm:$0x3]  ;;  %v8066_v20 = vld [vmem:[%s9631_s28 + $0x40] sm:$0xff] }
 0x438   : > { %8883 = vmatmul.mubr.msk.f32.vlgmr.msra.gmra.mxu1 %vm549_vm0, %v8076_v35  ;;  %8870 = vmatprep.subr.msk.mxu0 %vm684_vm1, %v8067_v32 }
 0x439   : > { %8885 = vmatprep.mubr.msk.f32.mxu1 %vm549_vm0, %v8077_v29  ;;  %v1804_v50 = vadd.f32 %v1803_v49, %v1802_v31  ;;  %8871 = vmatpush3.msk.msra.mxu0 %vm684_vm1, %v8067_v32  ;;  %v8034_v49 = vld [vmem:[%s9677_s16 + $0x3] ss:$0 sm:$0xff] }
 0x43a   : > { %8872 = vmatprep.subr.mxu0 %v8066_v20 }
 0x43b   : > { %v1805_v45 = vrot.slane %v1804_v50, 4  ;;  %8873 = vmatpush3.msra.mxu0 %v8066_v20 }
 0x43c   : > { %8886 = vmatmul.mubr.msk.f32.gmra.mxu1 %vm549_vm0, %v8078_v57 }
 0x43d   : > { %v1806_v46 = vadd.f32 %v1805_v45, %v1804_v50 }
 0x43f   : > { %v1807_v26 = vrot.slane %v1806_v46, 2 }
 0x441   : > { %v1808_v37 = vadd.f32 %v1807_v26, %v1806_v46 }
 0x443   : > { %v1809_v33 = vrot.slane %v1808_v37, 1 }
 0x445   : > { %v1810_v23 = vadd.f32 %v1809_v33, %v1808_v37 }
 0x447   : > { %v1811_v30 = vmul.f32 0.032258064, %v1810_v23 }
 0x449   : > { %9255 = vrsqrt.f32 %v1811_v30  ;;  %vm1814_vm8 = vcmp.eq.f32.partialorder %v1811_v30, inf  ;;  %v1817_v24 = vand.u32 2147483648, %v1811_v30  ;;  %vm1816_vm9 = vcmp.eq.f32.partialorder %v1811_v30, 0.0 }
 0x456   : > { %v9256_v22 = vpop.eup %9255 }
 0x457   : > { %v1813_v21 = vmul.f32 %v9256_v22, %v1811_v30 }
 0x459   : > { %v1815_v28 = vsel %vm1814_vm8, %v1811_v30, %v1813_v21 }
 0x45a   : > { %v1818_v19 = vsel %vm1816_vm9, %v1817_v24, %v1815_v28  ;;  %v8060_v24 = vld [vmem:[%s9643_s29 + $0x4] ss:$0 sm:$0xff]  ;;  %vm3653_vm9 = vcmask 458112  }
 0x45b   : > { %v1819_v25 = vadd.f32 1e-05, %v1818_v19 }
 0x45d   : > { %9257 = vrcp.f32 %v1819_v25 }
 0x46a   : > { %v9258_v17 = vpop.eup %9257 }
 0x46b   : > { %v1822_v51 = vmul.f32 %v9258_v17, %v1791_v18  ;;  %v1821_v54 = vmul.f32 %v9258_v17, %v1790_v34  ;;  %v1824_v44 = vmul.f32 %v9258_v17, %v1793_v36  ;;  %v1823_v35 = vmul.f32 %v9258_v17, %v1792_v27  ;;  %v8093_v34 = vld [vmem:[%s9561_s25 + $0x58] sm:$0x3] }
 0x46c   : > { %8888 = vmatprep.subr.msk.mxu0 %vm684_vm1, %v8093_v34 }
 0x46d   : > { %1831 = vrot.lane.b32.xlu1 %v1822_v51, %s9375_s23  ;;  %1829 = vrot.lane.b32.xlu0 %v1821_v54, %s9375_s23 }
 0x471   : > { %1835 = vrot.lane.b32.xlu1 %v1824_v44, %s9375_s23  ;;  %1833 = vrot.lane.b32.xlu0 %v1823_v35, %s9375_s23  ;;  %s9376_s23 = smov 24  }
 0x4df   : > { %v1832_v36 = vpop.permute.xlu1 %1831  ;;  %v1830_v18 = vpop.permute.xlu0 %1829 }
 0x4e0   : > { %1843 = vst.msk [vmem:[%s9729_s22 + $0x8] sm:$0xff] %vm1841_vm10, %v1832_v36  ;;  %1842 = vst.msk [vmem:[%s9729_s22] sm:$0xff] %vm1841_vm10, %v1830_v18  ;;  %v8085_v36 = vld [vmem:[%s9603_s14 + $0x5] ss:$0 sm:$0xff] }
 0x4e3   : > { %v1836_v27 = vpop.permute.xlu1 %1835  ;;  %v1834_v29 = vpop.permute.xlu0 %1833 }
 0x4e4   : > { %1845 = vst.msk [vmem:[%s9729_s22 + $0x18] sm:$0xff] %vm1841_vm10, %v1836_v27  ;;  %1844 = vst.msk [vmem:[%s9729_s22 + $0x10] sm:$0xff] %vm1841_vm10, %v1834_v29 }
 0x4e6   : > { %v8848_v31 = vpop.f32.mrf.mxu1 }
 0x4e7   : > { %v9966_v50 = vadd.f32 %v8848_v31, %v8034_v49 }
 0x4e8   : > { %v2210_v57 = vpop.f32.mrf.mxu1 }
 0x4e9   : > { %v9968_v45 = vadd.f32 %v8034_v49, %v2210_v57  ;;  %v2230_v33 = vsel %vm549_vm0, %v9966_v50, 0.0 }
 0x4ea   : > { %v8851_v46 = vpop.f32.mrf.mxu1 }
 0x4eb   : > { %v2229_v26 = vsel %vm549_vm0, %v9968_v45, 0.0  ;;  %v2226_v23 = vadd.f32 %v8851_v46, %v8034_v49  ;;  %v8092_v46 = vld [vmem:[%s9561_s25 + $0x50] sm:$0xff] }
 0x4ec   : > { %v2220_v37 = vpop.f32.mrf.mxu1  ;;  %v2231_v22 = vadd.f32 %v2230_v33, %v2229_v26  ;;  %v2792_v33 = vmul.f32 %v8085_v36, %v9806_v39 }
 0x4ed   : > { %v2221_v30 = vadd.f32 %v8034_v49, %v2220_v37  ;;  %v2234_v25 = vsel %vm549_vm0, %v2226_v23, 0.0  ;;  %v2793_v49 = vmul.f32 %v8085_v36, %v9804_v38  ;;  %v2795_v38 = vmul.f32 %v8085_v36, %v9808_v40 }
 0x4ef   : > { %v2232_v21 = vsel %vm549_vm0, %v2221_v30, 0.0 }
 0x4f0   : > { %v2233_v28 = vadd.f32 %v2232_v21, %v2231_v22  ;;  %v8866_v19 = vpop.f32.mrf.mxu1 }
 0x4f1   : > { %v2554_v51 = vadd.f32 %v8866_v19, %v8060_v24  ;;  %v8118_v19 = vld [vmem:[%s9508_s17 + $0x30] sm:$0xff] }
 0x4f2   : > { %v2235_v17 = vadd.f32 %v2234_v25, %v2233_v28  ;;  %v2548_v54 = vpop.f32.mrf.mxu1  ;;  %v8091_v28 = vld [vmem:[%s9610_s24 + $0x5] ss:$0 sm:$0xff] }
 0x4f3   : > { %v2549_v44 = vadd.f32 %v8060_v24, %v2548_v54  ;;  %v2568_v27 = vmax.f32 %v2554_v51, 0.0 }
 0x4f4   : > { %v2236_v35 = vrot.slane %v2235_v17, 4  ;;  %v8869_v32 = vpop.f32.mrf.mxu1 }
 0x4f5   : > { %v2567_v20 = vmax.f32 %v2549_v44, 0.0  ;;  %v2564_v29 = vadd.f32 %v8869_v32, %v8060_v24 }
 0x4f6   : > { %v2237_v18 = vadd.f32 %v2236_v35, %v2235_v17  ;;  %v2558_v31 = vpop.f32.mrf.mxu1  ;;  %v2794_v35 = vmul.f32 %v8085_v36, %v9810_v41 }
 0x4f7   : > { %v2559_v57 = vadd.f32 %v8060_v24, %v2558_v31  ;;  %8874 = vmatprep.mubr.msk.f32.mxu0 %vm671_vm2, %v2567_v20  ;;  %v2570_v17 = vmax.f32 %v2564_v29, 0.0 }
 0x4f8   : > { %v2238_v26 = vrot.slane %v2237_v18, 2  ;;  %8875 = vmatmul.mubr.msk.f32.vlgmr.msra.gmra.mxu0 %vm671_vm2, %v2568_v27  ;;  %v8884_v37 = vpop.f32.mrf.mxu1 }
 0x4f9   : > { %v2569_v22 = vmax.f32 %v2559_v57, 0.0  ;;  %v2880_v21 = vadd.f32 %v8884_v37, %v2793_v49  ;;  %8889 = vmatpush3.msk.msra.mxu0 %vm684_vm1, %v8093_v34 }
 0x4fa   : > { %v2239_v25 = vadd.f32 %v2238_v26, %v2237_v18  ;;  %v2874_v51 = vpop.f32.mrf.mxu1  ;;  %8890 = vmatprep.subr.mxu0 %v8092_v46 }
 0x4fb   : > { %v2875_v24 = vadd.f32 %v2874_v51, %v2792_v33  ;;  %8877 = vmatprep.mubr.msk.f32.mxu0 %vm671_vm2, %v2569_v22  ;;  %8891 = vmatpush3.msra.mxu0 %v8092_v46  ;;  %v2902_v44 = vadd.f32 %v8091_v28, %v2880_v21  ;;  %v8110_v21 = vld [vmem:[%s9498_s26 + $0xc0] sm:$0xff]  ;;  %v8112_v51 = vld [vmem:[%s9498_s26 + $0xd0] sm:$0xff] }
 0x4fc   : > { %v2240_v54 = vrot.slane %v2239_v25, 1  ;;  %8878 = vmatmul.mubr.msk.f32.gmra.mxu0 %vm671_vm2, %v2570_v17  ;;  %v8887_v39 = vpop.f32.mrf.mxu1  ;;  %8908 = vmatprep.subr.mxu0 %v8118_v19 }
 0x4fd   : > { %v2901_v34 = vadd.f32 %v8091_v28, %v2875_v24  ;;  %v2890_v32 = vadd.f32 %v8887_v39, %v2795_v38  ;;  %v2906_v31 = vmax.f32 %v2902_v44, 0.0 }
 0x4fe   : > { %v2241_v20 = vadd.f32 %v2240_v54, %v2239_v25  ;;  %v2884_v18 = vpop.f32.mrf.mxu1  ;;  %v8113_v54 = vld [vmem:[%s9498_s26 + $0xd8] sm:$0xff] }
 0x4ff   : > { %v2905_v27 = vmax.f32 %v2901_v34, 0.0  ;;  %v2885_v29 = vadd.f32 %v2884_v18, %v2794_v35  ;;  %v2904_v49 = vadd.f32 %v8091_v28, %v2890_v32 }
 0x500   : > { %v2242_v40 = vmul.f32 0.03125, %v2241_v20 }
 0x501   : > { %v2903_v57 = vadd.f32 %v8091_v28, %v2885_v29  ;;  %8892 = vmatprep.mubr.msk.f32.mxu0 %vm671_vm2, %v2905_v27  ;;  %v2908_v22 = vmax.f32 %v2904_v49, 0.0 }
 0x502   : > { %v2245_v46 = vsub.f32 %v2221_v30, %v2242_v40  ;;  %v2246_v26 = vsub.f32 %v2226_v23, %v2242_v40  ;;  %8893 = vmatmul.mubr.msk.f32.vlgmr.msra.gmra.mxu0 %vm671_vm2, %v2906_v31  ;;  %v2243_v41 = vsub.f32 %v9968_v45, %v2242_v40  ;;  %v2244_v36 = vsub.f32 %v9966_v50, %v2242_v40  ;;  %v8111_v50 = vld [vmem:[%s9498_s26 + $0xc8] sm:$0xff] }
 0x503   : > { %v2907_v37 = vmax.f32 %v2903_v57, 0.0  ;;  %8909 = vmatpush3.msra.mxu0 %v8118_v19 }
 0x504   : > { %v2249_v33 = vmul.f32 %v2245_v46, %v2245_v46  ;;  %v2247_v25 = vmul.f32 %v2243_v41, %v2243_v41  ;;  %v2248_v28 = vmul.f32 %v2244_v36, %v2244_v36  ;;  %v2250_v23 = vmul.f32 %v2246_v26, %v2246_v26 }
 0x505   : > { %8895 = vmatprep.mubr.msk.f32.mxu0 %vm671_vm2, %v2907_v37 }
 0x506   : > { %8896 = vmatmul.mubr.msk.f32.gmra.mxu0 %vm671_vm2, %v2908_v22  ;;  %v2251_v30 = vsel %vm549_vm0, %v2247_v25, 0.0  ;;  %v2252_v45 = vsel %vm549_vm0, %v2248_v28, 0.0  ;;  %v2254_v19 = vsel %vm549_vm0, %v2249_v33, 0.0  ;;  %v2256_v24 = vsel %vm549_vm0, %v2250_v23, 0.0  ;;  %v8102_v23 = vld [vmem:[%s9631_s28 + $0x58] sm:$0x3] }
 0x507   : > { %8910 = vmatprep.mubr.msk.f32.mxu0 %vm549_vm0, %v8110_v21  ;;  %v2253_v17 = vadd.f32 %v2252_v45, %v2251_v30  ;;  %8898 = vmatprep.subr.msk.mxu1 %vm684_vm1, %v8102_v23  ;;  %v8101_v30 = vld [vmem:[%s9631_s28 + $0x50] sm:$0xff] }
 0x508   : > { %8899 = vmatpush3.msk.msra.mxu1 %vm684_vm1, %v8102_v23 }
 0x509   : > { %v2255_v38 = vadd.f32 %v2254_v19, %v2253_v17  ;;  %8900 = vmatprep.subr.mxu1 %v8101_v30  ;;  %v8069_v17 = vld [vmem:[%s9677_s16 + $0x4] ss:$0 sm:$0xff] }
 0x50a   : > { %8911 = vmatmul.mubr.msk.f32.vlgmr.msra.gmra.mxu0 %vm549_vm0, %v8111_v50  ;;  %8901 = vmatpush3.msra.mxu1 %v8101_v30 }
 0x50b   : > { %8913 = vmatprep.mubr.msk.f32.mxu0 %vm549_vm0, %v8112_v51  ;;  %v2257_v44 = vadd.f32 %v2256_v24, %v2255_v38 }
 0x50d   : > { %v2258_v39 = vrot.slane %v2257_v44, 4 }
 0x50e   : > { %8914 = vmatmul.mubr.msk.f32.gmra.mxu0 %vm549_vm0, %v8113_v54 }
 0x50f   : > { %v2259_v35 = vadd.f32 %v2258_v39, %v2257_v44 }
 0x511   : > { %v2260_v34 = vrot.slane %v2259_v35, 2 }
 0x513   : > { %v2261_v32 = vadd.f32 %v2260_v34, %v2259_v35 }
 0x515   : > { %v2262_v20 = vrot.slane %v2261_v32, 1 }
 0x517   : > { %v2263_v18 = vadd.f32 %v2262_v20, %v2261_v32 }
 0x519   : > { %v2264_v27 = vmul.f32 0.032258064, %v2263_v18  ;;  %v8095_v18 = vld [vmem:[%s9643_s29 + $0x5] ss:$0 sm:$0xff] }
 0x51b   : > { %9259 = vrsqrt.f32 %v2264_v27  ;;  %vm2267_vm11 = vcmp.eq.f32.partialorder %v2264_v27, inf  ;;  %v2270_v31 = vand.u32 2147483648, %v2264_v27  ;;  %vm2269_vm12 = vcmp.eq.f32.partialorder %v2264_v27, 0.0 }
 0x528   : > { %v9260_v29 = vpop.eup %9259 }
 0x529   : > { %v2266_v40 = vmul.f32 %v9260_v29, %v2264_v27 }
 0x52b   : > { %v2268_v49 = vsel %vm2267_vm11, %v2264_v27, %v2266_v40 }
 0x52c   : > { %v2271_v57 = vsel %vm2269_vm12, %v2270_v31, %v2268_v49  ;;  %vm4106_vm12 = vcmask 523712  }
 0x52d   : > { %v2272_v37 = vadd.f32 1e-05, %v2271_v57 }
 0x52f   : > { %9261 = vrcp.f32 %v2272_v37 }
 0x53c   : > { %v9262_v33 = vpop.eup %9261 }
 0x53d   : > { %v2275_v22 = vmul.f32 %v9262_v33, %v2244_v36  ;;  %v2274_v21 = vmul.f32 %v9262_v33, %v2243_v41  ;;  %v2277_v25 = vmul.f32 %v9262_v33, %v2246_v26  ;;  %v2276_v28 = vmul.f32 %v9262_v33, %v2245_v46  ;;  %v8128_v41 = vld [vmem:[%s9561_s25 + $0x68] sm:$0x3] }
 0x53e   : > { %8916 = vmatprep.subr.msk.mxu1 %vm684_vm1, %v8128_v41 }
 0x53f   : > { %2284 = vrot.lane.b32.xlu1 %v2275_v22, %s9376_s23  ;;  %2282 = vrot.lane.b32.xlu0 %v2274_v21, %s9376_s23 }
 0x543   : > { %2288 = vrot.lane.b32.xlu1 %v2277_v25, %s9376_s23  ;;  %2286 = vrot.lane.b32.xlu0 %v2276_v28, %s9376_s23  ;;  %v8120_v25 = vld [vmem:[%s9603_s14 + $0x6] ss:$0 sm:$0xff]  ;;  %s9377_s23 = smov 32  }
 0x5b1   : > { %v2285_v26 = vpop.permute.xlu1 %2284  ;;  %v2283_v36 = vpop.permute.xlu0 %2282 }
 0x5b2   : > { %2296 = vst.msk [vmem:[%s9729_s22 + $0x8] sm:$0xff] %vm2294_vm13, %v2285_v26  ;;  %2295 = vst.msk [vmem:[%s9729_s22] sm:$0xff] %vm2294_vm13, %v2283_v36  ;;  %v3246_v36 = vmul.f32 %v8120_v25, %v9812_v42  ;;  %v3248_v42 = vmul.f32 %v8120_v25, %v9818_v47 }
 0x5b5   : > { %v2289_v46 = vpop.permute.xlu1 %2288  ;;  %v2287_v45 = vpop.permute.xlu0 %2286 }
 0x5b6   : > { %2298 = vst.msk [vmem:[%s9729_s22 + $0x18] sm:$0xff] %vm2294_vm13, %v2289_v46  ;;  %2297 = vst.msk [vmem:[%s9729_s22 + $0x10] sm:$0xff] %vm2294_vm13, %v2287_v45  ;;  %v8127_v45 = vld [vmem:[%s9561_s25 + $0x60] sm:$0xff] }
 0x5b8   : > { %v8876_v50 = vpop.f32.mrf.mxu0 }
 0x5b9   : > { %v10019_v51 = vadd.f32 %v8876_v50, %v8069_v17 }
 0x5ba   : > { %v2663_v19 = vpop.f32.mrf.mxu0 }
 0x5bb   : > { %v10021_v38 = vadd.f32 %v8069_v17, %v2663_v19  ;;  %v2683_v39 = vsel %vm549_vm0, %v10019_v51, 0.0  ;;  %v3245_v19 = vmul.f32 %v8120_v25, %v9814_v43 }
 0x5bc   : > { %v8879_v24 = vpop.f32.mrf.mxu0 }
 0x5bd   : > { %v2682_v54 = vsel %vm549_vm0, %v10021_v38, 0.0  ;;  %v2679_v35 = vadd.f32 %v8879_v24, %v8069_v17 }
 0x5be   : > { %v2673_v44 = vpop.f32.mrf.mxu0  ;;  %v2684_v32 = vadd.f32 %v2683_v39, %v2682_v54  ;;  %v8153_v39 = vld [vmem:[%s9508_s17 + $0x38] sm:$0xff] }
 0x5bf   : > { %v2674_v34 = vadd.f32 %v8069_v17, %v2673_v44  ;;  %v2687_v40 = vsel %vm549_vm0, %v2679_v35, 0.0  ;;  %v8126_v44 = vld [vmem:[%s9610_s24 + $0x6] ss:$0 sm:$0xff] }
 0x5c1   : > { %v2685_v20 = vsel %vm549_vm0, %v2674_v34, 0.0 }
 0x5c2   : > { %v2686_v27 = vadd.f32 %v2685_v20, %v2684_v32  ;;  %v8894_v29 = vpop.f32.mrf.mxu0 }
 0x5c3   : > { %v3007_v49 = vadd.f32 %v8894_v29, %v8095_v18 }
 0x5c4   : > { %v2688_v31 = vadd.f32 %v2687_v40, %v2686_v27  ;;  %v3001_v57 = vpop.f32.mrf.mxu0 }
 0x5c5   : > { %v3002_v37 = vadd.f32 %v8095_v18, %v3001_v57  ;;  %v3021_v23 = vmax.f32 %v3007_v49, 0.0 }
 0x5c6   : > { %v2689_v33 = vrot.slane %v2688_v31, 4  ;;  %v8897_v22 = vpop.f32.mrf.mxu0 }
 0x5c7   : > { %v3020_v21 = vmax.f32 %v3002_v37, 0.0  ;;  %v3017_v30 = vadd.f32 %v8897_v22, %v8095_v18 }
 0x5c8   : > { %v2690_v28 = vadd.f32 %v2689_v33, %v2688_v31  ;;  %v3011_v26 = vpop.f32.mrf.mxu0  ;;  %v3247_v31 = vmul.f32 %v8120_v25, %v9820_v48 }
 0x5c9   : > { %v3012_v46 = vadd.f32 %v8095_v18, %v3011_v26  ;;  %8902 = vmatprep.mubr.msk.f32.mxu1 %vm671_vm2, %v3020_v21  ;;  %v3023_v20 = vmax.f32 %v3017_v30, 0.0 }
 0x5ca   : > { %v2691_v50 = vrot.slane %v2690_v28, 2  ;;  %8903 = vmatmul.mubr.msk.f32.vlgmr.msra.gmra.mxu1 %vm671_vm2, %v3021_v23  ;;  %v8912_v17 = vpop.f32.mrf.mxu0 }
 0x5cb   : > { %v3022_v24 = vmax.f32 %v3012_v46, 0.0  ;;  %v3333_v54 = vadd.f32 %v8912_v17, %v3246_v36  ;;  %8917 = vmatpush3.msk.msra.mxu1 %vm684_vm1, %v8128_v41 }
 0x5cc   : > { %v2692_v32 = vadd.f32 %v2691_v50, %v2690_v28  ;;  %v3327_v27 = vpop.f32.mrf.mxu0  ;;  %8918 = vmatprep.subr.mxu1 %v8127_v45  ;;  %v8145_v50 = vld [vmem:[%s9498_s26 + $0xe0] sm:$0xff] }
 0x5cd   : > { %v3328_v18 = vadd.f32 %v3327_v27, %v3245_v19  ;;  %8905 = vmatprep.mubr.msk.f32.mxu1 %vm671_vm2, %v3022_v24  ;;  %8919 = vmatpush3.msra.mxu1 %v8127_v45  ;;  %v3355_v40 = vadd.f32 %v8126_v44, %v3333_v54 }
 0x5ce   : > { %v2693_v29 = vrot.slane %v2692_v32, 1  ;;  %8906 = vmatmul.mubr.msk.f32.gmra.mxu1 %vm671_vm2, %v3023_v20  ;;  %v8915_v43 = vpop.f32.mrf.mxu0  ;;  %8936 = vmatprep.subr.mxu1 %v8153_v39  ;;  %v8148_v20 = vld [vmem:[%s9498_s26 + $0xf8] sm:$0xff] }
 0x5cf   : > { %v3354_v41 = vadd.f32 %v8126_v44, %v3328_v18  ;;  %v3343_v49 = vadd.f32 %v8915_v43, %v3248_v42  ;;  %v3359_v21 = vmax.f32 %v3355_v40, 0.0 }
 0x5d0   : > { %v2694_v57 = vadd.f32 %v2693_v29, %v2692_v32  ;;  %v3337_v37 = vpop.f32.mrf.mxu0 }
 0x5d1   : > { %v3358_v33 = vmax.f32 %v3354_v41, 0.0  ;;  %v3338_v22 = vadd.f32 %v3337_v37, %v3247_v31  ;;  %v3357_v28 = vadd.f32 %v8126_v44, %v3343_v49 }
 0x5d2   : > { %v2695_v47 = vmul.f32 0.03125, %v2694_v57 }
 0x5d3   : > { %v3356_v23 = vadd.f32 %v8126_v44, %v3338_v22  ;;  %8920 = vmatprep.mubr.msk.f32.mxu1 %vm671_vm2, %v3358_v33  ;;  %v3361_v45 = vmax.f32 %v3357_v28, 0.0  ;;  %v8147_v44 = vld [vmem:[%s9498_s26 + $0xf0] sm:$0xff] }
 0x5d4   : > { %v2698_v30 = vsub.f32 %v2674_v34, %v2695_v47  ;;  %v2699_v26 = vsub.f32 %v2679_v35, %v2695_v47  ;;  %8921 = vmatmul.mubr.msk.f32.vlgmr.msra.gmra.mxu1 %vm671_vm2, %v3359_v21  ;;  %v2696_v48 = vsub.f32 %v10021_v38, %v2695_v47  ;;  %v2697_v25 = vsub.f32 %v10019_v51, %v2695_v47  ;;  %v8146_v51 = vld [vmem:[%s9498_s26 + $0xe8] sm:$0xff] }
 0x5d5   : > { %v3360_v36 = vmax.f32 %v3356_v23, 0.0  ;;  %8937 = vmatpush3.msra.mxu1 %v8153_v39 }
 0x5d6   : > { %v2702_v46 = vmul.f32 %v2698_v30, %v2698_v30  ;;  %v2700_v17 = vmul.f32 %v2696_v48, %v2696_v48  ;;  %v2701_v19 = vmul.f32 %v2697_v25, %v2697_v25  ;;  %v2703_v35 = vmul.f32 %v2699_v26, %v2699_v26 }
 0x5d7   : > { %8923 = vmatprep.mubr.msk.f32.mxu1 %vm671_vm2, %v3360_v36 }
 0x5d8   : > { %8924 = vmatmul.mubr.msk.f32.gmra.mxu1 %vm671_vm2, %v3361_v45  ;;  %v2704_v34 = vsel %vm549_vm0, %v2700_v17, 0.0  ;;  %v2705_v38 = vsel %vm549_vm0, %v2701_v19, 0.0  ;;  %v2707_v54 = vsel %vm549_vm0, %v2702_v46, 0.0  ;;  %v2709_v32 = vsel %vm549_vm0, %v2703_v35, 0.0  ;;  %v8137_v45 = vld [vmem:[%s9631_s28 + $0x68] sm:$0x3] }
 0x5d9   : > { %8938 = vmatprep.mubr.msk.f32.mxu1 %vm549_vm0, %v8145_v50  ;;  %v2706_v24 = vadd.f32 %v2705_v38, %v2704_v34  ;;  %8926 = vmatprep.subr.msk.mxu0 %vm684_vm1, %v8137_v45  ;;  %v8136_v50 = vld [vmem:[%s9631_s28 + $0x60] sm:$0xff] }
 0x5da   : > { %8927 = vmatpush3.msk.msra.mxu0 %vm684_vm1, %v8137_v45  ;;  %v8104_v35 = vld [vmem:[%s9677_s16 + $0x5] ss:$0 sm:$0xff] }
 0x5db   : > { %v2708_v39 = vadd.f32 %v2707_v54, %v2706_v24  ;;  %8928 = vmatprep.subr.mxu0 %v8136_v50 }
 0x5dc   : > { %8939 = vmatmul.mubr.msk.f32.vlgmr.msra.gmra.mxu1 %vm549_vm0, %v8146_v51  ;;  %8929 = vmatpush3.msra.mxu0 %v8136_v50  ;;  %v8162_v50 = vld [vmem:[%s9561_s25 + $0x70] sm:$0xff] }
 0x5dd   : > { %8941 = vmatprep.mubr.msk.f32.mxu1 %vm549_vm0, %v8147_v44  ;;  %v2710_v27 = vadd.f32 %v2709_v32, %v2708_v39 }
 0x5df   : > { %v2711_v42 = vrot.slane %v2710_v27, 4 }
 0x5e0   : > { %8942 = vmatmul.mubr.msk.f32.gmra.mxu1 %vm549_vm0, %v8148_v20 }
 0x5e1   : > { %v2712_v18 = vadd.f32 %v2711_v42, %v2710_v27 }
 0x5e3   : > { %v2713_v29 = vrot.slane %v2712_v18, 2 }
 0x5e5   : > { %v2714_v40 = vadd.f32 %v2713_v29, %v2712_v18  ;;  %v8130_v18 = vld [vmem:[%s9643_s29 + $0x6] ss:$0 sm:$0xff] }
 0x5e7   : > { %v2715_v43 = vrot.slane %v2714_v40, 1 }
 0x5e9   : > { %v2716_v31 = vadd.f32 %v2715_v43, %v2714_v40 }
 0x5eb   : > { %v2717_v41 = vmul.f32 0.032258064, %v2716_v31 }
 0x5ed   : > { %9263 = vrsqrt.f32 %v2717_v41  ;;  %vm2720_vm14 = vcmp.eq.f32.partialorder %v2717_v41, inf  ;;  %v2723_v37 = vand.u32 2147483648, %v2717_v41  ;;  %vm2722_vm15 = vcmp.eq.f32.partialorder %v2717_v41, 0.0 }
 0x5fa   : > { %v9264_v49 = vpop.eup %9263 }
 0x5fb   : > { %v2719_v57 = vmul.f32 %v9264_v49, %v2717_v41 }
 0x5fd   : > { %v2721_v33 = vsel %vm2720_vm14, %v2717_v41, %v2719_v57 }
 0x5fe   : > { %v2724_v22 = vsel %vm2722_vm15, %v2723_v37, %v2721_v33  ;;  %vm4559_vm15 = vcmask 589312  }
 0x5ff   : > { %v2725_v47 = vadd.f32 1e-05, %v2724_v22 }
 0x601   : > { %9265 = vrcp.f32 %v2725_v47  ;;  %v8155_v47 = vld [vmem:[%s9603_s14 + $0x7] ss:$0 sm:$0xff] }
 0x60e   : > { %v9266_v21 = vpop.eup %9265 }
 0x60f   : > { %v2728_v28 = vmul.f32 %v9266_v21, %v2697_v25  ;;  %v2727_v23 = vmul.f32 %v9266_v21, %v2696_v48  ;;  %v2730_v36 = vmul.f32 %v9266_v21, %v2699_v26  ;;  %v2729_v46 = vmul.f32 %v9266_v21, %v2698_v30  ;;  %v8163_v48 = vld [vmem:[%s9561_s25 + $0x78] sm:$0x3] }
 0x610   : > { %8944 = vmatprep.subr.msk.mxu0 %vm684_vm1, %v8163_v48 }
 0x611   : > { %2737 = vrot.lane.b32.xlu1 %v2728_v28, %s9377_s23  ;;  %2735 = vrot.lane.b32.xlu0 %v2727_v23, %s9377_s23 }
 0x615   : > { %2741 = vrot.lane.b32.xlu1 %v2730_v36, %s9377_s23  ;;  %2739 = vrot.lane.b32.xlu0 %v2729_v46, %s9377_s23  ;;  %v3699_v46 = vmul.f32 %v8155_v47, %v9828_v52  ;;  %v3701_v52 = vmul.f32 %v8155_v47, %v9834_v55  ;;  %s9378_s23 = smov 40  }
 0x683   : > { %v2738_v26 = vpop.permute.xlu1 %2737  ;;  %v2736_v25 = vpop.permute.xlu0 %2735 }
 0x684   : > { %2749 = vst.msk [vmem:[%s9729_s22 + $0x8] sm:$0xff] %vm2747_vm3, %v2738_v26  ;;  %2748 = vst.msk [vmem:[%s9729_s22] sm:$0xff] %vm2747_vm3, %v2736_v25 }
 0x687   : > { %v2742_v30 = vpop.permute.xlu1 %2741  ;;  %v2740_v17 = vpop.permute.xlu0 %2739 }
 0x688   : > { %2751 = vst.msk [vmem:[%s9729_s22 + $0x18] sm:$0xff] %vm2747_vm3, %v2742_v30  ;;  %2750 = vst.msk [vmem:[%s9729_s22 + $0x10] sm:$0xff] %vm2747_vm3, %v2740_v17  ;;  %v3698_v30 = vmul.f32 %v8155_v47, %v9830_v53 }
 0x68a   : > { %v8904_v19 = vpop.f32.mrf.mxu1 }
 0x68b   : > { %v10072_v38 = vadd.f32 %v8904_v19, %v8104_v35 }
 0x68c   : > { %v3116_v34 = vpop.f32.mrf.mxu1 }
 0x68d   : > { %v10074_v51 = vadd.f32 %v8104_v35, %v3116_v34  ;;  %v3136_v39 = vsel %vm549_vm0, %v10072_v38, 0.0  ;;  %v8188_v34 = vld [vmem:[%s9508_s17 + $0x40] sm:$0xff] }
 0x68e   : > { %v8907_v24 = vpop.f32.mrf.mxu1 }
 0x68f   : > { %v3135_v54 = vsel %vm549_vm0, %v10074_v51, 0.0  ;;  %v3132_v32 = vadd.f32 %v8907_v24, %v8104_v35 }
 0x690   : > { %v3126_v44 = vpop.f32.mrf.mxu1  ;;  %v3137_v27 = vadd.f32 %v3136_v39, %v3135_v54 }
 0x691   : > { %v3127_v20 = vadd.f32 %v8104_v35, %v3126_v44  ;;  %v3140_v43 = vsel %vm549_vm0, %v3132_v32, 0.0  ;;  %v8161_v35 = vld [vmem:[%s9610_s24 + $0x7] ss:$0 sm:$0xff] }
 0x693   : > { %v3138_v42 = vsel %vm549_vm0, %v3127_v20, 0.0 }
 0x694   : > { %v3139_v29 = vadd.f32 %v3138_v42, %v3137_v27  ;;  %v8922_v40 = vpop.f32.mrf.mxu1 }
 0x695   : > { %v3460_v41 = vadd.f32 %v8922_v40, %v8130_v18 }
 0x696   : > { %v3141_v31 = vadd.f32 %v3140_v43, %v3139_v29  ;;  %v3454_v49 = vpop.f32.mrf.mxu1 }
 0x697   : > { %v3455_v57 = vadd.f32 %v8130_v18, %v3454_v49  ;;  %v3474_v28 = vmax.f32 %v3460_v41, 0.0 }
 0x698   : > { %v3142_v37 = vrot.slane %v3141_v31, 4  ;;  %v8925_v33 = vpop.f32.mrf.mxu1 }
 0x699   : > { %v3473_v22 = vmax.f32 %v3455_v57, 0.0  ;;  %v3470_v23 = vadd.f32 %v8925_v33, %v8130_v18 }
 0x69a   : > { %v3143_v21 = vadd.f32 %v3142_v37, %v3141_v31  ;;  %v3464_v36 = vpop.f32.mrf.mxu1 }
 0x69b   : > { %v3465_v45 = vadd.f32 %v8130_v18, %v3464_v36  ;;  %8930 = vmatprep.mubr.msk.f32.mxu0 %vm671_vm2, %v3473_v22  ;;  %v3476_v54 = vmax.f32 %v3470_v23, 0.0  ;;  %v3700_v18 = vmul.f32 %v8155_v47, %v9836_v56  ;;  %v8180_v36 = vld [vmem:[%s9498_s26 + $0x100] sm:$0xff] }
 0x69c   : > { %v3144_v26 = vrot.slane %v3143_v21, 2  ;;  %8931 = vmatmul.mubr.msk.f32.vlgmr.msra.gmra.mxu0 %vm671_vm2, %v3474_v28  ;;  %v8940_v25 = vpop.f32.mrf.mxu1 }
 0x69d   : > { %v3475_v17 = vmax.f32 %v3465_v45, 0.0  ;;  %v3786_v19 = vadd.f32 %v8940_v25, %v3699_v46  ;;  %8945 = vmatpush3.msk.msra.mxu0 %vm684_vm1, %v8163_v48  ;;  %v8182_v25 = vld [vmem:[%s9498_s26 + $0x110] sm:$0xff] }
 0x69e   : > { %v3145_v24 = vadd.f32 %v3144_v26, %v3143_v21  ;;  %v3780_v44 = vpop.f32.mrf.mxu1  ;;  %8946 = vmatprep.subr.mxu0 %v8162_v50 }
 0x69f   : > { %v3781_v39 = vadd.f32 %v3780_v44, %v3698_v30  ;;  %8933 = vmatprep.mubr.msk.f32.mxu0 %vm671_vm2, %v3475_v17  ;;  %8947 = vmatpush3.msra.mxu0 %v8162_v50  ;;  %v3808_v42 = vadd.f32 %v8161_v35, %v3786_v19  ;;  %v8183_v19 = vld [vmem:[%s9498_s26 + $0x118] sm:$0xff] }
 0x6a0   : > { %v3146_v27 = vrot.slane %v3145_v24, 1  ;;  %8934 = vmatmul.mubr.msk.f32.gmra.mxu0 %vm671_vm2, %v3476_v54  ;;  %v8943_v53 = vpop.f32.mrf.mxu1  ;;  %8964 = vmatprep.subr.mxu0 %v8188_v34 }
 0x6a1   : > { %v3807_v48 = vadd.f32 %v8161_v35, %v3781_v39  ;;  %v3796_v29 = vadd.f32 %v8943_v53, %v3701_v52  ;;  %v3812_v49 = vmax.f32 %v3808_v42, 0.0 }
 0x6a2   : > { %v3147_v40 = vadd.f32 %v3146_v27, %v3145_v24  ;;  %v3790_v43 = vpop.f32.mrf.mxu1 }
 0x6a3   : > { %v3811_v31 = vmax.f32 %v3807_v48, 0.0  ;;  %v3791_v41 = vadd.f32 %v3790_v43, %v3700_v18  ;;  %v3810_v57 = vadd.f32 %v8161_v35, %v3796_v29 }
 0x6a4   : > { %v3148_v55 = vmul.f32 0.03125, %v3147_v40 }
 0x6a5   : > { %v3809_v37 = vadd.f32 %v8161_v35, %v3791_v41  ;;  %8948 = vmatprep.mubr.msk.f32.mxu0 %vm671_vm2, %v3811_v31  ;;  %v3814_v23 = vmax.f32 %v3810_v57, 0.0  ;;  %v8172_v57 = vld [vmem:[%s9631_s28 + $0x78] sm:$0x3] }
 0x6a6   : > { %v3151_v33 = vsub.f32 %v3127_v20, %v3148_v55  ;;  %v3152_v22 = vsub.f32 %v3132_v32, %v3148_v55  ;;  %8949 = vmatmul.mubr.msk.f32.vlgmr.msra.gmra.mxu0 %vm671_vm2, %v3812_v49  ;;  %v3149_v56 = vsub.f32 %v10074_v51, %v3148_v55  ;;  %v3150_v47 = vsub.f32 %v10072_v38, %v3148_v55  ;;  %v8181_v38 = vld [vmem:[%s9498_s26 + $0x108] sm:$0xff] }
 0x6a7   : > { %v3813_v21 = vmax.f32 %v3809_v37, 0.0  ;;  %8965 = vmatpush3.msra.mxu0 %v8188_v34  ;;  %8954 = vmatprep.subr.msk.mxu1 %vm684_vm1, %v8172_v57  ;;  %v8171_v37 = vld [vmem:[%s9631_s28 + $0x70] sm:$0xff] }
 0x6a8   : > { %v3155_v28 = vmul.f32 %v3151_v33, %v3151_v33  ;;  %v3153_v46 = vmul.f32 %v3149_v56, %v3149_v56  ;;  %v3154_v45 = vmul.f32 %v3150_v47, %v3150_v47  ;;  %v3156_v32 = vmul.f32 %v3152_v22, %v3152_v22  ;;  %8955 = vmatpush3.msk.msra.mxu1 %vm684_vm1, %v8172_v57 }
 0x6a9   : > { %8951 = vmatprep.mubr.msk.f32.mxu0 %vm671_vm2, %v3813_v21  ;;  %8956 = vmatprep.subr.mxu1 %v8171_v37 }
 0x6aa   : > { %8952 = vmatmul.mubr.msk.f32.gmra.mxu0 %vm671_vm2, %v3814_v23  ;;  %v3157_v20 = vsel %vm549_vm0, %v3153_v46, 0.0  ;;  %v3158_v51 = vsel %vm549_vm0, %v3154_v45, 0.0  ;;  %v3160_v26 = vsel %vm549_vm0, %v3155_v28, 0.0  ;;  %v3162_v17 = vsel %vm549_vm0, %v3156_v32, 0.0  ;;  %8957 = vmatpush3.msra.mxu1 %v8171_v37  ;;  %v8139_v23 = vld [vmem:[%s9677_s16 + $0x6] ss:$0 sm:$0xff] }
 0x6ab   : > { %8966 = vmatprep.mubr.msk.f32.mxu0 %vm549_vm0, %v8180_v36  ;;  %v3159_v50 = vadd.f32 %v3158_v51, %v3157_v20 }
 0x6ad   : > { %v3161_v30 = vadd.f32 %v3160_v26, %v3159_v50 }
 0x6ae   : > { %8967 = vmatmul.mubr.msk.f32.vlgmr.msra.gmra.mxu0 %vm549_vm0, %v8181_v38 }
 0x6af   : > { %8969 = vmatprep.mubr.msk.f32.mxu0 %vm549_vm0, %v8182_v25  ;;  %v3163_v35 = vadd.f32 %v3162_v17, %v3161_v30  ;;  %v8165_v17 = vld [vmem:[%s9643_s29 + $0x7] ss:$0 sm:$0xff] }
 0x6b1   : > { %v3164_v34 = vrot.slane %v3163_v35, 4 }
 0x6b2   : > { %8970 = vmatmul.mubr.msk.f32.gmra.mxu0 %vm549_vm0, %v8183_v19 }
 0x6b3   : > { %v3165_v24 = vadd.f32 %v3164_v34, %v3163_v35 }
 0x6b5   : > { %v3166_v54 = vrot.slane %v3165_v24, 2 }
 0x6b7   : > { %v3167_v44 = vadd.f32 %v3166_v54, %v3165_v24 }
 0x6b9   : > { %v3168_v52 = vrot.slane %v3167_v44, 1 }
 0x6bb   : > { %v3169_v39 = vadd.f32 %v3168_v52, %v3167_v44 }
 0x6bd   : > { %v3170_v27 = vmul.f32 0.032258064, %v3169_v39 }
 0x6bf   : > { %9267 = vrsqrt.f32 %v3170_v27  ;;  %vm3173_vm4 = vcmp.eq.f32.partialorder %v3170_v27, inf  ;;  %v3176_v18 = vand.u32 2147483648, %v3170_v27  ;;  %vm3175_vm5 = vcmp.eq.f32.partialorder %v3170_v27, 0.0 }
 0x6cc   : > { %v9268_v42 = vpop.eup %9267 }
 0x6cd   : > { %v3172_v53 = vmul.f32 %v9268_v42, %v3170_v27 }
 0x6cf   : > { %v3174_v48 = vsel %vm3173_vm4, %v3170_v27, %v3172_v53  ;;  %v8190_v53 = vld [vmem:[%s9603_s14 + $0x8] ss:$0 sm:$0xff] }
 0x6d0   : > { %v3177_v29 = vsel %vm3175_vm5, %v3176_v18, %v3174_v48  ;;  %v4151_v57 = vmul.f32 %v8190_v53, %v9845_v59  ;;  %vm5012_vm5 = vcmask 654912  }
 0x6d1   : > { %v3178_v40 = vadd.f32 1e-05, %v3177_v29 }
 0x6d3   : > { %9269 = vrcp.f32 %v3178_v40 }
 0x6e0   : > { %v9270_v43 = vpop.eup %9269 }
 0x6e1   : > { %v3181_v31 = vmul.f32 %v9270_v43, %v3150_v47  ;;  %v3180_v41 = vmul.f32 %v9270_v43, %v3149_v56  ;;  %v3183_v55 = vmul.f32 %v9270_v43, %v3152_v22  ;;  %v3182_v49 = vmul.f32 %v9270_v43, %v3151_v33  ;;  %v8198_v56 = vld [vmem:[%s9561_s25 + $0x88] sm:$0x3] }
 0x6e2   : > { %8972 = vmatprep.subr.msk.mxu1 %vm684_vm1, %v8198_v56  ;;  %v4152_v43 = vmul.f32 %v8190_v53, %v9843_v58  ;;  %v4154_v58 = vmul.f32 %v8190_v53, %v9847_v60 }
 0x6e3   : > { %3190 = vrot.lane.b32.xlu1 %v3181_v31, %s9378_s23  ;;  %3188 = vrot.lane.b32.xlu0 %v3180_v41, %s9378_s23  ;;  %v8197_v41 = vld [vmem:[%s9561_s25 + $0x80] sm:$0xff] }
 0x6e7   : > { %3194 = vrot.lane.b32.xlu1 %v3183_v55, %s9378_s23  ;;  %3192 = vrot.lane.b32.xlu0 %v3182_v49, %s9378_s23  ;;  %s9379_s23 = smov 48  }
 0x755   : > { %v3191_v22 = vpop.permute.xlu1 %3190  ;;  %v3189_v47 = vpop.permute.xlu0 %3188 }
 0x756   : > { %3202 = vst.msk [vmem:[%s9729_s22 + $0x8] sm:$0xff] %vm3200_vm6, %v3191_v22  ;;  %3201 = vst.msk [vmem:[%s9729_s22] sm:$0xff] %vm3200_vm6, %v3189_v47  ;;  %v8196_v47 = vld [vmem:[%s9610_s24 + $0x8] ss:$0 sm:$0xff] }
 0x759   : > { %v3195_v33 = vpop.permute.xlu1 %3194  ;;  %v3193_v21 = vpop.permute.xlu0 %3192 }
 0x75a   : > { %3204 = vst.msk [vmem:[%s9729_s22 + $0x18] sm:$0xff] %vm3200_vm6, %v3195_v33  ;;  %3203 = vst.msk [vmem:[%s9729_s22 + $0x10] sm:$0xff] %vm3200_vm6, %v3193_v21  ;;  %v8223_v33 = vld [vmem:[%s9508_s17 + $0x48] sm:$0xff] }
 0x75c   : > { %v8932_v28 = vpop.f32.mrf.mxu0 }
 0x75d   : > { %v10125_v46 = vadd.f32 %v8932_v28, %v8139_v23 }
 0x75e   : > { %v3569_v36 = vpop.f32.mrf.mxu0 }
 0x75f   : > { %v10127_v45 = vadd.f32 %v8139_v23, %v3569_v36  ;;  %v3589_v38 = vsel %vm549_vm0, %v10125_v46, 0.0 }
 0x760   : > { %v8935_v32 = vpop.f32.mrf.mxu0 }
 0x761   : > { %v3588_v20 = vsel %vm549_vm0, %v10127_v45, 0.0  ;;  %v3585_v50 = vadd.f32 %v8935_v32, %v8139_v23 }
 0x762   : > { %v3579_v51 = vpop.f32.mrf.mxu0  ;;  %v3590_v25 = vadd.f32 %v3589_v38, %v3588_v20 }
 0x763   : > { %v3580_v26 = vadd.f32 %v8139_v23, %v3579_v51  ;;  %v3593_v34 = vsel %vm549_vm0, %v3585_v50, 0.0  ;;  %v4153_v51 = vmul.f32 %v8190_v53, %v9849_v61  ;;  %v8215_v53 = vld [vmem:[%s9498_s26 + $0x120] sm:$0xff] }
 0x765   : > { %v3591_v30 = vsel %vm549_vm0, %v3580_v26, 0.0 }
 0x766   : > { %v3592_v19 = vadd.f32 %v3591_v30, %v3590_v25  ;;  %v8950_v35 = vpop.f32.mrf.mxu0 }
 0x767   : > { %v3913_v54 = vadd.f32 %v8950_v35, %v8165_v17 }
 0x768   : > { %v3594_v24 = vadd.f32 %v3593_v34, %v3592_v19  ;;  %v3907_v44 = vpop.f32.mrf.mxu0 }
 0x769   : > { %v3908_v52 = vadd.f32 %v8165_v17, %v3907_v44  ;;  %v3927_v48 = vmax.f32 %v3913_v54, 0.0 }
 0x76a   : > { %v3595_v39 = vrot.slane %v3594_v24, 4  ;;  %v8953_v27 = vpop.f32.mrf.mxu0 }
 0x76b   : > { %v3926_v42 = vmax.f32 %v3908_v52, 0.0  ;;  %v3923_v29 = vadd.f32 %v8953_v27, %v8165_v17 }
 0x76c   : > { %v3596_v18 = vadd.f32 %v3595_v39, %v3594_v24  ;;  %v3917_v40 = vpop.f32.mrf.mxu0 }
 0x76d   : > { %v3918_v31 = vadd.f32 %v8165_v17, %v3917_v40  ;;  %8958 = vmatprep.mubr.msk.f32.mxu1 %vm671_vm2, %v3926_v42  ;;  %v3929_v28 = vmax.f32 %v3923_v29, 0.0 }
 0x76e   : > { %v3597_v55 = vrot.slane %v3596_v18, 2  ;;  %8959 = vmatmul.mubr.msk.f32.vlgmr.msra.gmra.mxu1 %vm671_vm2, %v3927_v48  ;;  %v8968_v49 = vpop.f32.mrf.mxu0 }
 0x76f   : > { %v3928_v37 = vmax.f32 %v3918_v31, 0.0  ;;  %v4239_v22 = vadd.f32 %v8968_v49, %v4152_v43  ;;  %8973 = vmatpush3.msk.msra.mxu1 %vm684_vm1, %v8198_v56  ;;  %v8217_v43 = vld [vmem:[%s9498_s26 + $0x130] sm:$0xff] }
 0x770   : > { %v3598_v21 = vadd.f32 %v3597_v55, %v3596_v18  ;;  %v4233_v23 = vpop.f32.mrf.mxu0  ;;  %8974 = vmatprep.subr.mxu1 %v8197_v41  ;;  %v8218_v55 = vld [vmem:[%s9498_s26 + $0x138] sm:$0xff] }
 0x771   : > { %v4234_v36 = vadd.f32 %v4233_v23, %v4151_v57  ;;  %8961 = vmatprep.mubr.msk.f32.mxu1 %vm671_vm2, %v3928_v37  ;;  %8975 = vmatpush3.msra.mxu1 %v8197_v41  ;;  %v4261_v20 = vadd.f32 %v8196_v47, %v4239_v22 }
 0x772   : > { %v3599_v32 = vrot.slane %v3598_v21, 1  ;;  %8962 = vmatmul.mubr.msk.f32.gmra.mxu1 %vm671_vm2, %v3929_v28  ;;  %v8971_v59 = vpop.f32.mrf.mxu0  ;;  %8992 = vmatprep.subr.mxu1 %v8223_v33 }
 0x773   : > { %v4260_v56 = vadd.f32 %v8196_v47, %v4234_v36  ;;  %v4249_v38 = vadd.f32 %v8971_v59, %v4154_v58  ;;  %v4265_v35 = vmax.f32 %v4261_v20, 0.0 }
 0x774   : > { %v3600_v25 = vadd.f32 %v3599_v32, %v3598_v21  ;;  %v4243_v30 = vpop.f32.mrf.mxu0 }
 0x775   : > { %v4264_v17 = vmax.f32 %v4260_v56, 0.0  ;;  %v4244_v19 = vadd.f32 %v4243_v30, %v4153_v51  ;;  %v4263_v34 = vadd.f32 %v8196_v47, %v4249_v38 }
 0x776   : > { %v3601_v60 = vmul.f32 0.03125, %v3600_v25 }
 0x777   : > { %v4262_v24 = vadd.f32 %v8196_v47, %v4244_v19  ;;  %8976 = vmatprep.mubr.msk.f32.mxu1 %vm671_vm2, %v4264_v17  ;;  %v4267_v42 = vmax.f32 %v4263_v34, 0.0  ;;  %v8207_v17 = vld [vmem:[%s9631_s28 + $0x88] sm:$0x3]  ;;  %v8206_v19 = vld [vmem:[%s9631_s28 + $0x80] sm:$0xff] }
 0x778   : > { %v3604_v54 = vsub.f32 %v3580_v26, %v3601_v60  ;;  %v3605_v44 = vsub.f32 %v3585_v50, %v3601_v60  ;;  %8977 = vmatmul.mubr.msk.f32.vlgmr.msra.gmra.mxu1 %vm671_vm2, %v4265_v35  ;;  %v3602_v61 = vsub.f32 %v10127_v45, %v3601_v60  ;;  %v3603_v52 = vsub.f32 %v10125_v46, %v3601_v60  ;;  %v8216_v46 = vld [vmem:[%s9498_s26 + $0x128] sm:$0xff]  ;;  %v8233_v60 = vld [vmem:[%s9561_s25 + $0x98] sm:$0x3] }
 0x779   : > { %v4266_v39 = vmax.f32 %v4262_v24, 0.0  ;;  %8993 = vmatpush3.msra.mxu1 %v8223_v33  ;;  %8982 = vmatprep.subr.msk.mxu0 %vm684_vm1, %v8207_v17 }
 0x77a   : > { %v3608_v27 = vmul.f32 %v3604_v54, %v3604_v54  ;;  %v3606_v18 = vmul.f32 %v3602_v61, %v3602_v61  ;;  %v3607_v48 = vmul.f32 %v3603_v52, %v3603_v52  ;;  %v3609_v50 = vmul.f32 %v3605_v44, %v3605_v44  ;;  %8983 = vmatpush3.msk.msra.mxu0 %vm684_vm1, %v8207_v17  ;;  %v8258_v17 = vld [vmem:[%s9508_s17 + $0x50] sm:$0xff] }
 0x77b   : > { %8979 = vmatprep.mubr.msk.f32.mxu1 %vm671_vm2, %v4266_v39  ;;  %8984 = vmatprep.subr.mxu0 %v8206_v19 }
 0x77c   : > { %8980 = vmatmul.mubr.msk.f32.gmra.mxu1 %vm671_vm2, %v4267_v42  ;;  %v3610_v26 = vsel %vm549_vm0, %v3606_v18, 0.0  ;;  %v3611_v45 = vsel %vm549_vm0, %v3607_v48, 0.0  ;;  %v3613_v40 = vsel %vm549_vm0, %v3608_v27, 0.0  ;;  %v3615_v41 = vsel %vm549_vm0, %v3609_v50, 0.0  ;;  %8985 = vmatpush3.msra.mxu0 %v8206_v19 }
 0x77d   : > { %8994 = vmatprep.mubr.msk.f32.mxu1 %vm549_vm0, %v8215_v53  ;;  %v3612_v29 = vadd.f32 %v3611_v45, %v3610_v26  ;;  %9000 = vmatprep.subr.msk.mxu0 %vm684_vm1, %v8233_v60 }
 0x77f   : > { %v3614_v31 = vadd.f32 %v3613_v40, %v3612_v29  ;;  %v8200_v29 = vld [vmem:[%s9643_s29 + $0x8] ss:$0 sm:$0xff] }
 0x780   : > { %8995 = vmatmul.mubr.msk.f32.vlgmr.msra.gmra.mxu1 %vm549_vm0, %v8216_v46 }
 0x781   : > { %8997 = vmatprep.mubr.msk.f32.mxu1 %vm549_vm0, %v8217_v43  ;;  %v3616_v49 = vadd.f32 %v3615_v41, %v3614_v31 }
 0x783   : > { %v3617_v57 = vrot.slane %v3616_v49, 4 }
 0x784   : > { %8998 = vmatmul.mubr.msk.f32.gmra.mxu1 %vm549_vm0, %v8218_v55 }
 0x785   : > { %v3618_v37 = vadd.f32 %v3617_v57, %v3616_v49 }
 0x787   : > { %v3619_v22 = vrot.slane %v3618_v37, 2 }
 0x789   : > { %v3620_v47 = vadd.f32 %v3619_v22, %v3618_v37  ;;  %v8225_v37 = vld [vmem:[%s9603_s14 + $0x9] ss:$0 sm:$0xff] }
 0x78b   : > { %v3621_v33 = vrot.slane %v3620_v47, 1 }
 0x78d   : > { %v3622_v21 = vadd.f32 %v3621_v33, %v3620_v47 }
 0x78f   : > { %v3623_v28 = vmul.f32 0.032258064, %v3622_v21 }
 0x791   : > { %9271 = vrsqrt.f32 %v3623_v28  ;;  %vm3626_vm7 = vcmp.eq.f32.partialorder %v3623_v28, inf  ;;  %v3629_v36 = vand.u32 2147483648, %v3623_v28  ;;  %vm3628_vm8 = vcmp.eq.f32.partialorder %v3623_v28, 0.0 }
 0x79e   : > { %v9272_v23 = vpop.eup %9271 }
 0x79f   : > { %v3625_v58 = vmul.f32 %v9272_v23, %v3623_v28 }
 0x7a1   : > { %v3627_v32 = vsel %vm3626_vm7, %v3623_v28, %v3625_v58 }
 0x7a2   : > { %v3630_v20 = vsel %vm3628_vm8, %v3629_v36, %v3627_v32  ;;  %v4605_v36 = vmul.f32 %v8225_v37, %v9851_v62  ;;  %v4607_v62 = vmul.f32 %v8225_v37, %v9855_v0  ;;  %vm5465_vm8 = vcmask 720512  }
 0x7a3   : > { %v3631_v59 = vadd.f32 1e-05, %v3630_v20  ;;  %v8232_v20 = vld [vmem:[%s9561_s25 + $0x90] sm:$0xff] }
 0x7a5   : > { %9273 = vrcp.f32 %v3631_v59 }
 0x7b2   : > { %v9274_v51 = vpop.eup %9273 }
 0x7b3   : > { %v3634_v56 = vmul.f32 %v9274_v51, %v3603_v52  ;;  %v3633_v38 = vmul.f32 %v9274_v51, %v3602_v61  ;;  %v3636_v25 = vmul.f32 %v9274_v51, %v3605_v44  ;;  %v3635_v30 = vmul.f32 %v9274_v51, %v3604_v54  ;;  %v8174_v61 = vld [vmem:[%s9677_s16 + $0x7] ss:$0 sm:$0xff] }
 0x7b5   : > { %3643 = vrot.lane.b32.xlu1 %v3634_v56, %s9379_s23  ;;  %3641 = vrot.lane.b32.xlu0 %v3633_v38, %s9379_s23  ;;  %v4604_v56 = vmul.f32 %v8225_v37, %v9853_v63 }
 0x7b9   : > { %3647 = vrot.lane.b32.xlu1 %v3636_v25, %s9379_s23  ;;  %3645 = vrot.lane.b32.xlu0 %v3635_v30, %s9379_s23  ;;  %v8231_v30 = vld [vmem:[%s9610_s24 + $0x9] ss:$0 sm:$0xff]  ;;  %s9380_s23 = smov 56  }
 0x827   : > { %v3644_v35 = vpop.permute.xlu1 %3643  ;;  %v3642_v34 = vpop.permute.xlu0 %3641 }
 0x828   : > { %3655 = vst.msk [vmem:[%s9729_s22 + $0x8] sm:$0xff] %vm3653_vm9, %v3644_v35  ;;  %3654 = vst.msk [vmem:[%s9729_s22] sm:$0xff] %vm3653_vm9, %v3642_v34 }
 0x82b   : > { %v3648_v24 = vpop.permute.xlu1 %3647  ;;  %v3646_v54 = vpop.permute.xlu0 %3645 }
 0x82c   : > { %3657 = vst.msk [vmem:[%s9729_s22 + $0x18] sm:$0xff] %vm3653_vm9, %v3648_v24  ;;  %3656 = vst.msk [vmem:[%s9729_s22 + $0x10] sm:$0xff] %vm3653_vm9, %v3646_v54 }
 0x82e   : > { %v8960_v44 = vpop.f32.mrf.mxu1 }
 0x82f   : > { %v10178_v39 = vadd.f32 %v8960_v44, %v8174_v61 }
 0x830   : > { %v4022_v52 = vpop.f32.mrf.mxu1 }
 0x831   : > { %v10180_v27 = vadd.f32 %v8174_v61, %v4022_v52  ;;  %v4042_v48 = vsel %vm549_vm0, %v10178_v39, 0.0 }
 0x832   : > { %v8963_v42 = vpop.f32.mrf.mxu1 }
 0x833   : > { %v4041_v53 = vsel %vm549_vm0, %v10180_v27, 0.0  ;;  %v4038_v50 = vadd.f32 %v8963_v42, %v8174_v61 }
 0x834   : > { %v4032_v18 = vpop.f32.mrf.mxu1  ;;  %v4043_v45 = vadd.f32 %v4042_v48, %v4041_v53 }
 0x835   : > { %v4033_v26 = vadd.f32 %v8174_v61, %v4032_v18  ;;  %v4046_v31 = vsel %vm549_vm0, %v4038_v50, 0.0  ;;  %v4606_v61 = vmul.f32 %v8225_v37, %v9857_v1 }
 0x837   : > { %v4044_v46 = vsel %vm549_vm0, %v4033_v26, 0.0 }
 0x838   : > { %v4045_v40 = vadd.f32 %v4044_v46, %v4043_v45  ;;  %v8978_v43 = vpop.f32.mrf.mxu1 }
 0x839   : > { %v4366_v55 = vadd.f32 %v8978_v43, %v8200_v29 }
 0x83a   : > { %v4047_v41 = vadd.f32 %v4046_v31, %v4045_v40  ;;  %v4360_v49 = vpop.f32.mrf.mxu1 }
 0x83b   : > { %v4361_v57 = vadd.f32 %v8200_v29, %v4360_v49  ;;  %v4380_v28 = vmax.f32 %v4366_v55, 0.0 }
 0x83c   : > { %v4048_v22 = vrot.slane %v4047_v41, 4  ;;  %v8981_v47 = vpop.f32.mrf.mxu1 }
 0x83d   : > { %v4379_v33 = vmax.f32 %v4361_v57, 0.0  ;;  %v4376_v23 = vadd.f32 %v8981_v47, %v8200_v29  ;;  %v8250_v57 = vld [vmem:[%s9498_s26 + $0x140] sm:$0xff] }
 0x83e   : > { %v4049_v21 = vadd.f32 %v4048_v22, %v4047_v41  ;;  %v4370_v58 = vpop.f32.mrf.mxu1 }
 0x83f   : > { %v4371_v32 = vadd.f32 %v8200_v29, %v4370_v58  ;;  %8986 = vmatprep.mubr.msk.f32.mxu0 %vm671_vm2, %v4379_v33  ;;  %v4382_v35 = vmax.f32 %v4376_v23, 0.0  ;;  %v8253_v58 = vld [vmem:[%s9498_s26 + $0x158] sm:$0xff] }
 0x840   : > { %v4050_v59 = vrot.slane %v4049_v21, 2  ;;  %8987 = vmatmul.mubr.msk.f32.vlgmr.msra.gmra.mxu0 %vm671_vm2, %v4380_v28  ;;  %v8996_v51 = vpop.f32.mrf.mxu1 }
 0x841   : > { %v4381_v38 = vmax.f32 %v4371_v32, 0.0  ;;  %v4692_v25 = vadd.f32 %v8996_v51, %v4605_v36  ;;  %9001 = vmatpush3.msk.msra.mxu0 %vm684_vm1, %v8233_v60 }
 0x842   : > { %v4051_v19 = vadd.f32 %v4050_v59, %v4049_v21  ;;  %v4686_v34 = vpop.f32.mrf.mxu1  ;;  %9002 = vmatprep.subr.mxu0 %v8232_v20  ;;  %v8252_v21 = vld [vmem:[%s9498_s26 + $0x150] sm:$0xff] }
 0x843   : > { %v4687_v24 = vadd.f32 %v4686_v34, %v4604_v56  ;;  %8989 = vmatprep.mubr.msk.f32.mxu0 %vm671_vm2, %v4381_v38  ;;  %9003 = vmatpush3.msra.mxu0 %v8232_v20  ;;  %v4714_v44 = vadd.f32 %v8231_v30, %v4692_v25 }
 0x844   : > { %v4052_v54 = vrot.slane %v4051_v19, 1  ;;  %8990 = vmatmul.mubr.msk.f32.gmra.mxu0 %vm671_vm2, %v4382_v35  ;;  %v8999_v63 = vpop.f32.mrf.mxu1  ;;  %9020 = vmatprep.subr.mxu0 %v8258_v17 }
 0x845   : > { %v4713_v60 = vadd.f32 %v8231_v30, %v4687_v24  ;;  %v4702_v52 = vadd.f32 %v8999_v63, %v4607_v62  ;;  %v4718_v45 = vmax.f32 %v4714_v44, 0.0 }
 0x846   : > { %v4053_v42 = vadd.f32 %v4052_v54, %v4051_v19  ;;  %v4696_v53 = vpop.f32.mrf.mxu1 }
 0x847   : > { %v4717_v18 = vmax.f32 %v4713_v60, 0.0  ;;  %v4697_v48 = vadd.f32 %v4696_v53, %v4606_v61  ;;  %v4716_v46 = vadd.f32 %v8231_v30, %v4702_v52  ;;  %v8242_v60 = vld [vmem:[%s9631_s28 + $0x98] sm:$0x3]  ;;  %v8241_v52 = vld [vmem:[%s9631_s28 + $0x90] sm:$0xff] }
 0x848   : > { %v4054_v0 = vmul.f32 0.03125, %v4053_v42  ;;  %9010 = vmatprep.subr.msk.mxu1 %vm684_vm1, %v8242_v60  ;;  %v8268_v42 = vld [vmem:[%s9561_s25 + $0xa8] sm:$0x3] }
 0x849   : > { %v4715_v29 = vadd.f32 %v8231_v30, %v4697_v48  ;;  %9004 = vmatprep.mubr.msk.f32.mxu0 %vm671_vm2, %v4717_v18  ;;  %v4720_v49 = vmax.f32 %v4716_v46, 0.0  ;;  %9011 = vmatpush3.msk.msra.mxu1 %vm684_vm1, %v8242_v60  ;;  %v8209_v46 = vld [vmem:[%s9677_s16 + $0x8] ss:$0 sm:$0xff] }
 0x84a   : > { %v4057_v40 = vsub.f32 %v4033_v26, %v4054_v0  ;;  %v4058_v43 = vsub.f32 %v4038_v50, %v4054_v0  ;;  %9005 = vmatmul.mubr.msk.f32.vlgmr.msra.gmra.mxu0 %vm671_vm2, %v4718_v45  ;;  %v4055_v1 = vsub.f32 %v10180_v27, %v4054_v0  ;;  %v4056_v31 = vsub.f32 %v10178_v39, %v4054_v0  ;;  %v8251_v39 = vld [vmem:[%s9498_s26 + $0x148] sm:$0xff] }
 0x84b   : > { %v4719_v41 = vmax.f32 %v4715_v29, 0.0  ;;  %9021 = vmatpush3.msra.mxu0 %v8258_v17  ;;  %9012 = vmatprep.subr.mxu1 %v8241_v52 }
 0x84c   : > { %v4061_v55 = vmul.f32 %v4057_v40, %v4057_v40  ;;  %v4059_v37 = vmul.f32 %v4055_v1, %v4055_v1  ;;  %v4060_v22 = vmul.f32 %v4056_v31, %v4056_v31  ;;  %v4062_v50 = vmul.f32 %v4058_v43, %v4058_v43  ;;  %9013 = vmatpush3.msra.mxu1 %v8241_v52 }
 0x84d   : > { %9007 = vmatprep.mubr.msk.f32.mxu0 %vm671_vm2, %v4719_v41  ;;  %9028 = vmatprep.subr.msk.mxu1 %vm684_vm1, %v8268_v42 }
 0x84e   : > { %9008 = vmatmul.mubr.msk.f32.gmra.mxu0 %vm671_vm2, %v4720_v49  ;;  %v4063_v26 = vsel %vm549_vm0, %v4059_v37, 0.0  ;;  %v4064_v27 = vsel %vm549_vm0, %v4060_v22, 0.0  ;;  %v4066_v33 = vsel %vm549_vm0, %v4061_v55, 0.0  ;;  %v4068_v23 = vsel %vm549_vm0, %v4062_v50, 0.0  ;;  %v8235_v50 = vld [vmem:[%s9643_s29 + $0x9] ss:$0 sm:$0xff] }
 0x84f   : > { %9022 = vmatprep.mubr.msk.f32.mxu0 %vm549_vm0, %v8250_v57  ;;  %v4065_v47 = vadd.f32 %v4064_v27, %v4063_v26 }
 0x851   : > { %v4067_v28 = vadd.f32 %v4066_v33, %v4065_v47 }
 0x852   : > { %9023 = vmatmul.mubr.msk.f32.vlgmr.msra.gmra.mxu0 %vm549_vm0, %v8251_v39 }
 0x853   : > { %9025 = vmatprep.mubr.msk.f32.mxu0 %vm549_vm0, %v8252_v21  ;;  %v4069_v36 = vadd.f32 %v4068_v23, %v4067_v28  ;;  %v8260_v23 = vld [vmem:[%s9603_s14 + $0xa] ss:$0 sm:$0xff] }
 0x855   : > { %v4070_v32 = vrot.slane %v4069_v36, 4 }
 0x856   : > { %9026 = vmatmul.mubr.msk.f32.gmra.mxu0 %vm549_vm0, %v8253_v58 }
 0x857   : > { %v4071_v20 = vadd.f32 %v4070_v32, %v4069_v36 }
 0x859   : > { %v4072_v59 = vrot.slane %v4071_v20, 2 }
 0x85b   : > { %v4073_v51 = vadd.f32 %v4072_v59, %v4071_v20 }
 0x85d   : > { %v4074_v56 = vrot.slane %v4073_v51, 1 }
 0x85f   : > { %v4075_v38 = vadd.f32 %v4074_v56, %v4073_v51 }
 0x861   : > { %v4076_v25 = vmul.f32 0.032258064, %v4075_v38  ;;  %v5058_v38 = vmul.f32 %v8260_v23, %v9859_v2  ;;  %v5060_v2 = vmul.f32 %v8260_v23, %v9863_v4 }
 0x863   : > { %9275 = vrsqrt.f32 %v4076_v25  ;;  %vm4079_vm10 = vcmp.eq.f32.partialorder %v4076_v25, inf  ;;  %v4082_v19 = vand.u32 2147483648, %v4076_v25  ;;  %vm4081_vm11 = vcmp.eq.f32.partialorder %v4076_v25, 0.0 }
 0x870   : > { %v9276_v30 = vpop.eup %9275 }
 0x871   : > { %v4078_v17 = vmul.f32 %v9276_v30, %v4076_v25  ;;  %v8267_v30 = vld [vmem:[%s9561_s25 + $0xa0] sm:$0xff] }
 0x873   : > { %v4080_v35 = vsel %vm4079_vm10, %v4076_v25, %v4078_v17 }
 0x874   : > { %v4083_v34 = vsel %vm4081_vm11, %v4082_v19, %v4080_v35  ;;  %v5057_v35 = vmul.f32 %v8260_v23, %v9861_v3  ;;  %vm5918_vm11 = vcmask 786112  }
 0x875   : > { %v4084_v62 = vadd.f32 1e-05, %v4083_v34 }
 0x877   : > { %9277 = vrcp.f32 %v4084_v62 }
 0x884   : > { %v9278_v24 = vpop.eup %9277 }
 0x885   : > { %v4087_v54 = vmul.f32 %v9278_v24, %v4056_v31  ;;  %v4086_v44 = vmul.f32 %v9278_v24, %v4055_v1  ;;  %v4089_v63 = vmul.f32 %v9278_v24, %v4058_v43  ;;  %v4088_v61 = vmul.f32 %v9278_v24, %v4057_v40  ;;  %v8266_v24 = vld [vmem:[%s9610_s24 + $0xa] ss:$0 sm:$0xff] }
 0x887   : > { %4096 = vrot.lane.b32.xlu1 %v4087_v54, %s9380_s23  ;;  %4094 = vrot.lane.b32.xlu0 %v4086_v44, %s9380_s23  ;;  %v8293_v54 = vld [vmem:[%s9508_s17 + $0x58] sm:$0xff] }
 0x88b   : > { %4100 = vrot.lane.b32.xlu1 %v4089_v63, %s9380_s23  ;;  %4098 = vrot.lane.b32.xlu0 %v4088_v61, %s9380_s23  ;;  %s9381_s23 = smov 64  }
 0x8f9   : > { %v4097_v53 = vpop.permute.xlu1 %4096  ;;  %v4095_v18 = vpop.permute.xlu0 %4094 }
 0x8fa   : > { %4108 = vst.msk [vmem:[%s9729_s22 + $0x8] sm:$0xff] %vm4106_vm12, %v4097_v53  ;;  %4107 = vst.msk [vmem:[%s9729_s22] sm:$0xff] %vm4106_vm12, %v4095_v18  ;;  %v5059_v18 = vmul.f32 %v8260_v23, %v9865_v7  ;;  %v8287_v23 = vld [vmem:[%s9498_s26 + $0x170] sm:$0xff] }
 0x8fd   : > { %v4101_v48 = vpop.permute.xlu1 %4100  ;;  %v4099_v0 = vpop.permute.xlu0 %4098 }
 0x8fe   : > { %4110 = vst.msk [vmem:[%s9729_s22 + $0x18] sm:$0xff] %vm4106_vm12, %v4101_v48  ;;  %4109 = vst.msk [vmem:[%s9729_s22 + $0x10] sm:$0xff] %vm4106_vm12, %v4099_v0 }
 0x900   : > { %v8988_v45 = vpop.f32.mrf.mxu0 }
 0x901   : > { %v10231_v40 = vadd.f32 %v8988_v45, %v8209_v46 }
 0x902   : > { %v4475_v29 = vpop.f32.mrf.mxu0 }
 0x903   : > { %v10233_v43 = vadd.f32 %v8209_v46, %v4475_v29  ;;  %v4495_v55 = vsel %vm549_vm0, %v10231_v40, 0.0 }
 0x904   : > { %v8991_v1 = vpop.f32.mrf.mxu0 }
 0x905   : > { %v4494_v31 = vsel %vm549_vm0, %v10233_v43, 0.0  ;;  %v4491_v49 = vadd.f32 %v8991_v1, %v8209_v46 }
 0x906   : > { %v4485_v41 = vpop.f32.mrf.mxu0  ;;  %v4496_v37 = vadd.f32 %v4495_v55, %v4494_v31 }
 0x907   : > { %v4486_v57 = vadd.f32 %v8209_v46, %v4485_v41  ;;  %v4499_v39 = vsel %vm549_vm0, %v4491_v49, 0.0 }
 0x909   : > { %v4497_v22 = vsel %vm549_vm0, %v4486_v57, 0.0 }
 0x90a   : > { %v4498_v26 = vadd.f32 %v4497_v22, %v4496_v37  ;;  %v9006_v27 = vpop.f32.mrf.mxu0 }
 0x90b   : > { %v4819_v33 = vadd.f32 %v9006_v27, %v8235_v50 }
 0x90c   : > { %v4500_v47 = vadd.f32 %v4499_v39, %v4498_v26  ;;  %v4813_v21 = vpop.f32.mrf.mxu0  ;;  %v8285_v39 = vld [vmem:[%s9498_s26 + $0x160] sm:$0xff] }
 0x90d   : > { %v4814_v28 = vadd.f32 %v8235_v50, %v4813_v21  ;;  %v4833_v59 = vmax.f32 %v4819_v33, 0.0 }
 0x90e   : > { %v4501_v58 = vrot.slane %v4500_v47, 4  ;;  %v9009_v36 = vpop.f32.mrf.mxu0 }
 0x90f   : > { %v4832_v32 = vmax.f32 %v4814_v28, 0.0  ;;  %v4829_v51 = vadd.f32 %v9009_v36, %v8235_v50 }
 0x910   : > { %v4502_v20 = vadd.f32 %v4501_v58, %v4500_v47  ;;  %v4823_v56 = vpop.f32.mrf.mxu0 }
 0x911   : > { %v4824_v25 = vadd.f32 %v8235_v50, %v4823_v56  ;;  %9014 = vmatprep.mubr.msk.f32.mxu1 %vm671_vm2, %v4832_v32  ;;  %v4835_v63 = vmax.f32 %v4829_v51, 0.0  ;;  %v8288_v32 = vld [vmem:[%s9498_s26 + $0x178] sm:$0xff] }
 0x912   : > { %v4503_v17 = vrot.slane %v4502_v20, 2  ;;  %9015 = vmatmul.mubr.msk.f32.vlgmr.msra.gmra.mxu1 %vm671_vm2, %v4833_v59  ;;  %v9024_v19 = vpop.f32.mrf.mxu0 }
 0x913   : > { %v4834_v34 = vmax.f32 %v4824_v25, 0.0  ;;  %v5145_v62 = vadd.f32 %v9024_v19, %v5058_v38  ;;  %9029 = vmatpush3.msk.msra.mxu1 %vm684_vm1, %v8268_v42 }
 0x914   : > { %v4504_v44 = vadd.f32 %v4503_v17, %v4502_v20  ;;  %v5139_v61 = vpop.f32.mrf.mxu0  ;;  %9030 = vmatprep.subr.mxu1 %v8267_v30 }
 0x915   : > { %v5140_v60 = vadd.f32 %v5139_v61, %v5057_v35  ;;  %9017 = vmatprep.mubr.msk.f32.mxu1 %vm671_vm2, %v4834_v34  ;;  %9031 = vmatpush3.msra.mxu1 %v8267_v30  ;;  %v5167_v53 = vadd.f32 %v8266_v24, %v5145_v62 }
 0x916   : > { %v4505_v52 = vrot.slane %v4504_v44, 1  ;;  %9018 = vmatmul.mubr.msk.f32.gmra.mxu1 %vm671_vm2, %v4835_v63  ;;  %v9027_v3 = vpop.f32.mrf.mxu0  ;;  %9048 = vmatprep.subr.mxu1 %v8293_v54 }
 0x917   : > { %v5166_v42 = vadd.f32 %v8266_v24, %v5140_v60  ;;  %v5155_v48 = vadd.f32 %v9027_v3, %v5060_v2  ;;  %v5171_v1 = vmax.f32 %v5167_v53, 0.0  ;;  %v8276_v53 = vld [vmem:[%s9631_s28 + $0xa0] sm:$0xff]  ;;  %v8303_v3 = vld [vmem:[%s9561_s25 + $0xb8] sm:$0x3] }
 0x918   : > { %v4506_v0 = vadd.f32 %v4505_v52, %v4504_v44  ;;  %v5149_v45 = vpop.f32.mrf.mxu0  ;;  %v8277_v52 = vld [vmem:[%s9631_s28 + $0xa8] sm:$0x3] }
 0x919   : > { %v5170_v46 = vmax.f32 %v5166_v42, 0.0  ;;  %v5150_v29 = vadd.f32 %v5149_v45, %v5059_v18  ;;  %v5169_v31 = vadd.f32 %v8266_v24, %v5155_v48  ;;  %9038 = vmatprep.subr.msk.mxu0 %vm684_vm1, %v8277_v52 }
 0x91a   : > { %v4507_v4 = vmul.f32 0.03125, %v4506_v0  ;;  %9039 = vmatpush3.msk.msra.mxu0 %vm684_vm1, %v8277_v52 }
 0x91b   : > { %v5168_v41 = vadd.f32 %v8266_v24, %v5150_v29  ;;  %9032 = vmatprep.mubr.msk.f32.mxu1 %vm671_vm2, %v5170_v46  ;;  %v5173_v27 = vmax.f32 %v5169_v31, 0.0  ;;  %9040 = vmatprep.subr.mxu0 %v8276_v53  ;;  %v8244_v46 = vld [vmem:[%s9677_s16 + $0x9] ss:$0 sm:$0xff] }
 0x91c   : > { %v4510_v55 = vsub.f32 %v4486_v57, %v4507_v4  ;;  %v4511_v37 = vsub.f32 %v4491_v49, %v4507_v4  ;;  %9033 = vmatmul.mubr.msk.f32.vlgmr.msra.gmra.mxu1 %vm671_vm2, %v5171_v1  ;;  %v4508_v7 = vsub.f32 %v10233_v43, %v4507_v4  ;;  %v4509_v22 = vsub.f32 %v10231_v40, %v4507_v4  ;;  %v8286_v40 = vld [vmem:[%s9498_s26 + $0x168] sm:$0xff] }
 0x91d   : > { %v5172_v50 = vmax.f32 %v5168_v41, 0.0  ;;  %9049 = vmatpush3.msra.mxu1 %v8293_v54  ;;  %9041 = vmatpush3.msra.mxu0 %v8276_v53 }
 0x91e   : > { %v4514_v26 = vmul.f32 %v4510_v55, %v4510_v55  ;;  %v4512_v47 = vmul.f32 %v4508_v7, %v4508_v7  ;;  %v4513_v33 = vmul.f32 %v4509_v22, %v4509_v22  ;;  %v4515_v49 = vmul.f32 %v4511_v37, %v4511_v37  ;;  %9056 = vmatprep.subr.msk.mxu0 %vm684_vm1, %v8303_v3 }
 0x91f   : > { %9035 = vmatprep.mubr.msk.f32.mxu1 %vm671_vm2, %v5172_v50 }
 0x920   : > { %9036 = vmatmul.mubr.msk.f32.gmra.mxu1 %vm671_vm2, %v5173_v27  ;;  %v4516_v57 = vsel %vm549_vm0, %v4512_v47, 0.0  ;;  %v4517_v43 = vsel %vm549_vm0, %v4513_v33, 0.0  ;;  %v4519_v28 = vsel %vm549_vm0, %v4514_v26, 0.0  ;;  %v4521_v36 = vsel %vm549_vm0, %v4515_v49, 0.0  ;;  %v8270_v27 = vld [vmem:[%s9643_s29 + $0xa] ss:$0 sm:$0xff] }
 0x921   : > { %9050 = vmatprep.mubr.msk.f32.mxu1 %vm549_vm0, %v8285_v39  ;;  %v4518_v21 = vadd.f32 %v4517_v43, %v4516_v57 }
 0x923   : > { %v4520_v58 = vadd.f32 %v4519_v28, %v4518_v21  ;;  %v8295_v21 = vld [vmem:[%s9603_s14 + $0xb] ss:$0 sm:$0xff] }
 0x924   : > { %9051 = vmatmul.mubr.msk.f32.vlgmr.msra.gmra.mxu1 %vm549_vm0, %v8286_v40 }
 0x925   : > { %9053 = vmatprep.mubr.msk.f32.mxu1 %vm549_vm0, %v8287_v23  ;;  %v4522_v20 = vadd.f32 %v4521_v36, %v4520_v58 }
 0x927   : > { %v4523_v59 = vrot.slane %v4522_v20, 4 }
 0x928   : > { %9054 = vmatmul.mubr.msk.f32.gmra.mxu1 %vm549_vm0, %v8288_v32 }
 0x929   : > { %v4524_v51 = vadd.f32 %v4523_v59, %v4522_v20 }
 0x92b   : > { %v4525_v56 = vrot.slane %v4524_v51, 2 }
 0x92d   : > { %v4526_v38 = vadd.f32 %v4525_v56, %v4524_v51  ;;  %v5511_v51 = vmul.f32 %v8295_v21, %v9867_v8  ;;  %v5513_v8 = vmul.f32 %v8295_v21, %v9871_v10 }
 0x92f   : > { %v4527_v25 = vrot.slane %v4526_v38, 1 }
 0x931   : > { %v4528_v30 = vadd.f32 %v4527_v25, %v4526_v38  ;;  %v8302_v38 = vld [vmem:[%s9561_s25 + $0xb0] sm:$0xff] }
 0x933   : > { %v4529_v17 = vmul.f32 0.032258064, %v4528_v30 }
 0x935   : > { %9279 = vrsqrt.f32 %v4529_v17  ;;  %vm4532_vm13 = vcmp.eq.f32.partialorder %v4529_v17, inf  ;;  %v4535_v34 = vand.u32 2147483648, %v4529_v17  ;;  %vm4534_vm14 = vcmp.eq.f32.partialorder %v4529_v17, 0.0 }
 0x942   : > { %v9280_v19 = vpop.eup %9279 }
 0x943   : > { %v4531_v35 = vmul.f32 %v9280_v19, %v4529_v17 }
 0x945   : > { %v4533_v62 = vsel %vm4532_vm13, %v4529_v17, %v4531_v35  ;;  %v5510_v17 = vmul.f32 %v8295_v21, %v9869_v9 }
 0x946   : > { %v4536_v24 = vsel %vm4534_vm14, %v4535_v34, %v4533_v62  ;;  %v8301_v34 = vld [vmem:[%s9610_s24 + $0xb] ss:$0 sm:$0xff]  ;;  %v8328_v62 = vld [vmem:[%s9508_s17 + $0x60] sm:$0xff]  ;;  %vm6371_vm14 = vcmask 851712  }
 0x947   : > { %v4537_v54 = vadd.f32 1e-05, %v4536_v24 }
 0x949   : > { %9281 = vrcp.f32 %v4537_v54 }
 0x956   : > { %v9282_v44 = vpop.eup %9281 }
 0x957   : > { %v4540_v63 = vmul.f32 %v9282_v44, %v4509_v22  ;;  %v4539_v61 = vmul.f32 %v9282_v44, %v4508_v7  ;;  %v4542_v2 = vmul.f32 %v9282_v44, %v4511_v37  ;;  %v4541_v60 = vmul.f32 %v9282_v44, %v4510_v55 }
 0x959   : > { %4549 = vrot.lane.b32.xlu1 %v4540_v63, %s9381_s23  ;;  %4547 = vrot.lane.b32.xlu0 %v4539_v61, %s9381_s23 }
 0x95d   : > { %4553 = vrot.lane.b32.xlu1 %v4542_v2, %s9381_s23  ;;  %4551 = vrot.lane.b32.xlu0 %v4541_v60, %s9381_s23  ;;  %v5512_v60 = vmul.f32 %v8295_v21, %v9873_v12  ;;  %v8323_v21 = vld [vmem:[%s9498_s26 + $0x198] sm:$0xff]  ;;  %s9382_s23 = smov 72  }
 0x9cb   : > { %v4550_v18 = vpop.permute.xlu1 %4549  ;;  %v4548_v42 = vpop.permute.xlu0 %4547 }
 0x9cc   : > { %4561 = vst.msk [vmem:[%s9729_s22 + $0x8] sm:$0xff] %vm4559_vm15, %v4550_v18  ;;  %4560 = vst.msk [vmem:[%s9729_s22] sm:$0xff] %vm4559_vm15, %v4548_v42 }
 0x9cf   : > { %v4554_v48 = vpop.permute.xlu1 %4553  ;;  %v4552_v0 = vpop.permute.xlu0 %4551 }
 0x9d0   : > { %4563 = vst.msk [vmem:[%s9729_s22 + $0x18] sm:$0xff] %vm4559_vm15, %v4554_v48  ;;  %4562 = vst.msk [vmem:[%s9729_s22 + $0x10] sm:$0xff] %vm4559_vm15, %v4552_v0 }
 0x9d2   : > { %v9016_v45 = vpop.f32.mrf.mxu1 }
 0x9d3   : > { %v10284_v4 = vadd.f32 %v9016_v45, %v8244_v46 }
 0x9d4   : > { %v4928_v29 = vpop.f32.mrf.mxu1 }
 0x9d5   : > { %v10286_v1 = vadd.f32 %v8244_v46, %v4928_v29  ;;  %v4948_v37 = vsel %vm549_vm0, %v10284_v4, 0.0 }
 0x9d6   : > { %v9019_v31 = vpop.f32.mrf.mxu1 }
 0x9d7   : > { %v4947_v41 = vsel %vm549_vm0, %v10286_v1, 0.0  ;;  %v4944_v7 = vadd.f32 %v9019_v31, %v8244_v46 }
 0x9d8   : > { %v4938_v55 = vpop.f32.mrf.mxu1  ;;  %v4949_v50 = vadd.f32 %v4948_v37, %v4947_v41 }
 0x9d9   : > { %v4939_v22 = vadd.f32 %v8244_v46, %v4938_v55  ;;  %v4952_v33 = vsel %vm549_vm0, %v4944_v7, 0.0 }
 0x9db   : > { %v4950_v26 = vsel %vm549_vm0, %v4939_v22, 0.0 }
 0x9dc   : > { %v4951_v39 = vadd.f32 %v4950_v26, %v4949_v50  ;;  %v9034_v47 = vpop.f32.mrf.mxu1 }
 0x9dd   : > { %v5272_v57 = vadd.f32 %v9034_v47, %v8270_v27 }
 0x9de   : > { %v4953_v49 = vadd.f32 %v4952_v33, %v4951_v39  ;;  %v5266_v43 = vpop.f32.mrf.mxu1  ;;  %v8320_v39 = vld [vmem:[%s9498_s26 + $0x180] sm:$0xff] }
 0x9df   : > { %v5267_v40 = vadd.f32 %v8270_v27, %v5266_v43  ;;  %v5286_v32 = vmax.f32 %v5272_v57, 0.0 }
 0x9e0   : > { %v4954_v28 = vrot.slane %v4953_v49, 4  ;;  %v9037_v23 = vpop.f32.mrf.mxu1 }
 0x9e1   : > { %v5285_v58 = vmax.f32 %v5267_v40, 0.0  ;;  %v5282_v20 = vadd.f32 %v9037_v23, %v8270_v27 }
 0x9e2   : > { %v4955_v36 = vadd.f32 %v4954_v28, %v4953_v49  ;;  %v5276_v59 = vpop.f32.mrf.mxu1  ;;  %v8322_v49 = vld [vmem:[%s9498_s26 + $0x190] sm:$0xff] }
 0x9e3   : > { %v5277_v56 = vadd.f32 %v8270_v27, %v5276_v59  ;;  %9042 = vmatprep.mubr.msk.f32.mxu0 %vm671_vm2, %v5285_v58  ;;  %v5288_v54 = vmax.f32 %v5282_v20, 0.0 }
 0x9e4   : > { %v4956_v25 = vrot.slane %v4955_v36, 2  ;;  %9043 = vmatmul.mubr.msk.f32.vlgmr.msra.gmra.mxu0 %vm671_vm2, %v5286_v32  ;;  %v9052_v30 = vpop.f32.mrf.mxu1 }
 0x9e5   : > { %v5287_v19 = vmax.f32 %v5277_v56, 0.0  ;;  %v5598_v35 = vadd.f32 %v9052_v30, %v5511_v51  ;;  %9057 = vmatpush3.msk.msra.mxu0 %vm684_vm1, %v8303_v3 }
 0x9e6   : > { %v4957_v24 = vadd.f32 %v4956_v25, %v4955_v36  ;;  %v5592_v44 = vpop.f32.mrf.mxu1  ;;  %9058 = vmatprep.subr.mxu0 %v8302_v38 }
 0x9e7   : > { %v5593_v63 = vadd.f32 %v5592_v44, %v5510_v17  ;;  %9045 = vmatprep.mubr.msk.f32.mxu0 %vm671_vm2, %v5287_v19  ;;  %9059 = vmatpush3.msra.mxu0 %v8302_v38  ;;  %v5620_v2 = vadd.f32 %v8301_v34, %v5598_v35  ;;  %v8311_v44 = vld [vmem:[%s9631_s28 + $0xb0] sm:$0xff] }
 0x9e8   : > { %v4958_v61 = vrot.slane %v4957_v24, 1  ;;  %9046 = vmatmul.mubr.msk.f32.gmra.mxu0 %vm671_vm2, %v5288_v54  ;;  %v9055_v9 = vpop.f32.mrf.mxu1  ;;  %9076 = vmatprep.subr.mxu0 %v8328_v62  ;;  %v8312_v54 = vld [vmem:[%s9631_s28 + $0xb8] sm:$0x3] }
 0x9e9   : > { %v5619_v52 = vadd.f32 %v8301_v34, %v5593_v63  ;;  %v5608_v53 = vadd.f32 %v9055_v9, %v5513_v8  ;;  %v5624_v10 = vmax.f32 %v5620_v2, 0.0  ;;  %9066 = vmatprep.subr.msk.mxu1 %vm684_vm1, %v8312_v54  ;;  %v8338_v8 = vld [vmem:[%s9561_s25 + $0xc8] sm:$0x3] }
 0x9ea   : > { %v4959_v3 = vadd.f32 %v4958_v61, %v4957_v24  ;;  %v5602_v18 = vpop.f32.mrf.mxu1  ;;  %9067 = vmatpush3.msk.msra.mxu1 %vm684_vm1, %v8312_v54 }
 0x9eb   : > { %v5623_v42 = vmax.f32 %v5619_v52, 0.0  ;;  %v5603_v48 = vadd.f32 %v5602_v18, %v5512_v60  ;;  %v5622_v45 = vadd.f32 %v8301_v34, %v5608_v53  ;;  %9068 = vmatprep.subr.mxu1 %v8311_v44  ;;  %v8279_v52 = vld [vmem:[%s9677_s16 + $0xa] ss:$0 sm:$0xff] }
 0x9ec   : > { %v4960_v0 = vmul.f32 0.03125, %v4959_v3  ;;  %9069 = vmatpush3.msra.mxu1 %v8311_v44 }
 0x9ed   : > { %v5621_v46 = vadd.f32 %v8301_v34, %v5603_v48  ;;  %9060 = vmatprep.mubr.msk.f32.mxu0 %vm671_vm2, %v5623_v42  ;;  %v5626_v27 = vmax.f32 %v5622_v45, 0.0  ;;  %9084 = vmatprep.subr.msk.mxu1 %vm684_vm1, %v8338_v8 }
 0x9ee   : > { %v4961_v29 = vsub.f32 %v10286_v1, %v4960_v0  ;;  %v4962_v31 = vsub.f32 %v10284_v4, %v4960_v0  ;;  %v4963_v41 = vsub.f32 %v4939_v22, %v4960_v0  ;;  %v4964_v55 = vsub.f32 %v4944_v7, %v4960_v0  ;;  %9061 = vmatmul.mubr.msk.f32.vlgmr.msra.gmra.mxu0 %vm671_vm2, %v5624_v10  ;;  %v8321_v22 = vld [vmem:[%s9498_s26 + $0x188] sm:$0xff] }
 0x9ef   : > { %v5625_v12 = vmax.f32 %v5621_v46, 0.0  ;;  %9077 = vmatpush3.msra.mxu0 %v8328_v62 }
 0x9f0   : > { %v4965_v37 = vmul.f32 %v4961_v29, %v4961_v29  ;;  %v4966_v50 = vmul.f32 %v4962_v31, %v4962_v31  ;;  %v4967_v26 = vmul.f32 %v4963_v41, %v4963_v41  ;;  %v4968_v47 = vmul.f32 %v4964_v55, %v4964_v55 }
 0x9f1   : > { %9063 = vmatprep.mubr.msk.f32.mxu0 %vm671_vm2, %v5625_v12 }
 0x9f2   : > { %v4969_v1 = vsel %vm549_vm0, %v4965_v37, 0.0  ;;  %v4970_v4 = vsel %vm549_vm0, %v4966_v50, 0.0  ;;  %9064 = vmatmul.mubr.msk.f32.gmra.mxu0 %vm671_vm2, %v5626_v27  ;;  %v4972_v33 = vsel %vm549_vm0, %v4967_v26, 0.0  ;;  %v4974_v43 = vsel %vm549_vm0, %v4968_v47, 0.0  ;;  %v8330_v47 = vld [vmem:[%s9603_s14 + $0xc] ss:$0 sm:$0xff] }
 0x9f3   : > { %v4971_v7 = vadd.f32 %v4970_v4, %v4969_v1  ;;  %9078 = vmatprep.mubr.msk.f32.mxu0 %vm549_vm0, %v8320_v39 }
 0x9f5   : > { %v4973_v57 = vadd.f32 %v4972_v33, %v4971_v7 }
 0x9f6   : > { %9079 = vmatmul.mubr.msk.f32.vlgmr.msra.gmra.mxu0 %vm549_vm0, %v8321_v22 }
 0x9f7   : > { %v4975_v40 = vadd.f32 %v4974_v43, %v4973_v57  ;;  %9081 = vmatprep.mubr.msk.f32.mxu0 %vm549_vm0, %v8322_v49  ;;  %v5964_v43 = vmul.f32 %v8330_v47, %v9875_v6  ;;  %v5966_v6 = vmul.f32 %v8330_v47, %v9879_v11 }
 0x9f9   : > { %v4976_v28 = vrot.slane %v4975_v40, 4 }
 0x9fa   : > { %9082 = vmatmul.mubr.msk.f32.gmra.mxu0 %vm549_vm0, %v8323_v21  ;;  %v8337_v21 = vld [vmem:[%s9561_s25 + $0xc0] sm:$0xff] }
 0x9fb   : > { %v4977_v23 = vadd.f32 %v4976_v28, %v4975_v40 }
 0x9fd   : > { %v4978_v58 = vrot.slane %v4977_v23, 2 }
 0x9ff   : > { %v4979_v36 = vadd.f32 %v4978_v58, %v4977_v23  ;;  %v5963_v58 = vmul.f32 %v8330_v47, %v9877_v5 }
 0xa01   : > { %v4980_v32 = vrot.slane %v4979_v36, 1 }
 0xa03   : > { %v4981_v20 = vadd.f32 %v4980_v32, %v4979_v36 }
 0xa05   : > { %v4982_v59 = vmul.f32 0.032258064, %v4981_v20  ;;  %v8336_v20 = vld [vmem:[%s9610_s24 + $0xc] ss:$0 sm:$0xff] }
 0xa07   : > { %9283 = vrsqrt.f32 %v4982_v59  ;;  %vm4985_vm3 = vcmp.eq.f32.partialorder %v4982_v59, inf  ;;  %v4988_v38 = vand.u32 2147483648, %v4982_v59  ;;  %vm4987_vm4 = vcmp.eq.f32.partialorder %v4982_v59, 0.0 }
 0xa14   : > { %v9284_v51 = vpop.eup %9283 }
 0xa15   : > { %v4984_v56 = vmul.f32 %v9284_v51, %v4982_v59 }
 0xa17   : > { %v4986_v25 = vsel %vm4985_vm3, %v4982_v59, %v4984_v56  ;;  %v8363_v59 = vld [vmem:[%s9508_s17 + $0x68] sm:$0xff] }
 0xa18   : > { %v4989_v30 = vsel %vm4987_vm4, %v4988_v38, %v4986_v25  ;;  %vm6824_vm4 = vcmask 917312  }
 0xa19   : > { %v4990_v17 = vadd.f32 1e-05, %v4989_v30 }
 0xa1b   : > { %9285 = vrcp.f32 %v4990_v17 }
 0xa28   : > { %v9286_v19 = vpop.eup %9285 }
 0xa29   : > { %v4993_v35 = vmul.f32 %v9286_v19, %v4962_v31  ;;  %v4992_v34 = vmul.f32 %v9286_v19, %v4961_v29  ;;  %v4994_v62 = vmul.f32 %v9286_v19, %v4963_v41  ;;  %v4995_v24 = vmul.f32 %v9286_v19, %v4964_v55  ;;  %v8305_v41 = vld [vmem:[%s9643_s29 + $0xb] ss:$0 sm:$0xff] }
 0xa2a   : > { %v5965_v19 = vmul.f32 %v8330_v47, %v9881_v13 }
 0xa2b   : > { %5002 = vrot.lane.b32.xlu1 %v4993_v35, %s9382_s23  ;;  %5000 = vrot.lane.b32.xlu0 %v4992_v34, %s9382_s23 }
 0xa2f   : > { %5006 = vrot.lane.b32.xlu1 %v4995_v24, %s9382_s23  ;;  %5004 = vrot.lane.b32.xlu0 %v4994_v62, %s9382_s23  ;;  %s9383_s23 = smov 80  }
 0xa9d   : > { %v5003_v63 = vpop.permute.xlu1 %5002  ;;  %v5001_v61 = vpop.permute.xlu0 %5000 }
 0xa9e   : > { %5014 = vst.msk [vmem:[%s9729_s22 + $0x8] sm:$0xff] %vm5012_vm5, %v5003_v63  ;;  %5013 = vst.msk [vmem:[%s9729_s22] sm:$0xff] %vm5012_vm5, %v5001_v61 }
 0xaa1   : > { %v5007_v2 = vpop.permute.xlu1 %5006  ;;  %v5005_v9 = vpop.permute.xlu0 %5004 }
 0xaa2   : > { %5016 = vst.msk [vmem:[%s9729_s22 + $0x18] sm:$0xff] %vm5012_vm5, %v5007_v2  ;;  %5015 = vst.msk [vmem:[%s9729_s22 + $0x10] sm:$0xff] %vm5012_vm5, %v5005_v9  ;;  %vm7277_vm5 = vcmask 982912  }
 0xaa4   : > { %v9044_v60 = vpop.f32.mrf.mxu0 }
 0xaa5   : > { %v10337_v3 = vadd.f32 %v9044_v60, %v8279_v52 }
 0xaa6   : > { %v5381_v53 = vpop.f32.mrf.mxu0 }
 0xaa7   : > { %v10339_v18 = vadd.f32 %v8279_v52, %v5381_v53  ;;  %v5401_v10 = vsel %vm549_vm0, %v10337_v3, 0.0 }
 0xaa8   : > { %v9047_v42 = vpop.f32.mrf.mxu0 }
 0xaa9   : > { %v5400_v48 = vsel %vm549_vm0, %v10339_v18, 0.0  ;;  %v5397_v45 = vadd.f32 %v9047_v42, %v8279_v52 }
 0xaaa   : > { %v5391_v0 = vpop.f32.mrf.mxu0  ;;  %v5402_v29 = vadd.f32 %v5401_v10, %v5400_v48  ;;  %v8355_v10 = vld [vmem:[%s9498_s26 + $0x1a0] sm:$0xff] }
 0xaab   : > { %v5392_v46 = vadd.f32 %v8279_v52, %v5391_v0  ;;  %v5405_v37 = vsel %vm549_vm0, %v5397_v45, 0.0 }
 0xaad   : > { %v5403_v31 = vsel %vm549_vm0, %v5392_v46, 0.0 }
 0xaae   : > { %v5404_v55 = vadd.f32 %v5403_v31, %v5402_v29  ;;  %v9062_v12 = vpop.f32.mrf.mxu0 }
 0xaaf   : > { %v5725_v26 = vadd.f32 %v9062_v12, %v8305_v41 }
 0xab0   : > { %v5406_v50 = vadd.f32 %v5405_v37, %v5404_v55  ;;  %v5719_v27 = vpop.f32.mrf.mxu0 }
 0xab1   : > { %v5720_v39 = vadd.f32 %v8305_v41, %v5719_v27  ;;  %v5739_v33 = vmax.f32 %v5725_v26, 0.0 }
 0xab2   : > { %v5407_v1 = vrot.slane %v5406_v50, 4  ;;  %v9065_v4 = vpop.f32.mrf.mxu0 }
 0xab3   : > { %v5738_v7 = vmax.f32 %v5720_v39, 0.0  ;;  %v5735_v49 = vadd.f32 %v9065_v4, %v8305_v41 }
 0xab4   : > { %v5408_v22 = vadd.f32 %v5407_v1, %v5406_v50  ;;  %v5729_v57 = vpop.f32.mrf.mxu0  ;;  %v8358_v50 = vld [vmem:[%s9498_s26 + $0x1b8] sm:$0xff] }
 0xab5   : > { %v5730_v40 = vadd.f32 %v8305_v41, %v5729_v57  ;;  %9070 = vmatprep.mubr.msk.f32.mxu1 %vm671_vm2, %v5738_v7  ;;  %v5741_v56 = vmax.f32 %v5735_v49, 0.0  ;;  %v8357_v41 = vld [vmem:[%s9498_s26 + $0x1b0] sm:$0xff] }
 0xab6   : > { %v5409_v28 = vrot.slane %v5408_v22, 2  ;;  %9071 = vmatmul.mubr.msk.f32.vlgmr.msra.gmra.mxu1 %vm671_vm2, %v5739_v33  ;;  %v9080_v23 = vpop.f32.mrf.mxu0 }
 0xab7   : > { %v5740_v36 = vmax.f32 %v5730_v40, 0.0  ;;  %v6051_v32 = vadd.f32 %v9080_v23, %v5964_v43  ;;  %9085 = vmatpush3.msk.msra.mxu1 %vm684_vm1, %v8338_v8 }
 0xab8   : > { %v5410_v51 = vadd.f32 %v5409_v28, %v5408_v22  ;;  %v6045_v38 = vpop.f32.mrf.mxu0  ;;  %9086 = vmatprep.subr.mxu1 %v8337_v21 }
 0xab9   : > { %v6046_v25 = vadd.f32 %v6045_v38, %v5963_v58  ;;  %9073 = vmatprep.mubr.msk.f32.mxu1 %vm671_vm2, %v5740_v36  ;;  %9087 = vmatpush3.msra.mxu1 %v8337_v21  ;;  %v6073_v17 = vadd.f32 %v8336_v20, %v6051_v32  ;;  %v8347_v32 = vld [vmem:[%s9631_s28 + $0xc8] sm:$0x3] }
 0xaba   : > { %v5411_v30 = vrot.slane %v5410_v51, 1  ;;  %9074 = vmatmul.mubr.msk.f32.gmra.mxu1 %vm671_vm2, %v5741_v56  ;;  %v9083_v5 = vpop.f32.mrf.mxu0  ;;  %9104 = vmatprep.subr.mxu1 %v8363_v59 }
 0xabb   : > { %v6072_v35 = vadd.f32 %v8336_v20, %v6046_v25  ;;  %v6061_v34 = vadd.f32 %v9083_v5, %v5966_v6  ;;  %v6077_v11 = vmax.f32 %v6073_v17, 0.0  ;;  %9094 = vmatprep.subr.msk.mxu0 %vm684_vm1, %v8347_v32 }
 0xabc   : > { %v5412_v62 = vadd.f32 %v5411_v30, %v5410_v51  ;;  %v6055_v24 = vpop.f32.mrf.mxu0  ;;  %9095 = vmatpush3.msk.msra.mxu0 %vm684_vm1, %v8347_v32  ;;  %v8314_v30 = vld [vmem:[%s9677_s16 + $0xb] ss:$0 sm:$0xff] }
 0xabd   : > { %v6076_v54 = vmax.f32 %v6072_v35, 0.0  ;;  %v6056_v44 = vadd.f32 %v6055_v24, %v5965_v19  ;;  %v6075_v63 = vadd.f32 %v8336_v20, %v6061_v34 }
 0xabe   : > { %v5413_v8 = vmul.f32 0.03125, %v5412_v62 }
 0xabf   : > { %v6074_v61 = vadd.f32 %v8336_v20, %v6056_v44  ;;  %9088 = vmatprep.mubr.msk.f32.mxu1 %vm671_vm2, %v6076_v54  ;;  %v6079_v0 = vmax.f32 %v6075_v63, 0.0  ;;  %v8346_v20 = vld [vmem:[%s9631_s28 + $0xc0] sm:$0xff]  ;;  %v8340_v63 = vld [vmem:[%s9643_s29 + $0xc] ss:$0 sm:$0xff] }
 0xac0   : > { %v5414_v2 = vsub.f32 %v10339_v18, %v5413_v8  ;;  %v5415_v9 = vsub.f32 %v10337_v3, %v5413_v8  ;;  %v5416_v60 = vsub.f32 %v5392_v46, %v5413_v8  ;;  %v5417_v52 = vsub.f32 %v5397_v45, %v5413_v8  ;;  %9089 = vmatmul.mubr.msk.f32.vlgmr.msra.gmra.mxu1 %vm671_vm2, %v6077_v11  ;;  %v8356_v46 = vld [vmem:[%s9498_s26 + $0x1a8] sm:$0xff] }
 0xac1   : > { %v6078_v13 = vmax.f32 %v6074_v61, 0.0  ;;  %9105 = vmatpush3.msra.mxu1 %v8363_v59  ;;  %9096 = vmatprep.subr.mxu0 %v8346_v20  ;;  %v8373_v59 = vld [vmem:[%s9561_s25 + $0xd8] sm:$0x3] }
 0xac2   : > { %v5418_v53 = vmul.f32 %v5414_v2, %v5414_v2  ;;  %v5419_v42 = vmul.f32 %v5415_v9, %v5415_v9  ;;  %v5420_v48 = vmul.f32 %v5416_v60, %v5416_v60  ;;  %v5421_v29 = vmul.f32 %v5417_v52, %v5417_v52  ;;  %9097 = vmatpush3.msra.mxu0 %v8346_v20 }
 0xac3   : > { %9091 = vmatprep.mubr.msk.f32.mxu1 %vm671_vm2, %v6078_v13  ;;  %9112 = vmatprep.subr.msk.mxu0 %vm684_vm1, %v8373_v59 }
 0xac4   : > { %v5422_v18 = vsel %vm549_vm0, %v5418_v53, 0.0  ;;  %v5423_v3 = vsel %vm549_vm0, %v5419_v42, 0.0  ;;  %9092 = vmatmul.mubr.msk.f32.gmra.mxu1 %vm671_vm2, %v6079_v0  ;;  %v5425_v31 = vsel %vm549_vm0, %v5420_v48, 0.0  ;;  %v5427_v12 = vsel %vm549_vm0, %v5421_v29, 0.0  ;;  %v8365_v42 = vld [vmem:[%s9603_s14 + $0xd] ss:$0 sm:$0xff] }
 0xac5   : > { %v5424_v45 = vadd.f32 %v5423_v3, %v5422_v18  ;;  %9106 = vmatprep.mubr.msk.f32.mxu1 %vm549_vm0, %v8355_v10 }
 0xac7   : > { %v5426_v55 = vadd.f32 %v5425_v31, %v5424_v45 }
 0xac8   : > { %9107 = vmatmul.mubr.msk.f32.vlgmr.msra.gmra.mxu1 %vm549_vm0, %v8356_v46  ;;  %v6417_v46 = vmul.f32 %v8365_v42, %v9883_v14  ;;  %v6419_v14 = vmul.f32 %v8365_v42, %v9887_v16 }
 0xac9   : > { %v5428_v37 = vadd.f32 %v5427_v12, %v5426_v55  ;;  %9109 = vmatprep.mubr.msk.f32.mxu1 %vm549_vm0, %v8357_v41  ;;  %v8372_v41 = vld [vmem:[%s9561_s25 + $0xd0] sm:$0xff] }
 0xacb   : > { %v5429_v26 = vrot.slane %v5428_v37, 4 }
 0xacc   : > { %9110 = vmatmul.mubr.msk.f32.gmra.mxu1 %vm549_vm0, %v8358_v50 }
 0xacd   : > { %v5430_v27 = vadd.f32 %v5429_v26, %v5428_v37  ;;  %v6416_v37 = vmul.f32 %v8365_v42, %v9885_v15 }
 0xacf   : > { %v5431_v39 = vrot.slane %v5430_v27, 2 }
 0xad1   : > { %v5432_v47 = vadd.f32 %v5431_v39, %v5430_v27  ;;  %v8371_v27 = vld [vmem:[%s9610_s24 + $0xd] ss:$0 sm:$0xff]  ;;  %v8398_v39 = vld [vmem:[%s9508_s17 + $0x70] sm:$0xff] }
 0xad3   : > { %v5433_v1 = vrot.slane %v5432_v47, 1 }
 0xad5   : > { %v5434_v4 = vadd.f32 %v5433_v1, %v5432_v47 }
 0xad7   : > { %v5435_v7 = vmul.f32 0.032258064, %v5434_v4 }
 0xad9   : > { %9287 = vrsqrt.f32 %v5435_v7  ;;  %vm5438_vm6 = vcmp.eq.f32.partialorder %v5435_v7, inf  ;;  %v5441_v49 = vand.u32 2147483648, %v5435_v7  ;;  %vm5440_vm7 = vcmp.eq.f32.partialorder %v5435_v7, 0.0 }
 0xae6   : > { %v9288_v22 = vpop.eup %9287 }
 0xae7   : > { %v5437_v33 = vmul.f32 %v9288_v22, %v5435_v7 }
 0xae9   : > { %v5439_v57 = vsel %vm5438_vm6, %v5435_v7, %v5437_v33 }
 0xaea   : > { %v5442_v43 = vsel %vm5440_vm7, %v5441_v49, %v5439_v57  ;;  %v10637_v49 = vld [vmem:[#allocation5_spill] sm:$0xff] }
 0xaeb   : > { %v5443_v40 = vadd.f32 1e-05, %v5442_v43  ;;  %v6418_v57 = vmul.f32 %v8365_v42, %v10637_v49 }
 0xaed   : > { %9289 = vrcp.f32 %v5443_v40 }
 0xafa   : > { %v9290_v21 = vpop.eup %9289 }
 0xafb   : > { %v5446_v28 = vmul.f32 %v9290_v21, %v5415_v9  ;;  %v5445_v23 = vmul.f32 %v9290_v21, %v5414_v2  ;;  %v5447_v58 = vmul.f32 %v9290_v21, %v5416_v60  ;;  %v5448_v36 = vmul.f32 %v9290_v21, %v5417_v52 }
 0xafd   : > { %5455 = vrot.lane.b32.xlu1 %v5446_v28, %s9383_s23  ;;  %5453 = vrot.lane.b32.xlu0 %v5445_v23, %s9383_s23 }
 0xb01   : > { %5459 = vrot.lane.b32.xlu1 %v5448_v36, %s9383_s23  ;;  %5457 = vrot.lane.b32.xlu0 %v5447_v58, %s9383_s23  ;;  %s9384_s23 = smov 88  }
 0xb6f   : > { %v5456_v51 = vpop.permute.xlu1 %5455  ;;  %v5454_v56 = vpop.permute.xlu0 %5453 }
 0xb70   : > { %5467 = vst.msk [vmem:[%s9729_s22 + $0x8] sm:$0xff] %vm5465_vm8, %v5456_v51  ;;  %5466 = vst.msk [vmem:[%s9729_s22] sm:$0xff] %vm5465_vm8, %v5454_v56 }
 0xb73   : > { %v5460_v38 = vpop.permute.xlu1 %5459  ;;  %v5458_v6 = vpop.permute.xlu0 %5457 }
 0xb74   : > { %5469 = vst.msk [vmem:[%s9729_s22 + $0x18] sm:$0xff] %vm5465_vm8, %v5460_v38  ;;  %5468 = vst.msk [vmem:[%s9729_s22 + $0x10] sm:$0xff] %vm5465_vm8, %v5458_v6 }
 0xb76   : > { %v9072_v25 = vpop.f32.mrf.mxu1 }
 0xb77   : > { %v10390_v5 = vadd.f32 %v9072_v25, %v8314_v30 }
 0xb78   : > { %v5834_v17 = vpop.f32.mrf.mxu1 }
 0xb79   : > { %v10392_v19 = vadd.f32 %v8314_v30, %v5834_v17  ;;  %v5854_v24 = vsel %vm549_vm0, %v10390_v5, 0.0 }
 0xb7a   : > { %v9075_v35 = vpop.f32.mrf.mxu1 }
 0xb7b   : > { %v5853_v34 = vsel %vm549_vm0, %v10392_v19, 0.0  ;;  %v5850_v54 = vadd.f32 %v9075_v35, %v8314_v30 }
 0xb7c   : > { %v5844_v62 = vpop.f32.mrf.mxu1  ;;  %v5855_v8 = vadd.f32 %v5854_v24, %v5853_v34  ;;  %v8390_v34 = vld [vmem:[%s9498_s26 + $0x1c0] sm:$0xff] }
 0xb7d   : > { %v5845_v44 = vadd.f32 %v8314_v30, %v5844_v62  ;;  %v5858_v9 = vsel %vm549_vm0, %v5850_v54, 0.0 }
 0xb7f   : > { %v5856_v11 = vsel %vm549_vm0, %v5845_v44, 0.0 }
 0xb80   : > { %v5857_v61 = vadd.f32 %v5856_v11, %v5855_v8  ;;  %v9090_v2 = vpop.f32.mrf.mxu1  ;;  %v8392_v8 = vld [vmem:[%s9498_s26 + $0x1d0] sm:$0xff] }
 0xb81   : > { %v6178_v52 = vadd.f32 %v9090_v2, %v8340_v63  ;;  %v8393_v2 = vld [vmem:[%s9498_s26 + $0x1d8] sm:$0xff] }
 0xb82   : > { %v5859_v60 = vadd.f32 %v5858_v9, %v5857_v61  ;;  %v6172_v13 = vpop.f32.mrf.mxu1 }
 0xb83   : > { %v6173_v53 = vadd.f32 %v8340_v63, %v6172_v13  ;;  %v6192_v18 = vmax.f32 %v6178_v52, 0.0 }
 0xb84   : > { %v5860_v48 = vrot.slane %v5859_v60, 4  ;;  %v9093_v0 = vpop.f32.mrf.mxu1 }
 0xb85   : > { %v6191_v10 = vmax.f32 %v6173_v53, 0.0  ;;  %v6188_v3 = vadd.f32 %v9093_v0, %v8340_v63 }
 0xb86   : > { %v5861_v29 = vadd.f32 %v5860_v48, %v5859_v60  ;;  %v6182_v45 = vpop.f32.mrf.mxu1 }
 0xb87   : > { %v6183_v31 = vadd.f32 %v8340_v63, %v6182_v45  ;;  %9098 = vmatprep.mubr.msk.f32.mxu0 %vm671_vm2, %v6191_v10  ;;  %v6194_v1 = vmax.f32 %v6188_v3, 0.0 }
 0xb88   : > { %v5862_v55 = vrot.slane %v5861_v29, 2  ;;  %9099 = vmatmul.mubr.msk.f32.vlgmr.msra.gmra.mxu0 %vm671_vm2, %v6192_v18  ;;  %v9108_v12 = vpop.f32.mrf.mxu1 }
 0xb89   : > { %v6193_v50 = vmax.f32 %v6183_v31, 0.0  ;;  %v6504_v26 = vadd.f32 %v9108_v12, %v6417_v46  ;;  %9113 = vmatpush3.msk.msra.mxu0 %vm684_vm1, %v8373_v59 }
 0xb8a   : > { %v5863_v47 = vadd.f32 %v5862_v55, %v5861_v29  ;;  %v6498_v4 = vpop.f32.mrf.mxu1  ;;  %9114 = vmatprep.subr.mxu0 %v8372_v41 }
 0xb8b   : > { %v6499_v7 = vadd.f32 %v6498_v4, %v6416_v37  ;;  %9101 = vmatprep.mubr.msk.f32.mxu0 %vm671_vm2, %v6193_v50  ;;  %9115 = vmatpush3.msra.mxu0 %v8372_v41  ;;  %v6526_v33 = vadd.f32 %v8371_v27, %v6504_v26  ;;  %v8382_v37 = vld [vmem:[%s9631_s28 + $0xd8] sm:$0x3]  ;;  %v8381_v50 = vld [vmem:[%s9631_s28 + $0xd0] sm:$0xff]  ;;  %v8408_v26 = vld [vmem:[%s9561_s25 + $0xe8] sm:$0x3] }
 0xb8c   : > { %v5864_v22 = vrot.slane %v5863_v47, 1  ;;  %9102 = vmatmul.mubr.msk.f32.gmra.mxu0 %vm671_vm2, %v6194_v1  ;;  %v9111_v15 = vpop.f32.mrf.mxu1  ;;  %9132 = vmatprep.subr.mxu0 %v8398_v39 }
 0xb8d   : > { %v6525_v43 = vadd.f32 %v8371_v27, %v6499_v7  ;;  %v6514_v40 = vadd.f32 %v9111_v15, %v6419_v14  ;;  %v6530_v16 = vmax.f32 %v6526_v33, 0.0  ;;  %9122 = vmatprep.subr.msk.mxu1 %vm684_vm1, %v8382_v37  ;;  %v8349_v14 = vld [vmem:[%s9677_s16 + $0xc] ss:$0 sm:$0xff] }
 0xb8e   : > { %v5865_v21 = vadd.f32 %v5864_v22, %v5863_v47  ;;  %v6508_v28 = vpop.f32.mrf.mxu1  ;;  %9123 = vmatpush3.msk.msra.mxu1 %vm684_vm1, %v8382_v37 }
 0xb8f   : > { %v6529_v23 = vmax.f32 %v6525_v43, 0.0  ;;  %v6509_v58 = vadd.f32 %v6508_v28, %v6418_v57  ;;  %v6528_v32 = vadd.f32 %v8371_v27, %v6514_v40  ;;  %9124 = vmatprep.subr.mxu1 %v8381_v50 }
 0xb90   : > { %v5866_v36 = vmul.f32 0.03125, %v5865_v21  ;;  %9125 = vmatpush3.msra.mxu1 %v8381_v50 }
 0xb91   : > { %v6527_v20 = vadd.f32 %v8371_v27, %v6509_v58  ;;  %9116 = vmatprep.mubr.msk.f32.mxu0 %vm671_vm2, %v6529_v23  ;;  %v6532_v35 = vmax.f32 %v6528_v32, 0.0  ;;  %9140 = vmatprep.subr.msk.mxu1 %vm684_vm1, %v8408_v26  ;;  %v8375_v58 = vld [vmem:[%s9643_s29 + $0xd] ss:$0 sm:$0xff] }
 0xb92   : > { %v5867_v59 = vsub.f32 %v10392_v19, %v5866_v36  ;;  %v5868_v51 = vsub.f32 %v10390_v5, %v5866_v36  ;;  %v5869_v56 = vsub.f32 %v5845_v44, %v5866_v36  ;;  %v5870_v38 = vsub.f32 %v5850_v54, %v5866_v36  ;;  %9117 = vmatmul.mubr.msk.f32.vlgmr.msra.gmra.mxu0 %vm671_vm2, %v6530_v16  ;;  %v8391_v54 = vld [vmem:[%s9498_s26 + $0x1c8] sm:$0xff] }
 0xb93   : > { %v6531_v6 = vmax.f32 %v6527_v20, 0.0  ;;  %9133 = vmatpush3.msra.mxu0 %v8398_v39 }
 0xb94   : > { %v5871_v25 = vmul.f32 %v5867_v59, %v5867_v59  ;;  %v5872_v30 = vmul.f32 %v5868_v51, %v5868_v51  ;;  %v5873_v17 = vmul.f32 %v5869_v56, %v5869_v56  ;;  %v5874_v62 = vmul.f32 %v5870_v38, %v5870_v38 }
 0xb95   : > { %9119 = vmatprep.mubr.msk.f32.mxu0 %vm671_vm2, %v6531_v6 }
 0xb96   : > { %v5875_v19 = vsel %vm549_vm0, %v5871_v25, 0.0  ;;  %v5876_v5 = vsel %vm549_vm0, %v5872_v30, 0.0  ;;  %9120 = vmatmul.mubr.msk.f32.gmra.mxu0 %vm671_vm2, %v6532_v35  ;;  %v5878_v44 = vsel %vm549_vm0, %v5873_v17, 0.0  ;;  %v5880_v63 = vsel %vm549_vm0, %v5874_v62, 0.0 }
 0xb97   : > { %v5877_v24 = vadd.f32 %v5876_v5, %v5875_v19  ;;  %9134 = vmatprep.mubr.msk.f32.mxu0 %vm549_vm0, %v8390_v34  ;;  %v10638_v19 = vld [vmem:[#allocation6_spill] sm:$0xff] }
 0xb99   : > { %v5879_v11 = vadd.f32 %v5878_v44, %v5877_v24 }
 0xb9a   : > { %9135 = vmatmul.mubr.msk.f32.vlgmr.msra.gmra.mxu0 %vm549_vm0, %v8391_v54  ;;  %v8407_v54 = vld [vmem:[%s9561_s25 + $0xe0] sm:$0xff] }
 0xb9b   : > { %v5881_v61 = vadd.f32 %v5880_v63, %v5879_v11  ;;  %9137 = vmatprep.mubr.msk.f32.mxu0 %vm549_vm0, %v8392_v8  ;;  %v10639_v11 = vld [vmem:[#allocation7_spill] sm:$0xff] }
 0xb9d   : > { %v5882_v9 = vrot.slane %v5881_v61, 4 }
 0xb9e   : > { %9138 = vmatmul.mubr.msk.f32.gmra.mxu0 %vm549_vm0, %v8393_v2 }
 0xb9f   : > { %v5883_v60 = vadd.f32 %v5882_v9, %v5881_v61  ;;  %v8406_v9 = vld [vmem:[%s9610_s24 + $0xe] ss:$0 sm:$0xff] }
 0xba1   : > { %v5884_v52 = vrot.slane %v5883_v60, 2 }
 0xba3   : > { %v5885_v13 = vadd.f32 %v5884_v52, %v5883_v60  ;;  %v8433_v60 = vld [vmem:[%s9508_s17 + $0x78] sm:$0xff]  ;;  %s9386_s17 = smov 104  }
 0xba5   : > { %v5886_v53 = vrot.slane %v5885_v13, 1 }
 0xba7   : > { %v5887_v42 = vadd.f32 %v5886_v53, %v5885_v13 }
 0xba9   : > { %v5888_v48 = vmul.f32 0.032258064, %v5887_v42  ;;  %v10640_v42 = vld [vmem:[#allocation8_spill] sm:$0xff] }
 0xbab   : > { %9291 = vrsqrt.f32 %v5888_v48  ;;  %vm5891_vm9 = vcmp.eq.f32.partialorder %v5888_v48, inf  ;;  %v5894_v29 = vand.u32 2147483648, %v5888_v48  ;;  %vm5893_vm10 = vcmp.eq.f32.partialorder %v5888_v48, 0.0 }
 0xbb8   : > { %v9292_v0 = vpop.eup %9291 }
 0xbb9   : > { %v5890_v10 = vmul.f32 %v9292_v0, %v5888_v48 }
 0xbbb   : > { %v5892_v18 = vsel %vm5891_vm9, %v5888_v48, %v5890_v10 }
 0xbbc   : > { %v5895_v3 = vsel %vm5893_vm10, %v5894_v29, %v5892_v18 }
 0xbbd   : > { %v5896_v45 = vadd.f32 1e-05, %v5895_v3  ;;  %v10641_v3 = vld [vmem:[#allocation9_spill] sm:$0xff] }
 0xbbf   : > { %9293 = vrcp.f32 %v5896_v45 }
 0xbcc   : > { %v9294_v46 = vpop.eup %9293 }
 0xbcd   : > { %v5899_v31 = vmul.f32 %v9294_v46, %v5868_v51  ;;  %v5898_v41 = vmul.f32 %v9294_v46, %v5867_v59  ;;  %v5900_v55 = vmul.f32 %v9294_v46, %v5869_v56  ;;  %v5901_v12 = vmul.f32 %v9294_v46, %v5870_v38  ;;  %v8400_v38 = vld [vmem:[%s9603_s14 + $0xe] ss:$0 sm:$0xff] }
 0xbce   : > { %v6870_v5 = vmul.f32 %v8400_v38, %v10638_v19  ;;  %v6869_v63 = vmul.f32 %v8400_v38, %v10639_v11  ;;  %v6872_v48 = vmul.f32 %v8400_v38, %v10640_v42  ;;  %v6871_v45 = vmul.f32 %v8400_v38, %v10641_v3 }
 0xbcf   : > { %5908 = vrot.lane.b32.xlu1 %v5899_v31, %s9384_s23  ;;  %5906 = vrot.lane.b32.xlu0 %v5898_v41, %s9384_s23 }
 0xbd3   : > { %5912 = vrot.lane.b32.xlu1 %v5901_v12, %s9384_s23  ;;  %5910 = vrot.lane.b32.xlu0 %v5900_v55, %s9384_s23 }
 0xc41   : > { %v5909_v27 = vpop.permute.xlu1 %5908  ;;  %v5907_v39 = vpop.permute.xlu0 %5906 }
 0xc42   : > { %5920 = vst.msk [vmem:[%s9729_s22 + $0x8] sm:$0xff] %vm5918_vm11, %v5909_v27  ;;  %5919 = vst.msk [vmem:[%s9729_s22] sm:$0xff] %vm5918_vm11, %v5907_v39 }
 0xc45   : > { %v5913_v47 = vpop.permute.xlu1 %5912  ;;  %v5911_v1 = vpop.permute.xlu0 %5910 }
 0xc46   : > { %5922 = vst.msk [vmem:[%s9729_s22 + $0x18] sm:$0xff] %vm5918_vm11, %v5913_v47  ;;  %5921 = vst.msk [vmem:[%s9729_s22 + $0x10] sm:$0xff] %vm5918_vm11, %v5911_v1 }
 0xc48   : > { %v9100_v4 = vpop.f32.mrf.mxu0 }
 0xc49   : > { %v10443_v22 = vadd.f32 %v9100_v4, %v8349_v14 }
 0xc4a   : > { %v6287_v7 = vpop.f32.mrf.mxu0 }
 0xc4b   : > { %v10445_v33 = vadd.f32 %v8349_v14, %v6287_v7  ;;  %v6307_v43 = vsel %vm549_vm0, %v10443_v22, 0.0 }
 0xc4c   : > { %v9103_v15 = vpop.f32.mrf.mxu0 }
 0xc4d   : > { %v6306_v49 = vsel %vm549_vm0, %v10445_v33, 0.0  ;;  %v6303_v40 = vadd.f32 %v9103_v15, %v8349_v14 }
 0xc4e   : > { %v6297_v57 = vpop.f32.mrf.mxu0  ;;  %v6308_v28 = vadd.f32 %v6307_v43, %v6306_v49 }
 0xc4f   : > { %v6298_v21 = vadd.f32 %v8349_v14, %v6297_v57  ;;  %v6311_v32 = vsel %vm549_vm0, %v6303_v40, 0.0 }
 0xc51   : > { %v6309_v23 = vsel %vm549_vm0, %v6298_v21, 0.0 }
 0xc52   : > { %v6310_v36 = vadd.f32 %v6309_v23, %v6308_v28  ;;  %v9118_v16 = vpop.f32.mrf.mxu0  ;;  %v8425_v28 = vld [vmem:[%s9498_s26 + $0x1e0] sm:$0xff] }
 0xc53   : > { %v6631_v59 = vadd.f32 %v9118_v16, %v8375_v58 }
 0xc54   : > { %v6312_v20 = vadd.f32 %v6311_v32, %v6310_v36  ;;  %v6625_v51 = vpop.f32.mrf.mxu0  ;;  %v8427_v36 = vld [vmem:[%s9498_s26 + $0x1f0] sm:$0xff] }
 0xc55   : > { %v6626_v56 = vadd.f32 %v8375_v58, %v6625_v51  ;;  %v6645_v35 = vmax.f32 %v6631_v59, 0.0  ;;  %v8428_v59 = vld [vmem:[%s9498_s26 + $0x1f8] sm:$0xff] }
 0xc56   : > { %v6313_v6 = vrot.slane %v6312_v20, 4  ;;  %v9121_v25 = vpop.f32.mrf.mxu0 }
 0xc57   : > { %v6644_v30 = vmax.f32 %v6626_v56, 0.0  ;;  %v6641_v34 = vadd.f32 %v9121_v25, %v8375_v58 }
 0xc58   : > { %v6314_v17 = vadd.f32 %v6313_v6, %v6312_v20  ;;  %v6635_v62 = vpop.f32.mrf.mxu0 }
 0xc59   : > { %v6636_v24 = vadd.f32 %v8375_v58, %v6635_v62  ;;  %9126 = vmatprep.mubr.msk.f32.mxu1 %vm671_vm2, %v6644_v30  ;;  %v6647_v13 = vmax.f32 %v6641_v34, 0.0 }
 0xc5a   : > { %v6315_v44 = vrot.slane %v6314_v17, 2  ;;  %9127 = vmatmul.mubr.msk.f32.vlgmr.msra.gmra.mxu1 %vm671_vm2, %v6645_v35  ;;  %v9136_v8 = vpop.f32.mrf.mxu0 }
 0xc5b   : > { %v6646_v61 = vmax.f32 %v6636_v24, 0.0  ;;  %v6957_v2 = vadd.f32 %v9136_v8, %v6870_v5  ;;  %9141 = vmatpush3.msk.msra.mxu1 %vm684_vm1, %v8408_v26 }
 0xc5c   : > { %v6316_v52 = vadd.f32 %v6315_v44, %v6314_v17  ;;  %v6951_v53 = vpop.f32.mrf.mxu0  ;;  %9142 = vmatprep.subr.mxu1 %v8407_v54 }
 0xc5d   : > { %v6952_v0 = vadd.f32 %v6951_v53, %v6869_v63  ;;  %9129 = vmatprep.mubr.msk.f32.mxu1 %vm671_vm2, %v6646_v61  ;;  %9143 = vmatpush3.msra.mxu1 %v8407_v54  ;;  %v6979_v29 = vadd.f32 %v8406_v9, %v6957_v2  ;;  %v8417_v61 = vld [vmem:[%s9631_s28 + $0xe8] sm:$0x3]  ;;  %v8416_v2 = vld [vmem:[%s9631_s28 + $0xe0] sm:$0xff] }
 0xc5e   : > { %v6317_v10 = vrot.slane %v6316_v52, 1  ;;  %9130 = vmatmul.mubr.msk.f32.gmra.mxu1 %vm671_vm2, %v6647_v13  ;;  %v9139_v18 = vpop.f32.mrf.mxu0  ;;  %9160 = vmatprep.subr.mxu1 %v8433_v60 }
 0xc5f   : > { %v6978_v46 = vadd.f32 %v8406_v9, %v6952_v0  ;;  %v6967_v31 = vadd.f32 %v9139_v18, %v6872_v48  ;;  %v6983_v26 = vmax.f32 %v6979_v29, 0.0  ;;  %9150 = vmatprep.subr.msk.mxu0 %vm684_vm1, %v8417_v61  ;;  %v8384_v48 = vld [vmem:[%s9677_s16 + $0xd] ss:$0 sm:$0xff] }
 0xc60   : > { %v6318_v41 = vadd.f32 %v6317_v10, %v6316_v52  ;;  %v6961_v55 = vpop.f32.mrf.mxu0  ;;  %9151 = vmatpush3.msk.msra.mxu0 %vm684_vm1, %v8417_v61 }
 0xc61   : > { %v6982_v12 = vmax.f32 %v6978_v46, 0.0  ;;  %v6962_v37 = vadd.f32 %v6961_v55, %v6871_v45  ;;  %v6981_v27 = vadd.f32 %v8406_v9, %v6967_v31  ;;  %9152 = vmatprep.subr.mxu0 %v8416_v2 }
 0xc62   : > { %v6319_v50 = vmul.f32 0.03125, %v6318_v41  ;;  %9153 = vmatpush3.msra.mxu0 %v8416_v2 }
 0xc63   : > { %v6980_v39 = vadd.f32 %v8406_v9, %v6962_v37  ;;  %9144 = vmatprep.mubr.msk.f32.mxu1 %vm671_vm2, %v6982_v12  ;;  %v6985_v43 = vmax.f32 %v6981_v27, 0.0  ;;  %v8443_v9 = vld [vmem:[%s9561_s25 + $0xf8] sm:$0x3]  ;;  %v8410_v37 = vld [vmem:[%s9643_s29 + $0xe] ss:$0 sm:$0xff] }
 0xc64   : > { %v6320_v47 = vsub.f32 %v10445_v33, %v6319_v50  ;;  %v6321_v1 = vsub.f32 %v10443_v22, %v6319_v50  ;;  %v6322_v4 = vsub.f32 %v6298_v21, %v6319_v50  ;;  %v6323_v14 = vsub.f32 %v6303_v40, %v6319_v50  ;;  %9145 = vmatmul.mubr.msk.f32.vlgmr.msra.gmra.mxu1 %vm671_vm2, %v6983_v26  ;;  %v8426_v21 = vld [vmem:[%s9498_s26 + $0x1e8] sm:$0xff]  ;;  %s9385_s26 = smov 96  }
 0xc65   : > { %v6984_v7 = vmax.f32 %v6980_v39, 0.0  ;;  %9161 = vmatpush3.msra.mxu1 %v8433_v60  ;;  %9168 = vmatprep.subr.msk.mxu0 %vm684_vm1, %v8443_v9 }
 0xc66   : > { %v6324_v15 = vmul.f32 %v6320_v47, %v6320_v47  ;;  %v6325_v49 = vmul.f32 %v6321_v1, %v6321_v1  ;;  %v6326_v57 = vmul.f32 %v6322_v4, %v6322_v4  ;;  %v6327_v23 = vmul.f32 %v6323_v14, %v6323_v14 }
 0xc67   : > { %9147 = vmatprep.mubr.msk.f32.mxu1 %vm671_vm2, %v6984_v7 }
 0xc68   : > { %v6328_v33 = vsel %vm549_vm0, %v6324_v15, 0.0  ;;  %v6329_v22 = vsel %vm549_vm0, %v6325_v49, 0.0  ;;  %9148 = vmatmul.mubr.msk.f32.gmra.mxu1 %vm671_vm2, %v6985_v43  ;;  %v6331_v58 = vsel %vm549_vm0, %v6326_v57, 0.0  ;;  %v6333_v32 = vsel %vm549_vm0, %v6327_v23, 0.0 }
 0xc69   : > { %v6330_v40 = vadd.f32 %v6329_v22, %v6328_v33  ;;  %9162 = vmatprep.mubr.msk.f32.mxu1 %vm549_vm0, %v8425_v28  ;;  %v10642_v33 = vld [vmem:[#allocation10_spill] sm:$0xff] }
 0xc6b   : > { %v6332_v16 = vadd.f32 %v6331_v58, %v6330_v40 }
 0xc6c   : > { %9163 = vmatmul.mubr.msk.f32.vlgmr.msra.gmra.mxu1 %vm549_vm0, %v8426_v21  ;;  %v8442_v21 = vld [vmem:[%s9561_s25 + $0xf0] sm:$0xff]  ;;  %s9387_s25 = smov 112  }
 0xc6d   : > { %v6334_v20 = vadd.f32 %v6333_v32, %v6332_v16  ;;  %9165 = vmatprep.mubr.msk.f32.mxu1 %vm549_vm0, %v8427_v36  ;;  %v10643_v16 = vld [vmem:[#allocation11_spill] sm:$0xff] }
 0xc6f   : > { %v6335_v51 = vrot.slane %v6334_v20, 4 }
 0xc70   : > { %9166 = vmatmul.mubr.msk.f32.gmra.mxu1 %vm549_vm0, %v8428_v59 }
 0xc71   : > { %v6336_v56 = vadd.f32 %v6335_v51, %v6334_v20  ;;  %v8441_v51 = vld [vmem:[%s9610_s24 + $0xf] ss:$0 sm:$0xff]  ;;  %s8461_s24 = sshll.u32 %s9463_s13, 7  ;;  %s10575_s13 = scalar_lea.sflag [#allocation3], %s452_s21 }
 0xc72   : > { %s10567_s23 = scalar_lea.hbm %s10625_s9, %s8461_s24 }
 0xc73   : > { %v6337_v38 = vrot.slane %v6336_v56, 2 }
 0xc75   : > { %v6338_v6 = vadd.f32 %v6337_v38, %v6336_v56 }
 0xc77   : > { %v6339_v25 = vrot.slane %v6338_v6, 1 }
 0xc79   : > { %v6340_v30 = vadd.f32 %v6339_v25, %v6338_v6  ;;  %v10644_v25 = vld [vmem:[#allocation12_spill] sm:$0xff] }
 0xc7b   : > { %v6341_v17 = vmul.f32 0.032258064, %v6340_v30 }
 0xc7d   : > { %9295 = vrsqrt.f32 %v6341_v17  ;;  %vm6344_vm12 = vcmp.eq.f32.partialorder %v6341_v17, inf  ;;  %v6347_v62 = vand.u32 2147483648, %v6341_v17  ;;  %vm6346_vm13 = vcmp.eq.f32.partialorder %v6341_v17, 0.0 }
 0xc8a   : > { %v9296_v35 = vpop.eup %9295 }
 0xc8b   : > { %v6343_v34 = vmul.f32 %v9296_v35, %v6341_v17 }
 0xc8d   : > { %v6345_v19 = vsel %vm6344_vm12, %v6341_v17, %v6343_v34 }
 0xc8e   : > { %v6348_v5 = vsel %vm6346_vm13, %v6347_v62, %v6345_v19  ;;  %v10645_v19 = vld [vmem:[#allocation13_spill] sm:$0xff] }
 0xc8f   : > { %v6349_v24 = vadd.f32 1e-05, %v6348_v5 }
 0xc91   : > { %9297 = vrcp.f32 %v6349_v24 }
 0xc9e   : > { %v9298_v54 = vpop.eup %9297 }
 0xc9f   : > { %v6352_v44 = vmul.f32 %v9298_v54, %v6321_v1  ;;  %v6351_v8 = vmul.f32 %v9298_v54, %v6320_v47  ;;  %v6353_v11 = vmul.f32 %v9298_v54, %v6322_v4  ;;  %v6354_v63 = vmul.f32 %v9298_v54, %v6323_v14  ;;  %v8435_v14 = vld [vmem:[%s9603_s14 + $0xf] ss:$0 sm:$0xff]  ;;  %s9388_s14 = smov 120  }
 0xca0   : > { %v7323_v22 = vmul.f32 %v8435_v14, %v10642_v33  ;;  %v7322_v32 = vmul.f32 %v8435_v14, %v10643_v16  ;;  %v7325_v30 = vmul.f32 %v8435_v14, %v10644_v25  ;;  %v7324_v5 = vmul.f32 %v8435_v14, %v10645_v19 }
 0xca1   : > { %6361 = vrot.lane.b32.xlu1 %v6352_v44, %s9385_s26  ;;  %6359 = vrot.lane.b32.xlu0 %v6351_v8, %s9385_s26 }
 0xca5   : > { %6365 = vrot.lane.b32.xlu1 %v6354_v63, %s9385_s26  ;;  %6363 = vrot.lane.b32.xlu0 %v6353_v11, %s9385_s26 }
 0xd13   : > { %v6362_v60 = vpop.permute.xlu1 %6361  ;;  %v6360_v52 = vpop.permute.xlu0 %6359 }
 0xd14   : > { %6373 = vst.msk [vmem:[%s9729_s22 + $0x8] sm:$0xff] %vm6371_vm14, %v6362_v60  ;;  %6372 = vst.msk [vmem:[%s9729_s22] sm:$0xff] %vm6371_vm14, %v6360_v52 }
 0xd17   : > { %v6366_v13 = vpop.permute.xlu1 %6365  ;;  %v6364_v53 = vpop.permute.xlu0 %6363 }
 0xd18   : > { %6375 = vst.msk [vmem:[%s9729_s22 + $0x18] sm:$0xff] %vm6371_vm14, %v6366_v13  ;;  %6374 = vst.msk [vmem:[%s9729_s22 + $0x10] sm:$0xff] %vm6371_vm14, %v6364_v53 }
 0xd1a   : > { %v9128_v42 = vpop.f32.mrf.mxu1 }
 0xd1b   : > { %v10496_v10 = vadd.f32 %v9128_v42, %v8384_v48 }
 0xd1c   : > { %v6740_v0 = vpop.f32.mrf.mxu1 }
 0xd1d   : > { %v6741_v29 = vadd.f32 %v8384_v48, %v6740_v0  ;;  %v6760_v46 = vsel %vm549_vm0, %v10496_v10, 0.0 }
 0xd1e   : > { %v9131_v18 = vpop.f32.mrf.mxu1 }
 0xd1f   : > { %v6759_v3 = vsel %vm549_vm0, %v6741_v29, 0.0  ;;  %v6756_v31 = vadd.f32 %v9131_v18, %v8384_v48 }
 0xd20   : > { %v6750_v45 = vpop.f32.mrf.mxu1  ;;  %v6761_v55 = vadd.f32 %v6760_v46, %v6759_v3 }
 0xd21   : > { %v6751_v41 = vadd.f32 %v8384_v48, %v6750_v45  ;;  %v6764_v27 = vsel %vm549_vm0, %v6756_v31, 0.0 }
 0xd23   : > { %v6762_v12 = vsel %vm549_vm0, %v6751_v41, 0.0 }
 0xd24   : > { %v6763_v50 = vadd.f32 %v6762_v12, %v6761_v55  ;;  %v9146_v26 = vpop.f32.mrf.mxu1 }
 0xd25   : > { %v7084_v47 = vadd.f32 %v9146_v26, %v8410_v37 }
 0xd26   : > { %v6765_v39 = vadd.f32 %v6764_v27, %v6763_v50  ;;  %v7078_v1 = vpop.f32.mrf.mxu1 }
 0xd27   : > { %v7079_v4 = vadd.f32 %v8410_v37, %v7078_v1  ;;  %v7098_v43 = vmax.f32 %v7084_v47, 0.0 }
 0xd28   : > { %v6766_v7 = vrot.slane %v6765_v39, 4  ;;  %v9149_v15 = vpop.f32.mrf.mxu1 }
 0xd29   : > { %v7097_v49 = vmax.f32 %v7079_v4, 0.0  ;;  %v7094_v28 = vadd.f32 %v9149_v15, %v8410_v37 }
 0xd2a   : > { %v6767_v57 = vadd.f32 %v6766_v7, %v6765_v39  ;;  %v7088_v23 = vpop.f32.mrf.mxu1 }
 0xd2b   : > { %v7089_v40 = vadd.f32 %v8410_v37, %v7088_v23  ;;  %9154 = vmatprep.mubr.msk.f32.mxu0 %vm671_vm2, %v7097_v49  ;;  %v7100_v38 = vmax.f32 %v7094_v28, 0.0 }
 0xd2c   : > { %v6768_v58 = vrot.slane %v6767_v57, 2  ;;  %9155 = vmatmul.mubr.msk.f32.vlgmr.msra.gmra.mxu0 %vm671_vm2, %v7098_v43  ;;  %v9164_v36 = vpop.f32.mrf.mxu1 }
 0xd2d   : > { %v7099_v20 = vmax.f32 %v7089_v40, 0.0  ;;  %v7410_v59 = vadd.f32 %v9164_v36, %v7323_v22  ;;  %9169 = vmatpush3.msk.msra.mxu0 %vm684_vm1, %v8443_v9 }
 0xd2e   : > { %v6769_v56 = vadd.f32 %v6768_v58, %v6767_v57  ;;  %v7404_v6 = vpop.f32.mrf.mxu1  ;;  %9170 = vmatprep.subr.mxu0 %v8442_v21  ;;  %v8451_v58 = vld [vmem:[%s9631_s28 + $0xf0] sm:$0xff] }
 0xd2f   : > { %v7405_v17 = vadd.f32 %v7404_v6, %v7322_v32  ;;  %9157 = vmatprep.mubr.msk.f32.mxu0 %vm671_vm2, %v7099_v20  ;;  %9171 = vmatpush3.msra.mxu0 %v8442_v21  ;;  %v7432_v34 = vadd.f32 %v8441_v51, %v7410_v59  ;;  %v8452_v21 = vld [vmem:[%s9631_s28 + $0xf8] sm:$0x3]  ;;  %s7748_s28 = sshll.u32 %s9729_s22, 4  ;;  %s10569_s28 = int_to_ptr.vmem [resolvable:$true] %s7748_s28 }
 0xd30   : > { %v6770_v35 = vrot.slane %v6769_v56, 1  ;;  %9158 = vmatmul.mubr.msk.f32.gmra.mxu0 %vm671_vm2, %v7100_v38  ;;  %v9167_v62 = vpop.f32.mrf.mxu1  ;;  %9178 = vmatprep.subr.msk.mxu1 %vm684_vm1, %v8452_v21  ;;  %s9311_s26 = scalar_lea.vmem %s10569_s28, 512 }
 0xd31   : > { %v7431_v24 = vadd.f32 %v8441_v51, %v7405_v17  ;;  %v7420_v54 = vadd.f32 %v9167_v62, %v7325_v30  ;;  %v7436_v2 = vmax.f32 %v7432_v34, 0.0  ;;  %9179 = vmatpush3.msk.msra.mxu1 %vm684_vm1, %v8452_v21  ;;  %p9312_p11 = scmp.ne.s32.totalorder %s10569_s28, %s9311_s26 }
 0xd32   : > { %v6771_v44 = vadd.f32 %v6770_v35, %v6769_v56  ;;  %v7414_v8 = vpop.f32.mrf.mxu1  ;;  %9180 = vmatprep.subr.mxu1 %v8451_v58 }
 0xd33   : > { %v7435_v11 = vmax.f32 %v7431_v24, 0.0  ;;  %v7415_v63 = vadd.f32 %v7414_v8, %v7324_v5  ;;  %v7434_v9 = vadd.f32 %v8441_v51, %v7420_v54  ;;  %9181 = vmatpush3.msra.mxu1 %v8451_v58  ;;  %v8445_v24 = vld [vmem:[%s9643_s29 + $0xf] ss:$0 sm:$0xff]  ;;  %p9313_p12 = pnand %p9312_p11, %p9480_p5 }
 0xd34   : > { %v6772_v61 = vmul.f32 0.03125, %v6771_v44 }
 0xd35   : > { %v7433_v60 = vadd.f32 %v8441_v51, %v7415_v63  ;;  %9172 = vmatprep.mubr.msk.f32.mxu0 %vm671_vm2, %v7435_v11  ;;  %v7438_v45 = vmax.f32 %v7434_v9, 0.0  ;;  %v8419_v51 = vld [vmem:[%s9677_s16 + $0xe] ss:$0 sm:$0xff]  ;;  %p9314_p13 = pneg %p9313_p12 }
 0xd36   : > { %v6773_v52 = vsub.f32 %v6741_v29, %v6772_v61  ;;  %v6774_v13 = vsub.f32 %v10496_v10, %v6772_v61  ;;  %v6775_v53 = vsub.f32 %v6751_v41, %v6772_v61  ;;  %v6776_v42 = vsub.f32 %v6756_v31, %v6772_v61  ;;  %9173 = vmatmul.mubr.msk.f32.vlgmr.msra.gmra.mxu0 %vm671_vm2, %v7436_v2 }
 0xd37   : > { %v7437_v48 = vmax.f32 %v7433_v60, 0.0 }
 0xd38   : > { %v6777_v0 = vmul.f32 %v6773_v52, %v6773_v52  ;;  %v6778_v18 = vmul.f32 %v6774_v13, %v6774_v13  ;;  %v6779_v3 = vmul.f32 %v6775_v53, %v6775_v53  ;;  %v6780_v46 = vmul.f32 %v6776_v42, %v6776_v42 }
 0xd39   : > { %9175 = vmatprep.mubr.msk.f32.mxu0 %vm671_vm2, %v7437_v48 }
 0xd3a   : > { %v6781_v55 = vsel %vm549_vm0, %v6777_v0, 0.0  ;;  %v6782_v12 = vsel %vm549_vm0, %v6778_v18, 0.0  ;;  %9176 = vmatmul.mubr.msk.f32.gmra.mxu0 %vm671_vm2, %v7438_v45  ;;  %v6784_v10 = vsel %vm549_vm0, %v6779_v3, 0.0  ;;  %v6786_v41 = vsel %vm549_vm0, %v6780_v46, 0.0 }
 0xd3b   : > { %v6783_v29 = vadd.f32 %v6782_v12, %v6781_v55 }
 0xd3d   : > { %v6785_v31 = vadd.f32 %v6784_v10, %v6783_v29 }
 0xd3f   : > { %v6787_v37 = vadd.f32 %v6786_v41, %v6785_v31 }
 0xd41   : > { %v6788_v50 = vrot.slane %v6787_v37, 4 }
 0xd43   : > { %v6789_v26 = vadd.f32 %v6788_v50, %v6787_v37 }
 0xd45   : > { %v6790_v27 = vrot.slane %v6789_v26, 2 }
 0xd47   : > { %v6791_v39 = vadd.f32 %v6790_v27, %v6789_v26 }
 0xd49   : > { %v6792_v47 = vrot.slane %v6791_v39, 1 }
 0xd4b   : > { %v6793_v1 = vadd.f32 %v6792_v47, %v6791_v39 }
 0xd4d   : > { %v6794_v4 = vmul.f32 0.032258064, %v6793_v1 }
 0xd4f   : > { %9299 = vrsqrt.f32 %v6794_v4  ;;  %vm6797_vm15 = vcmp.eq.f32.partialorder %v6794_v4, inf  ;;  %v6800_v15 = vand.u32 2147483648, %v6794_v4  ;;  %vm6799_vm3 = vcmp.eq.f32.partialorder %v6794_v4, 0.0 }
 0xd5c   : > { %v9300_v14 = vpop.eup %9299 }
 0xd5d   : > { %v6796_v7 = vmul.f32 %v9300_v14, %v6794_v4 }
 0xd5f   : > { %v6798_v49 = vsel %vm6797_vm15, %v6794_v4, %v6796_v7 }
 0xd60   : > { %v6801_v57 = vsel %vm6799_vm3, %v6800_v15, %v6798_v49 }
 0xd61   : > { %v6802_v43 = vadd.f32 1e-05, %v6801_v57 }
 0xd63   : > { %9301 = vrcp.f32 %v6802_v43 }
 0xd70   : > { %v9302_v28 = vpop.eup %9301 }
 0xd71   : > { %v6805_v23 = vmul.f32 %v9302_v28, %v6774_v13  ;;  %v6804_v33 = vmul.f32 %v9302_v28, %v6773_v52  ;;  %v6806_v22 = vmul.f32 %v9302_v28, %v6775_v53  ;;  %v6807_v40 = vmul.f32 %v9302_v28, %v6776_v42 }
 0xd73   : > { %6814 = vrot.lane.b32.xlu1 %v6805_v23, %s9386_s17  ;;  %6812 = vrot.lane.b32.xlu0 %v6804_v33, %s9386_s17 }
 0xd77   : > { %6818 = vrot.lane.b32.xlu1 %v6807_v40, %s9386_s17  ;;  %6816 = vrot.lane.b32.xlu0 %v6806_v22, %s9386_s17  ;;  %s9389_s17 = smov [#allocation2]  }
 0xde5   : > { %v6815_v36 = vpop.permute.xlu1 %6814  ;;  %v6813_v16 = vpop.permute.xlu0 %6812 }
 0xde6   : > { %6826 = vst.msk [vmem:[%s9729_s22 + $0x8] sm:$0xff] %vm6824_vm4, %v6815_v36  ;;  %6825 = vst.msk [vmem:[%s9729_s22] sm:$0xff] %vm6824_vm4, %v6813_v16 }
 0xde9   : > { %v6819_v32 = vpop.permute.xlu1 %6818  ;;  %v6817_v20 = vpop.permute.xlu0 %6816 }
 0xdea   : > { %6828 = vst.msk [vmem:[%s9729_s22 + $0x18] sm:$0xff] %vm6824_vm4, %v6819_v32  ;;  %6827 = vst.msk [vmem:[%s9729_s22 + $0x10] sm:$0xff] %vm6824_vm4, %v6817_v20 }
 0xdec   : > { %v9156_v59 = vpop.f32.mrf.mxu0 }
 0xded   : > { %v7199_v38 = vadd.f32 %v9156_v59, %v8419_v51 }
 0xdee   : > { %v7193_v56 = vpop.f32.mrf.mxu0 }
 0xdef   : > { %v7194_v6 = vadd.f32 %v8419_v51, %v7193_v56  ;;  %v7213_v35 = vsel %vm549_vm0, %v7199_v38, 0.0 }
 0xdf0   : > { %v9159_v25 = vpop.f32.mrf.mxu0 }
 0xdf1   : > { %v7212_v30 = vsel %vm549_vm0, %v7194_v6, 0.0  ;;  %v7209_v34 = vadd.f32 %v9159_v25, %v8419_v51 }
 0xdf2   : > { %v7203_v17 = vpop.f32.mrf.mxu0  ;;  %v7214_v19 = vadd.f32 %v7213_v35, %v7212_v30 }
 0xdf3   : > { %v7204_v62 = vadd.f32 %v8419_v51, %v7203_v17  ;;  %v7217_v8 = vsel %vm549_vm0, %v7209_v34, 0.0 }
 0xdf5   : > { %v7215_v5 = vsel %vm549_vm0, %v7204_v62, 0.0 }
 0xdf6   : > { %v7216_v54 = vadd.f32 %v7215_v5, %v7214_v19  ;;  %v9174_v44 = vpop.f32.mrf.mxu0 }
 0xdf7   : > { %v7537_v63 = vadd.f32 %v9174_v44, %v8445_v24 }
 0xdf8   : > { %v7218_v11 = vadd.f32 %v7217_v8, %v7216_v54  ;;  %v7531_v61 = vpop.f32.mrf.mxu0 }
 0xdf9   : > { %v7532_v2 = vadd.f32 %v8445_v24, %v7531_v61  ;;  %v7551_v53 = vmax.f32 %v7537_v63, 0.0 }
 0xdfa   : > { %v7219_v9 = vrot.slane %v7218_v11, 4  ;;  %v9177_v60 = vpop.f32.mrf.mxu0 }
 0xdfb   : > { %v7550_v52 = vmax.f32 %v7532_v2, 0.0  ;;  %v7547_v42 = vadd.f32 %v9177_v60, %v8445_v24 }
 0xdfc   : > { %v7220_v13 = vadd.f32 %v7219_v9, %v7218_v11  ;;  %v7541_v48 = vpop.f32.mrf.mxu0 }
 0xdfd   : > { %v7542_v0 = vadd.f32 %v8445_v24, %v7541_v48  ;;  %9182 = vmatprep.mubr.msk.f32.mxu1 %vm671_vm2, %v7550_v52  ;;  %v7553_v46 = vmax.f32 %v7547_v42, 0.0 }
 0xdfe   : > { %v7221_v18 = vrot.slane %v7220_v13, 2  ;;  %9183 = vmatmul.mubr.msk.f32.vlgmr.msra.gmra.mxu1 %vm671_vm2, %v7551_v53 }
 0xdff   : > { %v7552_v3 = vmax.f32 %v7542_v0, 0.0 }
 0xe00   : > { %v7222_v45 = vadd.f32 %v7221_v18, %v7220_v13 }
 0xe01   : > { %9185 = vmatprep.mubr.msk.f32.mxu1 %vm671_vm2, %v7552_v3 }
 0xe02   : > { %v7223_v55 = vrot.slane %v7222_v45, 1  ;;  %9186 = vmatmul.mubr.msk.f32.gmra.mxu1 %vm671_vm2, %v7553_v46 }
 0xe04   : > { %v7224_v12 = vadd.f32 %v7223_v55, %v7222_v45 }
 0xe06   : > { %v7225_v29 = vmul.f32 0.03125, %v7224_v12 }
 0xe08   : > { %v7226_v10 = vsub.f32 %v7194_v6, %v7225_v29  ;;  %v7227_v31 = vsub.f32 %v7199_v38, %v7225_v29  ;;  %v7228_v41 = vsub.f32 %v7204_v62, %v7225_v29  ;;  %v7229_v37 = vsub.f32 %v7209_v34, %v7225_v29  ;;  %v8454_v62 = vld [vmem:[%s9677_s16 + $0xf] ss:$0 sm:$0xff] }
 0xe0a   : > { %v7230_v50 = vmul.f32 %v7226_v10, %v7226_v10  ;;  %v7231_v26 = vmul.f32 %v7227_v31, %v7227_v31  ;;  %v7232_v27 = vmul.f32 %v7228_v41, %v7228_v41  ;;  %v7233_v39 = vmul.f32 %v7229_v37, %v7229_v37 }
 0xe0c   : > { %v7234_v47 = vsel %vm549_vm0, %v7230_v50, 0.0  ;;  %v7235_v1 = vsel %vm549_vm0, %v7231_v26, 0.0  ;;  %v7237_v14 = vsel %vm549_vm0, %v7232_v27, 0.0  ;;  %v7239_v15 = vsel %vm549_vm0, %v7233_v39, 0.0 }
 0xe0d   : > { %v7236_v4 = vadd.f32 %v7235_v1, %v7234_v47 }
 0xe0f   : > { %v7238_v7 = vadd.f32 %v7237_v14, %v7236_v4 }
 0xe11   : > { %v7240_v49 = vadd.f32 %v7239_v15, %v7238_v7 }
 0xe13   : > { %v7241_v57 = vrot.slane %v7240_v49, 4 }
 0xe15   : > { %v7242_v43 = vadd.f32 %v7241_v57, %v7240_v49 }
 0xe17   : > { %v7243_v28 = vrot.slane %v7242_v43, 2 }
 0xe19   : > { %v7244_v23 = vadd.f32 %v7243_v28, %v7242_v43 }
 0xe1b   : > { %v7245_v33 = vrot.slane %v7244_v23, 1 }
 0xe1d   : > { %v7246_v22 = vadd.f32 %v7245_v33, %v7244_v23 }
 0xe1f   : > { %v7247_v40 = vmul.f32 0.032258064, %v7246_v22 }
 0xe21   : > { %9303 = vrsqrt.f32 %v7247_v40  ;;  %vm7250_vm1 = vcmp.eq.f32.partialorder %v7247_v40, inf  ;;  %v7253_v36 = vand.u32 2147483648, %v7247_v40  ;;  %vm7252_vm2 = vcmp.eq.f32.partialorder %v7247_v40, 0.0 }
 0xe2e   : > { %v9304_v21 = vpop.eup %9303 }
 0xe2f   : > { %v7249_v58 = vmul.f32 %v9304_v21, %v7247_v40 }
 0xe31   : > { %v7251_v16 = vsel %vm7250_vm1, %v7247_v40, %v7249_v58 }
 0xe32   : > { %v7254_v32 = vsel %vm7252_vm2, %v7253_v36, %v7251_v16 }
 0xe33   : > { %v7255_v20 = vadd.f32 1e-05, %v7254_v32 }
 0xe35   : > { %9305 = vrcp.f32 %v7255_v20 }
 0xe42   : > { %v9306_v59 = vpop.eup %9305 }
 0xe43   : > { %v7258_v51 = vmul.f32 %v9306_v59, %v7227_v31  ;;  %v7257_v56 = vmul.f32 %v9306_v59, %v7226_v10  ;;  %v7259_v38 = vmul.f32 %v9306_v59, %v7228_v41  ;;  %v7260_v6 = vmul.f32 %v9306_v59, %v7229_v37 }
 0xe45   : > { %7267 = vrot.lane.b32.xlu1 %v7258_v51, %s9387_s25  ;;  %7265 = vrot.lane.b32.xlu0 %v7257_v56, %s9387_s25 }
 0xe49   : > { %7271 = vrot.lane.b32.xlu1 %v7260_v6, %s9387_s25  ;;  %7269 = vrot.lane.b32.xlu0 %v7259_v38, %s9387_s25  ;;  %s9315_s25 = sshll.u32 %s9389_s17, 4  ;;  %s9316_s25 = int_to_ptr.vmem [resolvable:$false] %s9315_s25 }
 0xe4a   : > { %p9318_p0 = scmp.lt.s32.totalorder %s10569_s28, %s9316_s25 }
 0xeb7   : > { %v7268_v25 = vpop.permute.xlu1 %7267  ;;  %v7266_v30 = vpop.permute.xlu0 %7265 }
 0xeb8   : > { %7279 = vst.msk [vmem:[%s9729_s22 + $0x8] sm:$0xff] %vm7277_vm5, %v7268_v25  ;;  %7278 = vst.msk [vmem:[%s9729_s22] sm:$0xff] %vm7277_vm5, %v7266_v30 }
 0xebb   : > { %v7272_v17 = vpop.permute.xlu1 %7271  ;;  %v7270_v35 = vpop.permute.xlu0 %7269 }
 0xebc   : > { %7281 = vst.msk [vmem:[%s9729_s22 + $0x18] sm:$0xff] %vm7277_vm5, %v7272_v17  ;;  %7280 = vst.msk [vmem:[%s9729_s22 + $0x10] sm:$0xff] %vm7277_vm5, %v7270_v35 }
 0xebe   : > { %v9184_v34 = vpop.f32.mrf.mxu1 }
 0xebf   : > { %v7652_v5 = vadd.f32 %v9184_v34, %v8454_v62 }
 0xec0   : > { %v7646_v19 = vpop.f32.mrf.mxu1 }
 0xec1   : > { %v7647_v24 = vadd.f32 %v8454_v62, %v7646_v19  ;;  %v7666_v11 = vsel %vm549_vm0, %v7652_v5, 0.0 }
 0xec2   : > { %v9187_v54 = vpop.f32.mrf.mxu1 }
 0xec3   : > { %v7665_v44 = vsel %vm549_vm0, %v7647_v24, 0.0  ;;  %v7662_v63 = vadd.f32 %v9187_v54, %v8454_v62 }
 0xec4   : > { %v7656_v8 = vpop.f32.mrf.mxu1  ;;  %v7667_v2 = vadd.f32 %v7666_v11, %v7665_v44 }
 0xec5   : > { %v7657_v61 = vadd.f32 %v8454_v62, %v7656_v8  ;;  %v7670_v52 = vsel %vm549_vm0, %v7662_v63, 0.0 }
 0xec7   : > { %v7668_v9 = vsel %vm549_vm0, %v7657_v61, 0.0 }
 0xec8   : > { %v7669_v60 = vadd.f32 %v7668_v9, %v7667_v2 }
 0xeca   : > { %v7671_v13 = vadd.f32 %v7670_v52, %v7669_v60 }
 0xecc   : > { %v7672_v53 = vrot.slane %v7671_v13, 4 }
 0xece   : > { %v7673_v42 = vadd.f32 %v7672_v53, %v7671_v13 }
 0xed0   : > { %v7674_v48 = vrot.slane %v7673_v42, 2 }
 0xed2   : > { %v7675_v0 = vadd.f32 %v7674_v48, %v7673_v42 }
 0xed4   : > { %v7676_v18 = vrot.slane %v7675_v0, 1 }
 0xed6   : > { %v7677_v3 = vadd.f32 %v7676_v18, %v7675_v0 }
 0xed8   : > { %v7678_v45 = vmul.f32 0.03125, %v7677_v3 }
 0xeda   : > { %v7679_v46 = vsub.f32 %v7647_v24, %v7678_v45  ;;  %v7680_v55 = vsub.f32 %v7652_v5, %v7678_v45  ;;  %v7681_v12 = vsub.f32 %v7657_v61, %v7678_v45  ;;  %v7682_v29 = vsub.f32 %v7662_v63, %v7678_v45 }
 0xedc   : > { %v7683_v10 = vmul.f32 %v7679_v46, %v7679_v46  ;;  %v7684_v31 = vmul.f32 %v7680_v55, %v7680_v55  ;;  %v7685_v41 = vmul.f32 %v7681_v12, %v7681_v12  ;;  %v7686_v37 = vmul.f32 %v7682_v29, %v7682_v29 }
 0xede   : > { %v7687_v50 = vsel %vm549_vm0, %v7683_v10, 0.0  ;;  %v7688_v26 = vsel %vm549_vm0, %v7684_v31, 0.0  ;;  %v7690_v39 = vsel %vm549_vm0, %v7685_v41, 0.0  ;;  %v7692_v1 = vsel %vm549_vm0, %v7686_v37, 0.0 }
 0xedf   : > { %v7689_v27 = vadd.f32 %v7688_v26, %v7687_v50  ;;  %vm7730_vm0 = vcmask 1048512  }
 0xee1   : > { %v7691_v47 = vadd.f32 %v7690_v39, %v7689_v27 }
 0xee3   : > { %v7693_v4 = vadd.f32 %v7692_v1, %v7691_v47 }
 0xee5   : > { %v7694_v14 = vrot.slane %v7693_v4, 4 }
 0xee7   : > { %v7695_v7 = vadd.f32 %v7694_v14, %v7693_v4 }
 0xee9   : > { %v7696_v15 = vrot.slane %v7695_v7, 2 }
 0xeeb   : > { %v7697_v49 = vadd.f32 %v7696_v15, %v7695_v7 }
 0xeed   : > { %v7698_v57 = vrot.slane %v7697_v49, 1 }
 0xeef   : > { %v7699_v43 = vadd.f32 %v7698_v57, %v7697_v49 }
 0xef1   : > { %v7700_v28 = vmul.f32 0.032258064, %v7699_v43 }
 0xef3   : > { %9307 = vrsqrt.f32 %v7700_v28  ;;  %vm7703_vm6 = vcmp.eq.f32.partialorder %v7700_v28, inf  ;;  %v7706_v22 = vand.u32 2147483648, %v7700_v28  ;;  %vm7705_vm7 = vcmp.eq.f32.partialorder %v7700_v28, 0.0 }
 0xf00   : > { %v9308_v23 = vpop.eup %9307 }
 0xf01   : > { %v7702_v33 = vmul.f32 %v9308_v23, %v7700_v28 }
 0xf03   : > { %v7704_v40 = vsel %vm7703_vm6, %v7700_v28, %v7702_v33 }
 0xf04   : > { %v7707_v21 = vsel %vm7705_vm7, %v7706_v22, %v7704_v40 }
 0xf05   : > { %v7708_v58 = vadd.f32 1e-05, %v7707_v21 }
 0xf07   : > { %9309 = vrcp.f32 %v7708_v58 }
 0xf14   : > { %v9310_v36 = vpop.eup %9309 }
 0xf15   : > { %v7711_v16 = vmul.f32 %v9310_v36, %v7680_v55  ;;  %v7710_v32 = vmul.f32 %v9310_v36, %v7679_v46  ;;  %v7712_v20 = vmul.f32 %v9310_v36, %v7681_v12  ;;  %v7713_v59 = vmul.f32 %v9310_v36, %v7682_v29 }
 0xf17   : > { %7720 = vrot.lane.b32.xlu1 %v7711_v16, %s9388_s14  ;;  %7718 = vrot.lane.b32.xlu0 %v7710_v32, %s9388_s14 }
 0xf1b   : > { %7724 = vrot.lane.b32.xlu1 %v7713_v59, %s9388_s14  ;;  %7722 = vrot.lane.b32.xlu0 %v7712_v20, %s9388_s14  ;;  %s9317_s14 = scalar_lea.vmem %s9316_s25, 1024 }
 0xf1c   : > { %p9319_p1 = scmp.lt.s32.totalorder %s9317_s14, %s9311_s26 }
 0xf1e   : > { %p9320_p2 = por %p9319_p1, %p9318_p0 }
 0xf20   : > { %p9321_p3 = pnand %p9320_p2, %p9314_p13 }
 0xf89   : > { %v7721_v51 = vpop.permute.xlu1 %7720  ;;  %v7719_v56 = vpop.permute.xlu0 %7718 }
 0xf8a   : > { %7732 = vst.msk [vmem:[%s9729_s22 + $0x8] sm:$0xff] %vm7730_vm0, %v7721_v51  ;;  %7731 = vst.msk [vmem:[%s9729_s22] sm:$0xff] %vm7730_vm0, %v7719_v56 }
 0xf8d   : > { %v7725_v38 = vpop.permute.xlu1 %7724  ;;  %v7723_v6 = vpop.permute.xlu0 %7722 }
 0xf8e   : > { %7734 = vst.msk [vmem:[%s9729_s22 + $0x18] sm:$0xff] %vm7730_vm0, %v7725_v38  ;;  %7733 = vst.msk [vmem:[%s9729_s22 + $0x10] sm:$0xff] %vm7730_vm0, %v7723_v6 }
 0xf8f   : > { %9324 = shalt.err (!%p9321_p3)
}
 0xf90   : > { %s9325_s21 = scalar_lea.hbm %s10567_s23, 512  ;;  %s9329_s29 = scalar_lea.hbm %s10625_s9, 2048 }
 0xf91   : > { %p9326_p4 = scmp.ne.s32.totalorder %s10567_s23, %s9325_s21  ;;  %p9330_p9 = scmp.lt.s32.totalorder %s10567_s23, %s10625_s9 }
 0xf92   : > { %p9331_p10 = scmp.lt.s32.totalorder %s9329_s29, %s9325_s21 }
 0xf93   : > { %p9327_p7 = pnand %p9326_p4, %p9480_p5 }
 0xf94   : > { %p9332_p11 = por %p9331_p10, %p9330_p9 }
 0xf95   : > { %p9328_p8 = pneg %p9327_p7 }
 0xf97   : > { %p9333_p12 = pnand %p9332_p11, %p9328_p8 }
 0xf99   : > { %9336 = shalt.err (!%p9333_p12)
}
 0xf9a   : > { %s9390_s26 = smov 128   ;;  %s9391_s25 = smov 512  }
 0xf9b   : > { %9188 = dma.vmem_to_hbm [thread:$0]  (%p9480_p5), %s10569_s28, 512, %s10567_s23, %s10575_s13, %s9390_s26, %s9391_s25, %s9374_s27  }
 0xf9c PF: > { %p9194_p13 = scmp.ge.s32.totalorder %s9371_s12, 2  ;;  %s7763_s14 = sand.u32 1, %s9359_s30  }
 0xf9d   : > { %s7764_s21 = scalar_lea.sflag [#allocation3], %s7763_s14 }
 0xf9e   : > { %p9191_p0 = pnand %p9194_p13, %p9484_p6 }
 0xfa0   : > { %p9192_p1 = pneg %p9191_p0 }
 0xfa2   : > { %9354 = dma.done.wait (%p9192_p1), %s7764_s21, 512  }
 0xfa3   : > { %9356 = vsyncadd (%p9192_p1), %s7764_s21, 4294966784  ;;  %p19_p2 = scmp.ge.s32.totalorder %s9467_s15, 6   ;;  %s10646_s30 = smov %s9363_s10 }
 0xfa4   : > { %s10647_s10 = smov %s9367_s11  ;;  %s10648_s11 = smov %s9478_s18 }
 0xfa5   : > { %s10649_s12 = smov %s9467_s15  ;;  %21 = sbr.rel (!%p19_p2) target bundleno = 3 (0x3), region = 250 }
 0xfaa   :  { %7769 = vsyncpa [#allocation3], 1 }
 0xfab   :  { %7771 = vsyncpa [#allocation3 + $0x1], 1 }

</bundles_post_ra>
